<compile_context>
chip_gen: v7x
topology: tpu7x:2x2x1
jax: 0.10.0
libtpu: 0.0.40
codegen_flags: <defaults>
</compile_context>

<pallas_src>
import functools

import jax
import jax.numpy as jnp
from jax.experimental import pallas as pl
from jax.experimental.pallas import tpu as pltpu

# MXU operand dtype (accumulation is always f32).
MATMUL_DTYPE = jnp.bfloat16


# ----------------------------------------------------------------------------
# Kernel A: fused conv tower (streamed block weights) + (policy|value) convs
# ----------------------------------------------------------------------------
def _tower_kernel(x_ref, win_ref, bin_ref, w1_ref, b1_ref, w2_ref, b2_ref,
                  whc_ref, bhc_ref,                 # fused head-conv weights
                  pol_ref, val_ref,                 # outputs
                  buf_a, buf_b, col_ref,            # VMEM scratch
                  *, H, W, TB, cin, feat, pol_ch):
    M = TB * H * W
    j = pl.program_id(1)                            # residual-block index

    def conv(buf_ref, c_l, w, b, relu_in):
        # im2col into VMEM scratch: columns ordered (tap, channel) to match the
        # (9*Cin, Cout) weight layout; then one MXU matmul (M x 9C x Cout).
        for t in range(9):
            kh, kw = t // 3, t % 3
            patch = buf_ref[:, kh:kh + H, kw:kw + W, :c_l]        # (TB,H,W,c_l)
            if relu_in:
                # relu(0) == 0, so applying it to the zero halo is harmless.
                patch = jnp.maximum(patch, 0.0)
            col_ref[:, t * c_l:(t + 1) * c_l] = (
                patch.reshape(M, c_l).astype(col_ref.dtype))
        p = col_ref[:, :9 * c_l]                                   # (M, 9*c_l) bf16
        return jnp.dot(p, w, preferred_element_type=jnp.float32) + b  # (M,Cout) f32

    def store_interior(buf_ref, y, c_out):
        buf_ref[:, 1:H + 1, 1:W + 1, :c_out] = y.reshape(TB, H, W, c_out)

    # ---- block 0: init halos, place input, run conv_in --------------------
    @pl.when(j == 0)
    def _():
        # Zero the padded buffers so the halo implements 'same' padding; the
        # halo is never written afterwards (only interiors are), so this is
        # needed only once per batch tile.
        buf_a[...] = jnp.zeros_like(buf_a)
        buf_b[...] = jnp.zeros_like(buf_b)
        buf_a[:, 1:H + 1, 1:W + 1, :cin] = x_ref[...]
        y = conv(buf_a, cin, win_ref[...], bin_ref[...], relu_in=False)
        store_interior(buf_b, y, feat)

    # ---- residual block j (weights streamed for this grid step) -----------
    y1 = conv(buf_b, feat, w1_ref[0], b1_ref[0], relu_in=True)   # relu -> conv1
    store_interior(buf_a, y1, feat)
    skip = buf_b[:, 1:H + 1, 1:W + 1, :feat].reshape(M, feat)    # pre-relu skip
    y2 = conv(buf_a, feat, w2_ref[0], b2_ref[0], relu_in=True)   # relu -> conv2
    store_interior(buf_b, y2 + skip, feat)                       # + skip

    # ---- last block: fused policy+value head conv, write outputs ----------
    @pl.when(j == pl.num_programs(1) - 1)
    def _():
        yh = conv(buf_b, feat, whc_ref[...], bhc_ref[...], relu_in=False)  # (M,P+8)

        # Policy: emit in torch NCHW-flatten (channel-major) order.
        pol_t = yh[:, :pol_ch].T                                  # (pol_ch, M)
        for n in range(TB):
            pol_ref[n] = pol_t[:, n * H * W:(n + 1) * H * W]      # (pol_ch, H*W)

        # Value conv output, NHWC-flat row order (value_fc rows pre-permuted).
        val_ref[...] = yh[:, pol_ch:pol_ch + 8].reshape(TB, H * W, 8)


# ----------------------------------------------------------------------------
# Kernel B: fused value_fc -> relu -> (wdl | mcts) heads
# ----------------------------------------------------------------------------
def _heads_kernel(v_ref, wfc_ref, bfc_ref, whd_ref, bhd_ref, wdl_ref, mcts_ref):
    v = jnp.maximum(v_ref[...], 0.0).astype(wfc_ref.dtype)        # ReLU after flatten
    h = jnp.dot(v, wfc_ref[...], preferred_element_type=jnp.float32) + bfc_ref[...]
    h = jnp.maximum(h, 0.0)                                       # ReLU
    o = jnp.dot(h.astype(whd_ref.dtype), whd_ref[...],
                preferred_element_type=jnp.float32) + bhd_ref[...]  # (N, 4)
    wdl_ref[...] = o[:, 0:3]
    mcts_ref[...] = jnp.tanh(o[:, 3:4])


# ----------------------------------------------------------------------------
# Wrappers
# ----------------------------------------------------------------------------
def _pick_batch_tile(n):
    for tb in (8, 4, 2, 1):
        if n % tb == 0:
            return tb
    return 1


def conv_tower_and_head_convs(x_nhwc, params, blocks, feat, pol_ch):
    assert blocks >= 1
    N, H, W, cin = x_nhwc.shape
    TB = _pick_batch_tile(N)
    grid = (N // TB, blocks)
    cmax = max(cin, feat)

    w_in, b_in = params["conv_in"]
    w1, b1, w2, b2 = params["blocks_stacked"]
    whc, bhc = params["head_conv"]

    kern = functools.partial(_tower_kernel, H=H, W=W, TB=TB, cin=cin,
                             feat=feat, pol_ch=pol_ch)

    in_specs = [
        # input: re-used across the block axis (index fixed in j -> one DMA/n)
        pl.BlockSpec((TB, H, W, cin), lambda n, j: (n, 0, 0, 0)),
        # conv_in / head weights: resident (index fixed -> DMA'd once)
        pl.BlockSpec(w_in.shape, lambda n, j: (0, 0)),
        pl.BlockSpec(b_in.shape, lambda n, j: (0, 0)),
        # per-block weights: streamed (double-buffered) along the block axis
        pl.BlockSpec((1,) + w1.shape[1:], lambda n, j: (j, 0, 0)),
        pl.BlockSpec((1,) + b1.shape[1:], lambda n, j: (j, 0, 0)),
        pl.BlockSpec((1,) + w2.shape[1:], lambda n, j: (j, 0, 0)),
        pl.BlockSpec((1,) + b2.shape[1:], lambda n, j: (j, 0, 0)),
        pl.BlockSpec(whc.shape, lambda n, j: (0, 0)),
        pl.BlockSpec(bhc.shape, lambda n, j: (0, 0)),
    ]
    # outputs stay VMEM-resident across the block axis, written at the last j
    out_specs = (pl.BlockSpec((TB, pol_ch, H * W), lambda n, j: (n, 0, 0)),
                 pl.BlockSpec((TB, H * W, 8), lambda n, j: (n, 0, 0)))
    out_shape = (jax.ShapeDtypeStruct((N, pol_ch, H * W), jnp.float32),
                 jax.ShapeDtypeStruct((N, H * W, 8), jnp.float32))
    scratch = [
        pltpu.VMEM((TB, H + 2, W + 2, cmax), jnp.float32),   # buf_a (padded)
        pltpu.VMEM((TB, H + 2, W + 2, feat), jnp.float32),   # buf_b (padded)
        pltpu.VMEM((TB * H * W, 9 * cmax), MATMUL_DTYPE),    # im2col slab
    ]
    return pl.pallas_call(
        kern, grid=grid,
        in_specs=in_specs, out_specs=out_specs, out_shape=out_shape,
        scratch_shapes=scratch,
        compiler_params=pltpu.CompilerParams(
            dimension_semantics=("parallel", "arbitrary")),
    )(x_nhwc, w_in, b_in, w1, b1, w2, b2, whc, bhc)


def value_policy_dense_heads(v_flat, params):
    N, din = v_flat.shape
    wfc, bfc = params["value_fc"]
    whd, bhd = params["head_fc"]
    out_shape = (jax.ShapeDtypeStruct((N, 3), jnp.float32),
                 jax.ShapeDtypeStruct((N, 1), jnp.float32))
    return pl.pallas_call(
        _heads_kernel, grid=(1,),
        in_specs=[pl.BlockSpec((N, din), lambda i: (0, 0)),
                  pl.BlockSpec(wfc.shape, lambda i: (0, 0)),
                  pl.BlockSpec(bfc.shape, lambda i: (0, 0)),
                  pl.BlockSpec(whd.shape, lambda i: (0, 0)),
                  pl.BlockSpec(bhd.shape, lambda i: (0, 0))],
        out_specs=(pl.BlockSpec((N, 3), lambda i: (0, 0)),
                   pl.BlockSpec((N, 1), lambda i: (0, 0))),
        out_shape=out_shape,
    )(v_flat, wfc, bfc, whd, bhd)


# ----------------------------------------------------------------------------
# Parameter construction (deterministic; mirrors the torch module's shapes)
# ----------------------------------------------------------------------------
def _oihw_to_matmul(w_oihw):
    """(Cout,Cin,3,3) torch conv weight -> (9*Cin, Cout), rows = (kh*3+kw)*Cin+c."""
    cout, cin = w_oihw.shape[0], w_oihw.shape[1]
    return jnp.transpose(w_oihw, (2, 3, 1, 0)).reshape(9 * cin, cout)


def init_params(key, blocks, feature_count, input_channels, policy_channels,
                H=8, W=8):
    assert blocks >= 1
    assert H == 8 and W == 8, "value head Linear expects 8*8*8 inputs"
    md = MATMUL_DTYPE
    keys = jax.random.split(key, 6 + 2 * blocks)

    def conv_params(k, cin, cout, w_scale=1.0):
        k1, k2 = jax.random.split(k)
        w_oihw = jax.random.normal(k1, (cout, cin, 3, 3), jnp.float32) * 0.05
        b = jax.random.normal(k2, (cout,), jnp.float32) * 0.05
        w = _oihw_to_matmul(w_oihw * w_scale)    # weight-only scale (as in torch)
        return w.astype(md), b.reshape(1, cout)

    params = {}
    params["conv_in"] = conv_params(keys[0], input_channels, feature_count)

    w1s, b1s, w2s, b2s = [], [], [], []
    for i in range(blocks):
        w1, b1 = conv_params(keys[1 + 2 * i], feature_count, feature_count)
        w2, b2 = conv_params(keys[2 + 2 * i], feature_count, feature_count,
                             w_scale=0.001)      # mirrors conv2.weight *= 0.001
        w1s.append(w1); b1s.append(b1); w2s.append(w2); b2s.append(b2)
    params["blocks_stacked"] = (jnp.stack(w1s), jnp.stack(b1s),
                                jnp.stack(w2s), jnp.stack(b2s))

    k = 1 + 2 * blocks
    wp, bp = conv_params(keys[k], feature_count, policy_channels)
    wv, bv = conv_params(keys[k + 1], feature_count, 8)
    params["head_conv"] = (jnp.concatenate([wp, wv], axis=1),
                           jnp.concatenate([bp, bv], axis=1))

    # value_fc: torch Linear(8*H*W, 64).  Permute its rows so it consumes the
    # kernel's NHWC-flat order (h,w,c) directly (no runtime transpose).
    k1, k2 = jax.random.split(keys[k + 2])
    wfc_torch = jax.random.normal(k1, (64, 8 * H * W), jnp.float32) * 0.05  # (out,in)
    bfc = jax.random.normal(k2, (64,), jnp.float32) * 0.05
    idx = jnp.arange(8 * H * W)
    hw, c = idx // 8, idx % 8
    perm = c * (H * W) + hw                 # NHWC-flat row i <- torch row perm[i]
    wfc = wfc_torch.T[perm, :]
    params["value_fc"] = (wfc.astype(md), bfc.reshape(1, 64))

    # wdl (64->3) and mcts (64->1) fused into one (64,4) matmul.
    k1, k2 = jax.random.split(keys[k + 3])
    k3, k4 = jax.random.split(keys[k + 4])
    wdl_w = jax.random.normal(k1, (3, 64), jnp.float32) * 0.05
    wdl_b = jax.random.normal(k2, (3,), jnp.float32) * 0.05
    mv_w = jax.random.normal(k3, (1, 64), jnp.float32) * 0.05
    mv_b = jax.random.normal(k4, (1,), jnp.float32) * 0.05
    whd = jnp.concatenate([wdl_w.T, mv_w.T], axis=1)
    bhd = jnp.concatenate([wdl_b, mv_b]).reshape(1, 4)
    params["head_fc"] = (whd.astype(md), bhd)
    return params


# ----------------------------------------------------------------------------
# Forward pass (matches Network.forward)
# ----------------------------------------------------------------------------
def network_forward(params, x_nchw):
    N, _, H, W = x_nchw.shape
    feat = params["conv_in"][0].shape[1]
    pol_ch = params["head_conv"][0].shape[1] - 8
    blocks = params["blocks_stacked"][0].shape[0]

    x = jnp.transpose(x_nchw, (0, 2, 3, 1))       # NCHW -> NHWC (tiny, once)

    pol, val = conv_tower_and_head_convs(x, params, blocks, feat, pol_ch)
    policy = pol.reshape(N, pol_ch * H * W)       # already torch channel-major order
    v_flat = val.reshape(N, H * W * 8)            # NHWC-flat; fc rows permuted to match

    wdl, mcts = value_policy_dense_heads(v_flat, params)
    return policy, wdl, mcts


# ----------------------------------------------------------------------------
if __name__ == "__main__":
    # Small config consistent with the module (spatial MUST be 8x8: the value
    # head Linear expects 8*8*8 features).
    blocks, feature_count, input_channels, policy_channels = 2, 32, 8, 16
    N, H, W = 2, 8, 8

    key = jax.random.PRNGKey(0)
    kp, kx = jax.random.split(key)
    params = init_params(kp, blocks, feature_count, input_channels, policy_channels)
    x = jax.random.normal(kx, (N, input_channels, H, W), jnp.float32)  # NCHW like torch

    fwd = jax.jit(network_forward)
    policy, wdl, mcts_value = fwd(params, x)
    jax.block_until_ready((policy, wdl, mcts_value))

    assert policy.shape == (N, policy_channels * H * W)
    assert wdl.shape == (N, 3)
    assert mcts_value.shape == (N, 1)
    assert bool(jnp.all(jnp.isfinite(policy)))
    assert bool(jnp.all(jnp.isfinite(wdl)))
    assert bool(jnp.all(jnp.abs(mcts_value) <= 1.0))
    print("KERNEL_OK")
</pallas_src>

<mosaic_0001>
module attributes {stable_mosaic.version = 11 : i64} {
  func.func @_tower_kernel(%arg0: i32, %arg1: i32, %arg2: memref<2x8x8x8xf32, #tpu.memory_space<vmem>>, %arg3: memref<72x32xbf16, #tpu.memory_space<vmem>>, %arg4: memref<1x32xf32, #tpu.memory_space<vmem>>, %arg5: memref<1x288x32xbf16, #tpu.memory_space<vmem>>, %arg6: memref<1x1x32xf32, #tpu.memory_space<vmem>>, %arg7: memref<1x288x32xbf16, #tpu.memory_space<vmem>>, %arg8: memref<1x1x32xf32, #tpu.memory_space<vmem>>, %arg9: memref<288x24xbf16, #tpu.memory_space<vmem>>, %arg10: memref<1x24xf32, #tpu.memory_space<vmem>>, %arg11: memref<2x16x64xf32, #tpu.memory_space<vmem>>, %arg12: memref<2x64x8xf32, #tpu.memory_space<vmem>>, %arg13: memref<2x10x10x32xf32, #tpu.memory_space<vmem>>, %arg14: memref<2x10x10x32xf32, #tpu.memory_space<vmem>>, %arg15: memref<128x288xbf16, #tpu.memory_space<vmem>>) attributes {dimension_semantics = [#tpu.dimension_semantics<parallel>, #tpu.dimension_semantics<arbitrary>], iteration_bounds = array<i64: 1, 2>, scalar_prefetch = 0 : i64, scratch_operands = 3 : i64, tpu.core_type = #tpu.core_type<tc>, window_params = [{transform_indices = @transform_0, window_bounds = array<i64: 2, 8, 8, 8>}, {pipeline_mode = #tpu.pipeline_mode<synchronous>, transform_indices = @transform_1, window_bounds = array<i64: 72, 32>}, {pipeline_mode = #tpu.pipeline_mode<synchronous>, transform_indices = @transform_2, window_bounds = array<i64: 1, 32>}, {transform_indices = @transform_3, window_bounds = array<i64: 1, 288, 32>}, {transform_indices = @transform_4, window_bounds = array<i64: 1, 1, 32>}, {transform_indices = @transform_5, window_bounds = array<i64: 1, 288, 32>}, {transform_indices = @transform_6, window_bounds = array<i64: 1, 1, 32>}, {pipeline_mode = #tpu.pipeline_mode<synchronous>, transform_indices = @transform_7, window_bounds = array<i64: 288, 24>}, {pipeline_mode = #tpu.pipeline_mode<synchronous>, transform_indices = @transform_8, window_bounds = array<i64: 1, 24>}, {transform_indices = @transform_9, window_bounds = array<i64: 2, 16, 64>}, {transform_indices = @transform_10, window_bounds = array<i64: 2, 64, 8>}]} {
    %c0_i32 = arith.constant 0 : i32
    %0 = arith.cmpi eq, %arg1, %c0_i32 : i32
    %1 = arith.extui %0 : i1 to i32
    %c0_i32_0 = arith.constant 0 : i32
    %2 = arith.cmpi ne, %1, %c0_i32_0 : i32
    scf.if %2 {
      %cst_146 = arith.constant 0.000000e+00 : f32
      %137 = vector.broadcast %cst_146 : f32 to vector<2x10x10x32xf32>
      %c0_147 = arith.constant 0 : index
      %c0_148 = arith.constant 0 : index
      %c0_149 = arith.constant 0 : index
      %c0_150 = arith.constant 0 : index
      %138 = vector.load %arg13[%c0_147, %c0_148, %c0_149, %c0_150] : memref<2x10x10x32xf32, #tpu.memory_space<vmem>>, vector<2x10x10x32xf32>
      tpu.vector_store %arg13[%c0_147, %c0_148, %c0_149, %c0_150], %137 {strides = array<i32>} : memref<2x10x10x32xf32, #tpu.memory_space<vmem>>, vector<2x10x10x32xf32>,
      %cst_151 = arith.constant 0.000000e+00 : f32
      %139 = vector.broadcast %cst_151 : f32 to vector<2x10x10x32xf32>
      %c0_152 = arith.constant 0 : index
      %c0_153 = arith.constant 0 : index
      %c0_154 = arith.constant 0 : index
      %c0_155 = arith.constant 0 : index
      %140 = vector.load %arg14[%c0_152, %c0_153, %c0_154, %c0_155] : memref<2x10x10x32xf32, #tpu.memory_space<vmem>>, vector<2x10x10x32xf32>
      tpu.vector_store %arg14[%c0_152, %c0_153, %c0_154, %c0_155], %139 {strides = array<i32>} : memref<2x10x10x32xf32, #tpu.memory_space<vmem>>, vector<2x10x10x32xf32>,
      %c0_156 = arith.constant 0 : index
      %c0_157 = arith.constant 0 : index
      %c0_158 = arith.constant 0 : index
      %c0_159 = arith.constant 0 : index
      %141 = vector.load %arg2[%c0_156, %c0_157, %c0_158, %c0_159] : memref<2x8x8x8xf32, #tpu.memory_space<vmem>>, vector<2x8x8x8xf32>
      %c0_160 = arith.constant 0 : index
      %c1_161 = arith.constant 1 : index
      %c1_162 = arith.constant 1 : index
      %c0_163 = arith.constant 0 : index
      %142 = vector.load %arg13[%c0_160, %c1_161, %c1_162, %c0_163] : memref<2x10x10x32xf32, #tpu.memory_space<vmem>>, vector<2x8x8x8xf32>
      tpu.vector_store %arg13[%c0_160, %c1_161, %c1_162, %c0_163], %141 {strides = array<i32>} : memref<2x10x10x32xf32, #tpu.memory_space<vmem>>, vector<2x8x8x8xf32>,
      %c0_164 = arith.constant 0 : index
      %c0_165 = arith.constant 0 : index
      %143 = vector.load %arg3[%c0_164, %c0_165] : memref<72x32xbf16, #tpu.memory_space<vmem>>, vector<72x32xbf16>
      %c0_166 = arith.constant 0 : index
      %c0_167 = arith.constant 0 : index
      %144 = vector.load %arg4[%c0_166, %c0_167] : memref<1x32xf32, #tpu.memory_space<vmem>>, vector<1x32xf32>
      %c0_168 = arith.constant 0 : index
      %c0_169 = arith.constant 0 : index
      %c0_170 = arith.constant 0 : index
      %c0_171 = arith.constant 0 : index
      %145 = vector.load %arg13[%c0_168, %c0_169, %c0_170, %c0_171] : memref<2x10x10x32xf32, #tpu.memory_space<vmem>>, vector<2x8x8x8xf32>
      %146 = vector.shape_cast %145 : vector<2x8x8x8xf32> to vector<128x8xf32>
      %147 = arith.truncf %146 : vector<128x8xf32> to vector<128x8xbf16>
      %c0_172 = arith.constant 0 : index
      %c0_173 = arith.constant 0 : index
      %148 = vector.load %arg15[%c0_172, %c0_173] : memref<128x288xbf16, #tpu.memory_space<vmem>>, vector<128x8xbf16>
      tpu.vector_store %arg15[%c0_172, %c0_173], %147 {strides = array<i32>} : memref<128x288xbf16, #tpu.memory_space<vmem>>, vector<128x8xbf16>,
      %c0_174 = arith.constant 0 : index
      %c0_175 = arith.constant 0 : index
      %c1_176 = arith.constant 1 : index
      %c0_177 = arith.constant 0 : index
      %149 = vector.load %arg13[%c0_174, %c0_175, %c1_176, %c0_177] : memref<2x10x10x32xf32, #tpu.memory_space<vmem>>, vector<2x8x8x8xf32>
      %150 = vector.shape_cast %149 : vector<2x8x8x8xf32> to vector<128x8xf32>
      %151 = arith.truncf %150 : vector<128x8xf32> to vector<128x8xbf16>
      %c0_178 = arith.constant 0 : index
      %c8 = arith.constant 8 : index
      %152 = vector.load %arg15[%c0_178, %c8] : memref<128x288xbf16, #tpu.memory_space<vmem>>, vector<128x8xbf16>
      tpu.vector_store %arg15[%c0_178, %c8], %151 {strides = array<i32>} : memref<128x288xbf16, #tpu.memory_space<vmem>>, vector<128x8xbf16>,
      %c0_179 = arith.constant 0 : index
      %c0_180 = arith.constant 0 : index
      %c2_181 = arith.constant 2 : index
      %c0_182 = arith.constant 0 : index
      %153 = vector.load %arg13[%c0_179, %c0_180, %c2_181, %c0_182] : memref<2x10x10x32xf32, #tpu.memory_space<vmem>>, vector<2x8x8x8xf32>
      %154 = vector.shape_cast %153 : vector<2x8x8x8xf32> to vector<128x8xf32>
      %155 = arith.truncf %154 : vector<128x8xf32> to vector<128x8xbf16>
      %c0_183 = arith.constant 0 : index
      %c16 = arith.constant 16 : index
      %156 = vector.load %arg15[%c0_183, %c16] : memref<128x288xbf16, #tpu.memory_space<vmem>>, vector<128x8xbf16>
      tpu.vector_store %arg15[%c0_183, %c16], %155 {strides = array<i32>} : memref<128x288xbf16, #tpu.memory_space<vmem>>, vector<128x8xbf16>,
      %c0_184 = arith.constant 0 : index
      %c1_185 = arith.constant 1 : index
      %c0_186 = arith.constant 0 : index
      %c0_187 = arith.constant 0 : index
      %157 = vector.load %arg13[%c0_184, %c1_185, %c0_186, %c0_187] : memref<2x10x10x32xf32, #tpu.memory_space<vmem>>, vector<2x8x8x8xf32>
      %158 = vector.shape_cast %157 : vector<2x8x8x8xf32> to vector<128x8xf32>
      %159 = arith.truncf %158 : vector<128x8xf32> to vector<128x8xbf16>
      %c0_188 = arith.constant 0 : index
      %c24 = arith.constant 24 : index
      %160 = vector.load %arg15[%c0_188, %c24] : memref<128x288xbf16, #tpu.memory_space<vmem>>, vector<128x8xbf16>
      tpu.vector_store %arg15[%c0_188, %c24], %159 {strides = array<i32>} : memref<128x288xbf16, #tpu.memory_space<vmem>>, vector<128x8xbf16>,
      %c0_189 = arith.constant 0 : index
      %c1_190 = arith.constant 1 : index
      %c1_191 = arith.constant 1 : index
      %c0_192 = arith.constant 0 : index
      %161 = vector.load %arg13[%c0_189, %c1_190, %c1_191, %c0_192] : memref<2x10x10x32xf32, #tpu.memory_space<vmem>>, vector<2x8x8x8xf32>
      %162 = vector.shape_cast %161 : vector<2x8x8x8xf32> to vector<128x8xf32>
      %163 = arith.truncf %162 : vector<128x8xf32> to vector<128x8xbf16>
      %c0_193 = arith.constant 0 : index
      %c32_194 = arith.constant 32 : index
      %164 = vector.load %arg15[%c0_193, %c32_194] : memref<128x288xbf16, #tpu.memory_space<vmem>>, vector<128x8xbf16>
      tpu.vector_store %arg15[%c0_193, %c32_194], %163 {strides = array<i32>} : memref<128x288xbf16, #tpu.memory_space<vmem>>, vector<128x8xbf16>,
      %c0_195 = arith.constant 0 : index
      %c1_196 = arith.constant 1 : index
      %c2_197 = arith.constant 2 : index
      %c0_198 = arith.constant 0 : index
      %165 = vector.load %arg13[%c0_195, %c1_196, %c2_197, %c0_198] : memref<2x10x10x32xf32, #tpu.memory_space<vmem>>, vector<2x8x8x8xf32>
      %166 = vector.shape_cast %165 : vector<2x8x8x8xf32> to vector<128x8xf32>
      %167 = arith.truncf %166 : vector<128x8xf32> to vector<128x8xbf16>
      %c0_199 = arith.constant 0 : index
      %c40 = arith.constant 40 : index
      %168 = vector.load %arg15[%c0_199, %c40] : memref<128x288xbf16, #tpu.memory_space<vmem>>, vector<128x8xbf16>
      tpu.vector_store %arg15[%c0_199, %c40], %167 {strides = array<i32>} : memref<128x288xbf16, #tpu.memory_space<vmem>>, vector<128x8xbf16>,
      %c0_200 = arith.constant 0 : index
      %c2_201 = arith.constant 2 : index
      %c0_202 = arith.constant 0 : index
      %c0_203 = arith.constant 0 : index
      %169 = vector.load %arg13[%c0_200, %c2_201, %c0_202, %c0_203] : memref<2x10x10x32xf32, #tpu.memory_space<vmem>>, vector<2x8x8x8xf32>
      %170 = vector.shape_cast %169 : vector<2x8x8x8xf32> to vector<128x8xf32>
      %171 = arith.truncf %170 : vector<128x8xf32> to vector<128x8xbf16>
      %c0_204 = arith.constant 0 : index
      %c48 = arith.constant 48 : index
      %172 = vector.load %arg15[%c0_204, %c48] : memref<128x288xbf16, #tpu.memory_space<vmem>>, vector<128x8xbf16>
      tpu.vector_store %arg15[%c0_204, %c48], %171 {strides = array<i32>} : memref<128x288xbf16, #tpu.memory_space<vmem>>, vector<128x8xbf16>,
      %c0_205 = arith.constant 0 : index
      %c2_206 = arith.constant 2 : index
      %c1_207 = arith.constant 1 : index
      %c0_208 = arith.constant 0 : index
      %173 = vector.load %arg13[%c0_205, %c2_206, %c1_207, %c0_208] : memref<2x10x10x32xf32, #tpu.memory_space<vmem>>, vector<2x8x8x8xf32>
      %174 = vector.shape_cast %173 : vector<2x8x8x8xf32> to vector<128x8xf32>
      %175 = arith.truncf %174 : vector<128x8xf32> to vector<128x8xbf16>
      %c0_209 = arith.constant 0 : index
      %c56 = arith.constant 56 : index
      %176 = vector.load %arg15[%c0_209, %c56] : memref<128x288xbf16, #tpu.memory_space<vmem>>, vector<128x8xbf16>
      tpu.vector_store %arg15[%c0_209, %c56], %175 {strides = array<i32>} : memref<128x288xbf16, #tpu.memory_space<vmem>>, vector<128x8xbf16>,
      %c0_210 = arith.constant 0 : index
      %c2_211 = arith.constant 2 : index
      %c2_212 = arith.constant 2 : index
      %c0_213 = arith.constant 0 : index
      %177 = vector.load %arg13[%c0_210, %c2_211, %c2_212, %c0_213] : memref<2x10x10x32xf32, #tpu.memory_space<vmem>>, vector<2x8x8x8xf32>
      %178 = vector.shape_cast %177 : vector<2x8x8x8xf32> to vector<128x8xf32>
      %179 = arith.truncf %178 : vector<128x8xf32> to vector<128x8xbf16>
      %c0_214 = arith.constant 0 : index
      %c64_215 = arith.constant 64 : index
      %180 = vector.load %arg15[%c0_214, %c64_215] : memref<128x288xbf16, #tpu.memory_space<vmem>>, vector<128x8xbf16>
      tpu.vector_store %arg15[%c0_214, %c64_215], %179 {strides = array<i32>} : memref<128x288xbf16, #tpu.memory_space<vmem>>, vector<128x8xbf16>,
      %c0_216 = arith.constant 0 : index
      %c0_217 = arith.constant 0 : index
      %181 = vector.load %arg15[%c0_216, %c0_217] : memref<128x288xbf16, #tpu.memory_space<vmem>>, vector<128x72xbf16>
      %cst_218 = arith.constant dense<0.000000e+00> : vector<128x32xf32>
      %182 = tpu.matmul %181, %143, %cst_218 {dimension_numbers = #tpu.dot_dimension_numbers<[1], [0], [0], [1], [0, 0, 1, 1], [], []>} : vector<128x72xbf16>, vector<72x32xbf16>, vector<128x32xf32> -> vector<128x32xf32>
      %183 = vector.broadcast %144 : vector<1x32xf32> to vector<128x32xf32>
      %184 = arith.addf %182, %183 : vector<128x32xf32>
      %185 = vector.shape_cast %184 : vector<128x32xf32> to vector<2x8x8x32xf32>
      %c0_219 = arith.constant 0 : index
      %c1_220 = arith.constant 1 : index
      %c1_221 = arith.constant 1 : index
      %c0_222 = arith.constant 0 : index
      %186 = vector.load %arg14[%c0_219, %c1_220, %c1_221, %c0_222] : memref<2x10x10x32xf32, #tpu.memory_space<vmem>>, vector<2x8x8x32xf32>
      tpu.vector_store %arg14[%c0_219, %c1_220, %c1_221, %c0_222], %185 {strides = array<i32>} : memref<2x10x10x32xf32, #tpu.memory_space<vmem>>, vector<2x8x8x32xf32>,
    } else {
    }
    %c0 = arith.constant 0 : index
    %c0_1 = arith.constant 0 : index
    %c0_2 = arith.constant 0 : index
    %3 = vector.load %arg5[%c0, %c0_1, %c0_2] : memref<1x288x32xbf16, #tpu.memory_space<vmem>>, vector<1x288x32xbf16>
    %4 = vector.shape_cast %3 : vector<1x288x32xbf16> to vector<288x32xbf16>
    %c0_3 = arith.constant 0 : index
    %c0_4 = arith.constant 0 : index
    %c0_5 = arith.constant 0 : index
    %5 = vector.load %arg6[%c0_3, %c0_4, %c0_5] : memref<1x1x32xf32, #tpu.memory_space<vmem>>, vector<1x1x32xf32>
    %6 = vector.shape_cast %5 : vector<1x1x32xf32> to vector<1x32xf32>
    %c0_6 = arith.constant 0 : index
    %c0_7 = arith.constant 0 : index
    %c0_8 = arith.constant 0 : index
    %c0_9 = arith.constant 0 : index
    %7 = vector.load %arg14[%c0_6, %c0_7, %c0_8, %c0_9] : memref<2x10x10x32xf32, #tpu.memory_space<vmem>>, vector<2x8x8x32xf32>
    %cst = arith.constant 0.000000e+00 : f32
    %8 = vector.broadcast %cst : f32 to vector<2x8x8x32xf32>
    %9 = arith.maximumf %7, %8 : vector<2x8x8x32xf32>
    %10 = vector.shape_cast %9 : vector<2x8x8x32xf32> to vector<128x32xf32>
    %11 = arith.truncf %10 : vector<128x32xf32> to vector<128x32xbf16>
    %c0_10 = arith.constant 0 : index
    %c0_11 = arith.constant 0 : index
    %12 = vector.load %arg15[%c0_10, %c0_11] : memref<128x288xbf16, #tpu.memory_space<vmem>>, vector<128x32xbf16>
    tpu.vector_store %arg15[%c0_10, %c0_11], %11 {strides = array<i32>} : memref<128x288xbf16, #tpu.memory_space<vmem>>, vector<128x32xbf16>,
    %c0_12 = arith.constant 0 : index
    %c0_13 = arith.constant 0 : index
    %c1 = arith.constant 1 : index
    %c0_14 = arith.constant 0 : index
    %13 = vector.load %arg14[%c0_12, %c0_13, %c1, %c0_14] : memref<2x10x10x32xf32, #tpu.memory_space<vmem>>, vector<2x8x8x32xf32>
    %cst_15 = arith.constant 0.000000e+00 : f32
    %14 = vector.broadcast %cst_15 : f32 to vector<2x8x8x32xf32>
    %15 = arith.maximumf %13, %14 : vector<2x8x8x32xf32>
    %16 = vector.shape_cast %15 : vector<2x8x8x32xf32> to vector<128x32xf32>
    %17 = arith.truncf %16 : vector<128x32xf32> to vector<128x32xbf16>
    %c0_16 = arith.constant 0 : index
    %c32 = arith.constant 32 : index
    %18 = vector.load %arg15[%c0_16, %c32] : memref<128x288xbf16, #tpu.memory_space<vmem>>, vector<128x32xbf16>
    tpu.vector_store %arg15[%c0_16, %c32], %17 {strides = array<i32>} : memref<128x288xbf16, #tpu.memory_space<vmem>>, vector<128x32xbf16>,
    %c0_17 = arith.constant 0 : index
    %c0_18 = arith.constant 0 : index
    %c2 = arith.constant 2 : index
    %c0_19 = arith.constant 0 : index
    %19 = vector.load %arg14[%c0_17, %c0_18, %c2, %c0_19] : memref<2x10x10x32xf32, #tpu.memory_space<vmem>>, vector<2x8x8x32xf32>
    %cst_20 = arith.constant 0.000000e+00 : f32
    %20 = vector.broadcast %cst_20 : f32 to vector<2x8x8x32xf32>
    %21 = arith.maximumf %19, %20 : vector<2x8x8x32xf32>
    %22 = vector.shape_cast %21 : vector<2x8x8x32xf32> to vector<128x32xf32>
    %23 = arith.truncf %22 : vector<128x32xf32> to vector<128x32xbf16>
    %c0_21 = arith.constant 0 : index
    %c64 = arith.constant 64 : index
    %24 = vector.load %arg15[%c0_21, %c64] : memref<128x288xbf16, #tpu.memory_space<vmem>>, vector<128x32xbf16>
    tpu.vector_store %arg15[%c0_21, %c64], %23 {strides = array<i32>} : memref<128x288xbf16, #tpu.memory_space<vmem>>, vector<128x32xbf16>,
    %c0_22 = arith.constant 0 : index
    %c1_23 = arith.constant 1 : index
    %c0_24 = arith.constant 0 : index
    %c0_25 = arith.constant 0 : index
    %25 = vector.load %arg14[%c0_22, %c1_23, %c0_24, %c0_25] : memref<2x10x10x32xf32, #tpu.memory_space<vmem>>, vector<2x8x8x32xf32>
    %cst_26 = arith.constant 0.000000e+00 : f32
    %26 = vector.broadcast %cst_26 : f32 to vector<2x8x8x32xf32>
    %27 = arith.maximumf %25, %26 : vector<2x8x8x32xf32>
    %28 = vector.shape_cast %27 : vector<2x8x8x32xf32> to vector<128x32xf32>
    %29 = arith.truncf %28 : vector<128x32xf32> to vector<128x32xbf16>
    %c0_27 = arith.constant 0 : index
    %c96 = arith.constant 96 : index
    %30 = vector.load %arg15[%c0_27, %c96] : memref<128x288xbf16, #tpu.memory_space<vmem>>, vector<128x32xbf16>
    tpu.vector_store %arg15[%c0_27, %c96], %29 {strides = array<i32>} : memref<128x288xbf16, #tpu.memory_space<vmem>>, vector<128x32xbf16>,
    %c0_28 = arith.constant 0 : index
    %c1_29 = arith.constant 1 : index
    %c1_30 = arith.constant 1 : index
    %c0_31 = arith.constant 0 : index
    %31 = vector.load %arg14[%c0_28, %c1_29, %c1_30, %c0_31] : memref<2x10x10x32xf32, #tpu.memory_space<vmem>>, vector<2x8x8x32xf32>
    %cst_32 = arith.constant 0.000000e+00 : f32
    %32 = vector.broadcast %cst_32 : f32 to vector<2x8x8x32xf32>
    %33 = arith.maximumf %31, %32 : vector<2x8x8x32xf32>
    %34 = vector.shape_cast %33 : vector<2x8x8x32xf32> to vector<128x32xf32>
    %35 = arith.truncf %34 : vector<128x32xf32> to vector<128x32xbf16>
    %c0_33 = arith.constant 0 : index
    %c128 = arith.constant 128 : index
    %36 = vector.load %arg15[%c0_33, %c128] : memref<128x288xbf16, #tpu.memory_space<vmem>>, vector<128x32xbf16>
    tpu.vector_store %arg15[%c0_33, %c128], %35 {strides = array<i32>} : memref<128x288xbf16, #tpu.memory_space<vmem>>, vector<128x32xbf16>,
    %c0_34 = arith.constant 0 : index
    %c1_35 = arith.constant 1 : index
    %c2_36 = arith.constant 2 : index
    %c0_37 = arith.constant 0 : index
    %37 = vector.load %arg14[%c0_34, %c1_35, %c2_36, %c0_37] : memref<2x10x10x32xf32, #tpu.memory_space<vmem>>, vector<2x8x8x32xf32>
    %cst_38 = arith.constant 0.000000e+00 : f32
    %38 = vector.broadcast %cst_38 : f32 to vector<2x8x8x32xf32>
    %39 = arith.maximumf %37, %38 : vector<2x8x8x32xf32>
    %40 = vector.shape_cast %39 : vector<2x8x8x32xf32> to vector<128x32xf32>
    %41 = arith.truncf %40 : vector<128x32xf32> to vector<128x32xbf16>
    %c0_39 = arith.constant 0 : index
    %c160 = arith.constant 160 : index
    %42 = vector.load %arg15[%c0_39, %c160] : memref<128x288xbf16, #tpu.memory_space<vmem>>, vector<128x32xbf16>
    tpu.vector_store %arg15[%c0_39, %c160], %41 {strides = array<i32>} : memref<128x288xbf16, #tpu.memory_space<vmem>>, vector<128x32xbf16>,
    %c0_40 = arith.constant 0 : index
    %c2_41 = arith.constant 2 : index
    %c0_42 = arith.constant 0 : index
    %c0_43 = arith.constant 0 : index
    %43 = vector.load %arg14[%c0_40, %c2_41, %c0_42, %c0_43] : memref<2x10x10x32xf32, #tpu.memory_space<vmem>>, vector<2x8x8x32xf32>
    %cst_44 = arith.constant 0.000000e+00 : f32
    %44 = vector.broadcast %cst_44 : f32 to vector<2x8x8x32xf32>
    %45 = arith.maximumf %43, %44 : vector<2x8x8x32xf32>
    %46 = vector.shape_cast %45 : vector<2x8x8x32xf32> to vector<128x32xf32>
    %47 = arith.truncf %46 : vector<128x32xf32> to vector<128x32xbf16>
    %c0_45 = arith.constant 0 : index
    %c192 = arith.constant 192 : index
    %48 = vector.load %arg15[%c0_45, %c192] : memref<128x288xbf16, #tpu.memory_space<vmem>>, vector<128x32xbf16>
    tpu.vector_store %arg15[%c0_45, %c192], %47 {strides = array<i32>} : memref<128x288xbf16, #tpu.memory_space<vmem>>, vector<128x32xbf16>,
    %c0_46 = arith.constant 0 : index
    %c2_47 = arith.constant 2 : index
    %c1_48 = arith.constant 1 : index
    %c0_49 = arith.constant 0 : index
    %49 = vector.load %arg14[%c0_46, %c2_47, %c1_48, %c0_49] : memref<2x10x10x32xf32, #tpu.memory_space<vmem>>, vector<2x8x8x32xf32>
    %cst_50 = arith.constant 0.000000e+00 : f32
    %50 = vector.broadcast %cst_50 : f32 to vector<2x8x8x32xf32>
    %51 = arith.maximumf %49, %50 : vector<2x8x8x32xf32>
    %52 = vector.shape_cast %51 : vector<2x8x8x32xf32> to vector<128x32xf32>
    %53 = arith.truncf %52 : vector<128x32xf32> to vector<128x32xbf16>
    %c0_51 = arith.constant 0 : index
    %c224 = arith.constant 224 : index
    %54 = vector.load %arg15[%c0_51, %c224] : memref<128x288xbf16, #tpu.memory_space<vmem>>, vector<128x32xbf16>
    tpu.vector_store %arg15[%c0_51, %c224], %53 {strides = array<i32>} : memref<128x288xbf16, #tpu.memory_space<vmem>>, vector<128x32xbf16>,
    %c0_52 = arith.constant 0 : index
    %c2_53 = arith.constant 2 : index
    %c2_54 = arith.constant 2 : index
    %c0_55 = arith.constant 0 : index
    %55 = vector.load %arg14[%c0_52, %c2_53, %c2_54, %c0_55] : memref<2x10x10x32xf32, #tpu.memory_space<vmem>>, vector<2x8x8x32xf32>
    %cst_56 = arith.constant 0.000000e+00 : f32
    %56 = vector.broadcast %cst_56 : f32 to vector<2x8x8x32xf32>
    %57 = arith.maximumf %55, %56 : vector<2x8x8x32xf32>
    %58 = vector.shape_cast %57 : vector<2x8x8x32xf32> to vector<128x32xf32>
    %59 = arith.truncf %58 : vector<128x32xf32> to vector<128x32xbf16>
    %c0_57 = arith.constant 0 : index
    %c256 = arith.constant 256 : index
    %60 = vector.load %arg15[%c0_57, %c256] : memref<128x288xbf16, #tpu.memory_space<vmem>>, vector<128x32xbf16>
    tpu.vector_store %arg15[%c0_57, %c256], %59 {strides = array<i32>} : memref<128x288xbf16, #tpu.memory_space<vmem>>, vector<128x32xbf16>,
    %c0_58 = arith.constant 0 : index
    %c0_59 = arith.constant 0 : index
    %61 = vector.load %arg15[%c0_58, %c0_59] : memref<128x288xbf16, #tpu.memory_space<vmem>>, vector<128x288xbf16>
    %cst_60 = arith.constant dense<0.000000e+00> : vector<128x32xf32>
    %62 = tpu.matmul %61, %4, %cst_60 {dimension_numbers = #tpu.dot_dimension_numbers<[1], [0], [0], [1], [0, 0, 1, 1], [], []>} : vector<128x288xbf16>, vector<288x32xbf16>, vector<128x32xf32> -> vector<128x32xf32>
    %63 = vector.broadcast %6 : vector<1x32xf32> to vector<128x32xf32>
    %64 = arith.addf %62, %63 : vector<128x32xf32>
    %65 = vector.shape_cast %64 : vector<128x32xf32> to vector<2x8x8x32xf32>
    %c0_61 = arith.constant 0 : index
    %c1_62 = arith.constant 1 : index
    %c1_63 = arith.constant 1 : index
    %c0_64 = arith.constant 0 : index
    %66 = vector.load %arg13[%c0_61, %c1_62, %c1_63, %c0_64] : memref<2x10x10x32xf32, #tpu.memory_space<vmem>>, vector<2x8x8x32xf32>
    tpu.vector_store %arg13[%c0_61, %c1_62, %c1_63, %c0_64], %65 {strides = array<i32>} : memref<2x10x10x32xf32, #tpu.memory_space<vmem>>, vector<2x8x8x32xf32>,
    %c0_65 = arith.constant 0 : index
    %c1_66 = arith.constant 1 : index
    %c1_67 = arith.constant 1 : index
    %c0_68 = arith.constant 0 : index
    %67 = vector.load %arg14[%c0_65, %c1_66, %c1_67, %c0_68] : memref<2x10x10x32xf32, #tpu.memory_space<vmem>>, vector<2x8x8x32xf32>
    %68 = vector.shape_cast %67 : vector<2x8x8x32xf32> to vector<128x32xf32>
    %c0_69 = arith.constant 0 : index
    %c0_70 = arith.constant 0 : index
    %c0_71 = arith.constant 0 : index
    %69 = vector.load %arg7[%c0_69, %c0_70, %c0_71] : memref<1x288x32xbf16, #tpu.memory_space<vmem>>, vector<1x288x32xbf16>
    %70 = vector.shape_cast %69 : vector<1x288x32xbf16> to vector<288x32xbf16>
    %c0_72 = arith.constant 0 : index
    %c0_73 = arith.constant 0 : index
    %c0_74 = arith.constant 0 : index
    %71 = vector.load %arg8[%c0_72, %c0_73, %c0_74] : memref<1x1x32xf32, #tpu.memory_space<vmem>>, vector<1x1x32xf32>
    %72 = vector.shape_cast %71 : vector<1x1x32xf32> to vector<1x32xf32>
    %c0_75 = arith.constant 0 : index
    %c0_76 = arith.constant 0 : index
    %c0_77 = arith.constant 0 : index
    %c0_78 = arith.constant 0 : index
    %73 = vector.load %arg13[%c0_75, %c0_76, %c0_77, %c0_78] : memref<2x10x10x32xf32, #tpu.memory_space<vmem>>, vector<2x8x8x32xf32>
    %cst_79 = arith.constant 0.000000e+00 : f32
    %74 = vector.broadcast %cst_79 : f32 to vector<2x8x8x32xf32>
    %75 = arith.maximumf %73, %74 : vector<2x8x8x32xf32>
    %76 = vector.shape_cast %75 : vector<2x8x8x32xf32> to vector<128x32xf32>
    %77 = arith.truncf %76 : vector<128x32xf32> to vector<128x32xbf16>
    %c0_80 = arith.constant 0 : index
    %c0_81 = arith.constant 0 : index
    %78 = vector.load %arg15[%c0_80, %c0_81] : memref<128x288xbf16, #tpu.memory_space<vmem>>, vector<128x32xbf16>
    tpu.vector_store %arg15[%c0_80, %c0_81], %77 {strides = array<i32>} : memref<128x288xbf16, #tpu.memory_space<vmem>>, vector<128x32xbf16>,
    %c0_82 = arith.constant 0 : index
    %c0_83 = arith.constant 0 : index
    %c1_84 = arith.constant 1 : index
    %c0_85 = arith.constant 0 : index
    %79 = vector.load %arg13[%c0_82, %c0_83, %c1_84, %c0_85] : memref<2x10x10x32xf32, #tpu.memory_space<vmem>>, vector<2x8x8x32xf32>
    %cst_86 = arith.constant 0.000000e+00 : f32
    %80 = vector.broadcast %cst_86 : f32 to vector<2x8x8x32xf32>
    %81 = arith.maximumf %79, %80 : vector<2x8x8x32xf32>
    %82 = vector.shape_cast %81 : vector<2x8x8x32xf32> to vector<128x32xf32>
    %83 = arith.truncf %82 : vector<128x32xf32> to vector<128x32xbf16>
    %c0_87 = arith.constant 0 : index
    %c32_88 = arith.constant 32 : index
    %84 = vector.load %arg15[%c0_87, %c32_88] : memref<128x288xbf16, #tpu.memory_space<vmem>>, vector<128x32xbf16>
    tpu.vector_store %arg15[%c0_87, %c32_88], %83 {strides = array<i32>} : memref<128x288xbf16, #tpu.memory_space<vmem>>, vector<128x32xbf16>,
    %c0_89 = arith.constant 0 : index
    %c0_90 = arith.constant 0 : index
    %c2_91 = arith.constant 2 : index
    %c0_92 = arith.constant 0 : index
    %85 = vector.load %arg13[%c0_89, %c0_90, %c2_91, %c0_92] : memref<2x10x10x32xf32, #tpu.memory_space<vmem>>, vector<2x8x8x32xf32>
    %cst_93 = arith.constant 0.000000e+00 : f32
    %86 = vector.broadcast %cst_93 : f32 to vector<2x8x8x32xf32>
    %87 = arith.maximumf %85, %86 : vector<2x8x8x32xf32>
    %88 = vector.shape_cast %87 : vector<2x8x8x32xf32> to vector<128x32xf32>
    %89 = arith.truncf %88 : vector<128x32xf32> to vector<128x32xbf16>
    %c0_94 = arith.constant 0 : index
    %c64_95 = arith.constant 64 : index
    %90 = vector.load %arg15[%c0_94, %c64_95] : memref<128x288xbf16, #tpu.memory_space<vmem>>, vector<128x32xbf16>
    tpu.vector_store %arg15[%c0_94, %c64_95], %89 {strides = array<i32>} : memref<128x288xbf16, #tpu.memory_space<vmem>>, vector<128x32xbf16>,
    %c0_96 = arith.constant 0 : index
    %c1_97 = arith.constant 1 : index
    %c0_98 = arith.constant 0 : index
    %c0_99 = arith.constant 0 : index
    %91 = vector.load %arg13[%c0_96, %c1_97, %c0_98, %c0_99] : memref<2x10x10x32xf32, #tpu.memory_space<vmem>>, vector<2x8x8x32xf32>
    %cst_100 = arith.constant 0.000000e+00 : f32
    %92 = vector.broadcast %cst_100 : f32 to vector<2x8x8x32xf32>
    %93 = arith.maximumf %91, %92 : vector<2x8x8x32xf32>
    %94 = vector.shape_cast %93 : vector<2x8x8x32xf32> to vector<128x32xf32>
    %95 = arith.truncf %94 : vector<128x32xf32> to vector<128x32xbf16>
    %c0_101 = arith.constant 0 : index
    %c96_102 = arith.constant 96 : index
    %96 = vector.load %arg15[%c0_101, %c96_102] : memref<128x288xbf16, #tpu.memory_space<vmem>>, vector<128x32xbf16>
    tpu.vector_store %arg15[%c0_101, %c96_102], %95 {strides = array<i32>} : memref<128x288xbf16, #tpu.memory_space<vmem>>, vector<128x32xbf16>,
    %c0_103 = arith.constant 0 : index
    %c1_104 = arith.constant 1 : index
    %c1_105 = arith.constant 1 : index
    %c0_106 = arith.constant 0 : index
    %97 = vector.load %arg13[%c0_103, %c1_104, %c1_105, %c0_106] : memref<2x10x10x32xf32, #tpu.memory_space<vmem>>, vector<2x8x8x32xf32>
    %cst_107 = arith.constant 0.000000e+00 : f32
    %98 = vector.broadcast %cst_107 : f32 to vector<2x8x8x32xf32>
    %99 = arith.maximumf %97, %98 : vector<2x8x8x32xf32>
    %100 = vector.shape_cast %99 : vector<2x8x8x32xf32> to vector<128x32xf32>
    %101 = arith.truncf %100 : vector<128x32xf32> to vector<128x32xbf16>
    %c0_108 = arith.constant 0 : index
    %c128_109 = arith.constant 128 : index
    %102 = vector.load %arg15[%c0_108, %c128_109] : memref<128x288xbf16, #tpu.memory_space<vmem>>, vector<128x32xbf16>
    tpu.vector_store %arg15[%c0_108, %c128_109], %101 {strides = array<i32>} : memref<128x288xbf16, #tpu.memory_space<vmem>>, vector<128x32xbf16>,
    %c0_110 = arith.constant 0 : index
    %c1_111 = arith.constant 1 : index
    %c2_112 = arith.constant 2 : index
    %c0_113 = arith.constant 0 : index
    %103 = vector.load %arg13[%c0_110, %c1_111, %c2_112, %c0_113] : memref<2x10x10x32xf32, #tpu.memory_space<vmem>>, vector<2x8x8x32xf32>
    %cst_114 = arith.constant 0.000000e+00 : f32
    %104 = vector.broadcast %cst_114 : f32 to vector<2x8x8x32xf32>
    %105 = arith.maximumf %103, %104 : vector<2x8x8x32xf32>
    %106 = vector.shape_cast %105 : vector<2x8x8x32xf32> to vector<128x32xf32>
    %107 = arith.truncf %106 : vector<128x32xf32> to vector<128x32xbf16>
    %c0_115 = arith.constant 0 : index
    %c160_116 = arith.constant 160 : index
    %108 = vector.load %arg15[%c0_115, %c160_116] : memref<128x288xbf16, #tpu.memory_space<vmem>>, vector<128x32xbf16>
    tpu.vector_store %arg15[%c0_115, %c160_116], %107 {strides = array<i32>} : memref<128x288xbf16, #tpu.memory_space<vmem>>, vector<128x32xbf16>,
    %c0_117 = arith.constant 0 : index
    %c2_118 = arith.constant 2 : index
    %c0_119 = arith.constant 0 : index
    %c0_120 = arith.constant 0 : index
    %109 = vector.load %arg13[%c0_117, %c2_118, %c0_119, %c0_120] : memref<2x10x10x32xf32, #tpu.memory_space<vmem>>, vector<2x8x8x32xf32>
    %cst_121 = arith.constant 0.000000e+00 : f32
    %110 = vector.broadcast %cst_121 : f32 to vector<2x8x8x32xf32>
    %111 = arith.maximumf %109, %110 : vector<2x8x8x32xf32>
    %112 = vector.shape_cast %111 : vector<2x8x8x32xf32> to vector<128x32xf32>
    %113 = arith.truncf %112 : vector<128x32xf32> to vector<128x32xbf16>
    %c0_122 = arith.constant 0 : index
    %c192_123 = arith.constant 192 : index
    %114 = vector.load %arg15[%c0_122, %c192_123] : memref<128x288xbf16, #tpu.memory_space<vmem>>, vector<128x32xbf16>
    tpu.vector_store %arg15[%c0_122, %c192_123], %113 {strides = array<i32>} : memref<128x288xbf16, #tpu.memory_space<vmem>>, vector<128x32xbf16>,
    %c0_124 = arith.constant 0 : index
    %c2_125 = arith.constant 2 : index
    %c1_126 = arith.constant 1 : index
    %c0_127 = arith.constant 0 : index
    %115 = vector.load %arg13[%c0_124, %c2_125, %c1_126, %c0_127] : memref<2x10x10x32xf32, #tpu.memory_space<vmem>>, vector<2x8x8x32xf32>
    %cst_128 = arith.constant 0.000000e+00 : f32
    %116 = vector.broadcast %cst_128 : f32 to vector<2x8x8x32xf32>
    %117 = arith.maximumf %115, %116 : vector<2x8x8x32xf32>
    %118 = vector.shape_cast %117 : vector<2x8x8x32xf32> to vector<128x32xf32>
    %119 = arith.truncf %118 : vector<128x32xf32> to vector<128x32xbf16>
    %c0_129 = arith.constant 0 : index
    %c224_130 = arith.constant 224 : index
    %120 = vector.load %arg15[%c0_129, %c224_130] : memref<128x288xbf16, #tpu.memory_space<vmem>>, vector<128x32xbf16>
    tpu.vector_store %arg15[%c0_129, %c224_130], %119 {strides = array<i32>} : memref<128x288xbf16, #tpu.memory_space<vmem>>, vector<128x32xbf16>,
    %c0_131 = arith.constant 0 : index
    %c2_132 = arith.constant 2 : index
    %c2_133 = arith.constant 2 : index
    %c0_134 = arith.constant 0 : index
    %121 = vector.load %arg13[%c0_131, %c2_132, %c2_133, %c0_134] : memref<2x10x10x32xf32, #tpu.memory_space<vmem>>, vector<2x8x8x32xf32>
    %cst_135 = arith.constant 0.000000e+00 : f32
    %122 = vector.broadcast %cst_135 : f32 to vector<2x8x8x32xf32>
    %123 = arith.maximumf %121, %122 : vector<2x8x8x32xf32>
    %124 = vector.shape_cast %123 : vector<2x8x8x32xf32> to vector<128x32xf32>
    %125 = arith.truncf %124 : vector<128x32xf32> to vector<128x32xbf16>
    %c0_136 = arith.constant 0 : index
    %c256_137 = arith.constant 256 : index
    %126 = vector.load %arg15[%c0_136, %c256_137] : memref<128x288xbf16, #tpu.memory_space<vmem>>, vector<128x32xbf16>
    tpu.vector_store %arg15[%c0_136, %c256_137], %125 {strides = array<i32>} : memref<128x288xbf16, #tpu.memory_space<vmem>>, vector<128x32xbf16>,
    %c0_138 = arith.constant 0 : index
    %c0_139 = arith.constant 0 : index
    %127 = vector.load %arg15[%c0_138, %c0_139] : memref<128x288xbf16, #tpu.memory_space<vmem>>, vector<128x288xbf16>
    %cst_140 = arith.constant dense<0.000000e+00> : vector<128x32xf32>
    %128 = tpu.matmul %127, %70, %cst_140 {dimension_numbers = #tpu.dot_dimension_numbers<[1], [0], [0], [1], [0, 0, 1, 1], [], []>} : vector<128x288xbf16>, vector<288x32xbf16>, vector<128x32xf32> -> vector<128x32xf32>
    %129 = vector.broadcast %72 : vector<1x32xf32> to vector<128x32xf32>
    %130 = arith.addf %128, %129 : vector<128x32xf32>
    %131 = arith.addf %130, %68 : vector<128x32xf32>
    %132 = vector.shape_cast %131 : vector<128x32xf32> to vector<2x8x8x32xf32>
    %c0_141 = arith.constant 0 : index
    %c1_142 = arith.constant 1 : index
    %c1_143 = arith.constant 1 : index
    %c0_144 = arith.constant 0 : index
    %133 = vector.load %arg14[%c0_141, %c1_142, %c1_143, %c0_144] : memref<2x10x10x32xf32, #tpu.memory_space<vmem>>, vector<2x8x8x32xf32>
    tpu.vector_store %arg14[%c0_141, %c1_142, %c1_143, %c0_144], %132 {strides = array<i32>} : memref<2x10x10x32xf32, #tpu.memory_space<vmem>>, vector<2x8x8x32xf32>,
    %c1_i32 = arith.constant 1 : i32
    %134 = arith.cmpi eq, %arg1, %c1_i32 : i32
    %135 = arith.extui %134 : i1 to i32
    %c0_i32_145 = arith.constant 0 : i32
    %136 = arith.cmpi ne, %135, %c0_i32_145 : i32
    scf.if %136 {
      %c0_146 = arith.constant 0 : index
      %c0_147 = arith.constant 0 : index
      %137 = vector.load %arg9[%c0_146, %c0_147] : memref<288x24xbf16, #tpu.memory_space<vmem>>, vector<288x24xbf16>
      %c0_148 = arith.constant 0 : index
      %c0_149 = arith.constant 0 : index
      %138 = vector.load %arg10[%c0_148, %c0_149] : memref<1x24xf32, #tpu.memory_space<vmem>>, vector<1x24xf32>
      %c0_150 = arith.constant 0 : index
      %c0_151 = arith.constant 0 : index
      %c0_152 = arith.constant 0 : index
      %c0_153 = arith.constant 0 : index
      %139 = vector.load %arg14[%c0_150, %c0_151, %c0_152, %c0_153] : memref<2x10x10x32xf32, #tpu.memory_space<vmem>>, vector<2x8x8x32xf32>
      %140 = vector.shape_cast %139 : vector<2x8x8x32xf32> to vector<128x32xf32>
      %141 = arith.truncf %140 : vector<128x32xf32> to vector<128x32xbf16>
      %c0_154 = arith.constant 0 : index
      %c0_155 = arith.constant 0 : index
      %142 = vector.load %arg15[%c0_154, %c0_155] : memref<128x288xbf16, #tpu.memory_space<vmem>>, vector<128x32xbf16>
      tpu.vector_store %arg15[%c0_154, %c0_155], %141 {strides = array<i32>} : memref<128x288xbf16, #tpu.memory_space<vmem>>, vector<128x32xbf16>,
      %c0_156 = arith.constant 0 : index
      %c0_157 = arith.constant 0 : index
      %c1_158 = arith.constant 1 : index
      %c0_159 = arith.constant 0 : index
      %143 = vector.load %arg14[%c0_156, %c0_157, %c1_158, %c0_159] : memref<2x10x10x32xf32, #tpu.memory_space<vmem>>, vector<2x8x8x32xf32>
      %144 = vector.shape_cast %143 : vector<2x8x8x32xf32> to vector<128x32xf32>
      %145 = arith.truncf %144 : vector<128x32xf32> to vector<128x32xbf16>
      %c0_160 = arith.constant 0 : index
      %c32_161 = arith.constant 32 : index
      %146 = vector.load %arg15[%c0_160, %c32_161] : memref<128x288xbf16, #tpu.memory_space<vmem>>, vector<128x32xbf16>
      tpu.vector_store %arg15[%c0_160, %c32_161], %145 {strides = array<i32>} : memref<128x288xbf16, #tpu.memory_space<vmem>>, vector<128x32xbf16>,
      %c0_162 = arith.constant 0 : index
      %c0_163 = arith.constant 0 : index
      %c2_164 = arith.constant 2 : index
      %c0_165 = arith.constant 0 : index
      %147 = vector.load %arg14[%c0_162, %c0_163, %c2_164, %c0_165] : memref<2x10x10x32xf32, #tpu.memory_space<vmem>>, vector<2x8x8x32xf32>
      %148 = vector.shape_cast %147 : vector<2x8x8x32xf32> to vector<128x32xf32>
      %149 = arith.truncf %148 : vector<128x32xf32> to vector<128x32xbf16>
      %c0_166 = arith.constant 0 : index
      %c64_167 = arith.constant 64 : index
      %150 = vector.load %arg15[%c0_166, %c64_167] : memref<128x288xbf16, #tpu.memory_space<vmem>>, vector<128x32xbf16>
      tpu.vector_store %arg15[%c0_166, %c64_167], %149 {strides = array<i32>} : memref<128x288xbf16, #tpu.memory_space<vmem>>, vector<128x32xbf16>,
      %c0_168 = arith.constant 0 : index
      %c1_169 = arith.constant 1 : index
      %c0_170 = arith.constant 0 : index
      %c0_171 = arith.constant 0 : index
      %151 = vector.load %arg14[%c0_168, %c1_169, %c0_170, %c0_171] : memref<2x10x10x32xf32, #tpu.memory_space<vmem>>, vector<2x8x8x32xf32>
      %152 = vector.shape_cast %151 : vector<2x8x8x32xf32> to vector<128x32xf32>
      %153 = arith.truncf %152 : vector<128x32xf32> to vector<128x32xbf16>
      %c0_172 = arith.constant 0 : index
      %c96_173 = arith.constant 96 : index
      %154 = vector.load %arg15[%c0_172, %c96_173] : memref<128x288xbf16, #tpu.memory_space<vmem>>, vector<128x32xbf16>
      tpu.vector_store %arg15[%c0_172, %c96_173], %153 {strides = array<i32>} : memref<128x288xbf16, #tpu.memory_space<vmem>>, vector<128x32xbf16>,
      %c0_174 = arith.constant 0 : index
      %c1_175 = arith.constant 1 : index
      %c1_176 = arith.constant 1 : index
      %c0_177 = arith.constant 0 : index
      %155 = vector.load %arg14[%c0_174, %c1_175, %c1_176, %c0_177] : memref<2x10x10x32xf32, #tpu.memory_space<vmem>>, vector<2x8x8x32xf32>
      %156 = vector.shape_cast %155 : vector<2x8x8x32xf32> to vector<128x32xf32>
      %157 = arith.truncf %156 : vector<128x32xf32> to vector<128x32xbf16>
      %c0_178 = arith.constant 0 : index
      %c128_179 = arith.constant 128 : index
      %158 = vector.load %arg15[%c0_178, %c128_179] : memref<128x288xbf16, #tpu.memory_space<vmem>>, vector<128x32xbf16>
      tpu.vector_store %arg15[%c0_178, %c128_179], %157 {strides = array<i32>} : memref<128x288xbf16, #tpu.memory_space<vmem>>, vector<128x32xbf16>,
      %c0_180 = arith.constant 0 : index
      %c1_181 = arith.constant 1 : index
      %c2_182 = arith.constant 2 : index
      %c0_183 = arith.constant 0 : index
      %159 = vector.load %arg14[%c0_180, %c1_181, %c2_182, %c0_183] : memref<2x10x10x32xf32, #tpu.memory_space<vmem>>, vector<2x8x8x32xf32>
      %160 = vector.shape_cast %159 : vector<2x8x8x32xf32> to vector<128x32xf32>
      %161 = arith.truncf %160 : vector<128x32xf32> to vector<128x32xbf16>
      %c0_184 = arith.constant 0 : index
      %c160_185 = arith.constant 160 : index
      %162 = vector.load %arg15[%c0_184, %c160_185] : memref<128x288xbf16, #tpu.memory_space<vmem>>, vector<128x32xbf16>
      tpu.vector_store %arg15[%c0_184, %c160_185], %161 {strides = array<i32>} : memref<128x288xbf16, #tpu.memory_space<vmem>>, vector<128x32xbf16>,
      %c0_186 = arith.constant 0 : index
      %c2_187 = arith.constant 2 : index
      %c0_188 = arith.constant 0 : index
      %c0_189 = arith.constant 0 : index
      %163 = vector.load %arg14[%c0_186, %c2_187, %c0_188, %c0_189] : memref<2x10x10x32xf32, #tpu.memory_space<vmem>>, vector<2x8x8x32xf32>
      %164 = vector.shape_cast %163 : vector<2x8x8x32xf32> to vector<128x32xf32>
      %165 = arith.truncf %164 : vector<128x32xf32> to vector<128x32xbf16>
      %c0_190 = arith.constant 0 : index
      %c192_191 = arith.constant 192 : index
      %166 = vector.load %arg15[%c0_190, %c192_191] : memref<128x288xbf16, #tpu.memory_space<vmem>>, vector<128x32xbf16>
      tpu.vector_store %arg15[%c0_190, %c192_191], %165 {strides = array<i32>} : memref<128x288xbf16, #tpu.memory_space<vmem>>, vector<128x32xbf16>,
      %c0_192 = arith.constant 0 : index
      %c2_193 = arith.constant 2 : index
      %c1_194 = arith.constant 1 : index
      %c0_195 = arith.constant 0 : index
      %167 = vector.load %arg14[%c0_192, %c2_193, %c1_194, %c0_195] : memref<2x10x10x32xf32, #tpu.memory_space<vmem>>, vector<2x8x8x32xf32>
      %168 = vector.shape_cast %167 : vector<2x8x8x32xf32> to vector<128x32xf32>
      %169 = arith.truncf %168 : vector<128x32xf32> to vector<128x32xbf16>
      %c0_196 = arith.constant 0 : index
      %c224_197 = arith.constant 224 : index
      %170 = vector.load %arg15[%c0_196, %c224_197] : memref<128x288xbf16, #tpu.memory_space<vmem>>, vector<128x32xbf16>
      tpu.vector_store %arg15[%c0_196, %c224_197], %169 {strides = array<i32>} : memref<128x288xbf16, #tpu.memory_space<vmem>>, vector<128x32xbf16>,
      %c0_198 = arith.constant 0 : index
      %c2_199 = arith.constant 2 : index
      %c2_200 = arith.constant 2 : index
      %c0_201 = arith.constant 0 : index
      %171 = vector.load %arg14[%c0_198, %c2_199, %c2_200, %c0_201] : memref<2x10x10x32xf32, #tpu.memory_space<vmem>>, vector<2x8x8x32xf32>
      %172 = vector.shape_cast %171 : vector<2x8x8x32xf32> to vector<128x32xf32>
      %173 = arith.truncf %172 : vector<128x32xf32> to vector<128x32xbf16>
      %c0_202 = arith.constant 0 : index
      %c256_203 = arith.constant 256 : index
      %174 = vector.load %arg15[%c0_202, %c256_203] : memref<128x288xbf16, #tpu.memory_space<vmem>>, vector<128x32xbf16>
      tpu.vector_store %arg15[%c0_202, %c256_203], %173 {strides = array<i32>} : memref<128x288xbf16, #tpu.memory_space<vmem>>, vector<128x32xbf16>,
      %c0_204 = arith.constant 0 : index
      %c0_205 = arith.constant 0 : index
      %175 = vector.load %arg15[%c0_204, %c0_205] : memref<128x288xbf16, #tpu.memory_space<vmem>>, vector<128x288xbf16>
      %cst_206 = arith.constant dense<0.000000e+00> : vector<128x24xf32>
      %176 = tpu.matmul %175, %137, %cst_206 {dimension_numbers = #tpu.dot_dimension_numbers<[1], [0], [0], [1], [0, 0, 1, 1], [], []>} : vector<128x288xbf16>, vector<288x24xbf16>, vector<128x24xf32> -> vector<128x24xf32>
      %177 = vector.broadcast %138 : vector<1x24xf32> to vector<128x24xf32>
      %178 = arith.addf %176, %177 : vector<128x24xf32>
      %179 = vector.extract_strided_slice %178 {offsets = [0, 0], sizes = [128, 16], strides = [1, 1]} : vector<128x24xf32> to vector<128x16xf32>
      %180 = tpu.transpose %179, [1, 0] : vector<128x16xf32> -> vector<16x128xf32>
      %181 = vector.extract_strided_slice %180 {offsets = [0, 0], sizes = [16, 64], strides = [1, 1]} : vector<16x128xf32> to vector<16x64xf32>
      %c0_207 = arith.constant 0 : index
      %c0_208 = arith.constant 0 : index
      %c0_209 = arith.constant 0 : index
      %182 = vector.load %arg11[%c0_207, %c0_208, %c0_209] : memref<2x16x64xf32, #tpu.memory_space<vmem>>, vector<1x16x64xf32>
      %183 = vector.shape_cast %182 : vector<1x16x64xf32> to vector<16x64xf32>
      %184 = vector.shape_cast %181 : vector<16x64xf32> to vector<1x16x64xf32>
      tpu.vector_store %arg11[%c0_207, %c0_208, %c0_209], %184 {strides = array<i32>} : memref<2x16x64xf32, #tpu.memory_space<vmem>>, vector<1x16x64xf32>,
      %185 = vector.extract_strided_slice %180 {offsets = [0, 64], sizes = [16, 64], strides = [1, 1]} : vector<16x128xf32> to vector<16x64xf32>
      %c1_210 = arith.constant 1 : index
      %c0_211 = arith.constant 0 : index
      %c0_212 = arith.constant 0 : index
      %186 = vector.load %arg11[%c1_210, %c0_211, %c0_212] : memref<2x16x64xf32, #tpu.memory_space<vmem>>, vector<1x16x64xf32>
      %187 = vector.shape_cast %186 : vector<1x16x64xf32> to vector<16x64xf32>
      %188 = vector.shape_cast %185 : vector<16x64xf32> to vector<1x16x64xf32>
      tpu.vector_store %arg11[%c1_210, %c0_211, %c0_212], %188 {strides = array<i32>} : memref<2x16x64xf32, #tpu.memory_space<vmem>>, vector<1x16x64xf32>,
      %189 = vector.extract_strided_slice %178 {offsets = [0, 16], sizes = [128, 8], strides = [1, 1]} : vector<128x24xf32> to vector<128x8xf32>
      %190 = vector.shape_cast %189 : vector<128x8xf32> to vector<2x64x8xf32>
      %c0_213 = arith.constant 0 : index
      %c0_214 = arith.constant 0 : index
      %c0_215 = arith.constant 0 : index
      %191 = vector.load %arg12[%c0_213, %c0_214, %c0_215] : memref<2x64x8xf32, #tpu.memory_space<vmem>>, vector<2x64x8xf32>
      tpu.vector_store %arg12[%c0_213, %c0_214, %c0_215], %190 {strides = array<i32>} : memref<2x64x8xf32, #tpu.memory_space<vmem>>, vector<2x64x8xf32>,
    } else {
    }
    return
  }
  func.func @transform_0(%arg0: i32, %arg1: i32) -> (i32, i32, i32, i32) {
    %c0_i32 = arith.constant 0 : i32
    %c0_i32_0 = arith.constant 0 : i32
    %c0_i32_1 = arith.constant 0 : i32
    %c0_i32_2 = arith.constant 0 : i32
    return %arg0, %c0_i32, %c0_i32_0, %c0_i32_1 : i32, i32, i32, i32
  }
  func.func @transform_1(%arg0: i32, %arg1: i32) -> (i32, i32) {
    %c0_i32 = arith.constant 0 : i32
    %c0_i32_0 = arith.constant 0 : i32
    %c0_i32_1 = arith.constant 0 : i32
    return %c0_i32, %c0_i32_0 : i32, i32
  }
  func.func @transform_2(%arg0: i32, %arg1: i32) -> (i32, i32) {
    %c0_i32 = arith.constant 0 : i32
    %c0_i32_0 = arith.constant 0 : i32
    %c0_i32_1 = arith.constant 0 : i32
    return %c0_i32, %c0_i32_0 : i32, i32
  }
  func.func @transform_3(%arg0: i32, %arg1: i32) -> (i32, i32, i32) {
    %c0_i32 = arith.constant 0 : i32
    %c0_i32_0 = arith.constant 0 : i32
    %c0_i32_1 = arith.constant 0 : i32
    return %arg1, %c0_i32, %c0_i32_0 : i32, i32, i32
  }
  func.func @transform_4(%arg0: i32, %arg1: i32) -> (i32, i32, i32) {
    %c0_i32 = arith.constant 0 : i32
    %c0_i32_0 = arith.constant 0 : i32
    %c0_i32_1 = arith.constant 0 : i32
    return %arg1, %c0_i32, %c0_i32_0 : i32, i32, i32
  }
  func.func @transform_5(%arg0: i32, %arg1: i32) -> (i32, i32, i32) {
    %c0_i32 = arith.constant 0 : i32
    %c0_i32_0 = arith.constant 0 : i32
    %c0_i32_1 = arith.constant 0 : i32
    return %arg1, %c0_i32, %c0_i32_0 : i32, i32, i32
  }
  func.func @transform_6(%arg0: i32, %arg1: i32) -> (i32, i32, i32) {
    %c0_i32 = arith.constant 0 : i32
    %c0_i32_0 = arith.constant 0 : i32
    %c0_i32_1 = arith.constant 0 : i32
    return %arg1, %c0_i32, %c0_i32_0 : i32, i32, i32
  }
  func.func @transform_7(%arg0: i32, %arg1: i32) -> (i32, i32) {
    %c0_i32 = arith.constant 0 : i32
    %c0_i32_0 = arith.constant 0 : i32
    %c0_i32_1 = arith.constant 0 : i32
    return %c0_i32, %c0_i32_0 : i32, i32
  }
  func.func @transform_8(%arg0: i32, %arg1: i32) -> (i32, i32) {
    %c0_i32 = arith.constant 0 : i32
    %c0_i32_0 = arith.constant 0 : i32
    %c0_i32_1 = arith.constant 0 : i32
    return %c0_i32, %c0_i32_0 : i32, i32
  }
  func.func @transform_9(%arg0: i32, %arg1: i32) -> (i32, i32, i32) {
    %c0_i32 = arith.constant 0 : i32
    %c0_i32_0 = arith.constant 0 : i32
    %c0_i32_1 = arith.constant 0 : i32
    return %arg0, %c0_i32, %c0_i32_0 : i32, i32, i32
  }
  func.func @transform_10(%arg0: i32, %arg1: i32) -> (i32, i32, i32) {
    %c0_i32 = arith.constant 0 : i32
    %c0_i32_0 = arith.constant 0 : i32
    %c0_i32_1 = arith.constant 0 : i32
    return %arg0, %c0_i32, %c0_i32_0 : i32, i32, i32
  }
}

module attributes {stable_mosaic.version = 11 : i64} {
  func.func @_heads_kernel(%arg0: i32, %arg1: memref<2x512xf32, #tpu.memory_space<vmem>>, %arg2: memref<512x64xbf16, #tpu.memory_space<vmem>>, %arg3: memref<1x64xf32, #tpu.memory_space<vmem>>, %arg4: memref<64x4xbf16, #tpu.memory_space<vmem>>, %arg5: memref<1x4xf32, #tpu.memory_space<vmem>>, %arg6: memref<2x3xf32, #tpu.memory_space<vmem>>, %arg7: memref<2x1xf32, #tpu.memory_space<vmem>>) attributes {dimension_semantics = [#tpu.dimension_semantics<arbitrary>], iteration_bounds = array<i64: 1>, scalar_prefetch = 0 : i64, scratch_operands = 0 : i64, tpu.core_type = #tpu.core_type<tc>, window_params = [{pipeline_mode = #tpu.pipeline_mode<synchronous>, transform_indices = @transform_0, window_bounds = array<i64: 2, 512>}, {pipeline_mode = #tpu.pipeline_mode<synchronous>, transform_indices = @transform_1, window_bounds = array<i64: 512, 64>}, {pipeline_mode = #tpu.pipeline_mode<synchronous>, transform_indices = @transform_2, window_bounds = array<i64: 1, 64>}, {pipeline_mode = #tpu.pipeline_mode<synchronous>, transform_indices = @transform_3, window_bounds = array<i64: 64, 4>}, {pipeline_mode = #tpu.pipeline_mode<synchronous>, transform_indices = @transform_4, window_bounds = array<i64: 1, 4>}, {pipeline_mode = #tpu.pipeline_mode<synchronous>, transform_indices = @transform_5, window_bounds = array<i64: 2, 3>}, {pipeline_mode = #tpu.pipeline_mode<synchronous>, transform_indices = @transform_6, window_bounds = array<i64: 2, 1>}]} {
    %c0 = arith.constant 0 : index
    %c0_0 = arith.constant 0 : index
    %0 = vector.load %arg1[%c0, %c0_0] : memref<2x512xf32, #tpu.memory_space<vmem>>, vector<2x512xf32>
    %cst = arith.constant 0.000000e+00 : f32
    %1 = vector.broadcast %cst : f32 to vector<2x512xf32>
    %2 = arith.maximumf %0, %1 : vector<2x512xf32>
    %3 = arith.truncf %2 : vector<2x512xf32> to vector<2x512xbf16>
    %c0_1 = arith.constant 0 : index
    %c0_2 = arith.constant 0 : index
    %4 = vector.load %arg2[%c0_1, %c0_2] : memref<512x64xbf16, #tpu.memory_space<vmem>>, vector<512x64xbf16>
    %cst_3 = arith.constant dense<0.000000e+00> : vector<2x64xf32>
    %5 = tpu.matmul %3, %4, %cst_3 {dimension_numbers = #tpu.dot_dimension_numbers<[1], [0], [0], [1], [0, 0, 1, 1], [], []>} : vector<2x512xbf16>, vector<512x64xbf16>, vector<2x64xf32> -> vector<2x64xf32>
    %c0_4 = arith.constant 0 : index
    %c0_5 = arith.constant 0 : index
    %6 = vector.load %arg3[%c0_4, %c0_5] : memref<1x64xf32, #tpu.memory_space<vmem>>, vector<1x64xf32>
    %7 = vector.broadcast %6 : vector<1x64xf32> to vector<2x64xf32>
    %8 = arith.addf %5, %7 : vector<2x64xf32>
    %cst_6 = arith.constant 0.000000e+00 : f32
    %9 = vector.broadcast %cst_6 : f32 to vector<2x64xf32>
    %10 = arith.maximumf %8, %9 : vector<2x64xf32>
    %11 = arith.truncf %10 : vector<2x64xf32> to vector<2x64xbf16>
    %c0_7 = arith.constant 0 : index
    %c0_8 = arith.constant 0 : index
    %12 = vector.load %arg4[%c0_7, %c0_8] : memref<64x4xbf16, #tpu.memory_space<vmem>>, vector<64x4xbf16>
    %cst_9 = arith.constant dense<0.000000e+00> : vector<2x4xf32>
    %13 = tpu.matmul %11, %12, %cst_9 {dimension_numbers = #tpu.dot_dimension_numbers<[1], [0], [0], [1], [0, 0, 1, 1], [], []>} : vector<2x64xbf16>, vector<64x4xbf16>, vector<2x4xf32> -> vector<2x4xf32>
    %c0_10 = arith.constant 0 : index
    %c0_11 = arith.constant 0 : index
    %14 = vector.load %arg5[%c0_10, %c0_11] : memref<1x4xf32, #tpu.memory_space<vmem>>, vector<1x4xf32>
    %15 = vector.broadcast %14 : vector<1x4xf32> to vector<2x4xf32>
    %16 = arith.addf %13, %15 : vector<2x4xf32>
    %17 = vector.extract_strided_slice %16 {offsets = [0, 0], sizes = [2, 3], strides = [1, 1]} : vector<2x4xf32> to vector<2x3xf32>
    %c0_12 = arith.constant 0 : index
    %c0_13 = arith.constant 0 : index
    %18 = vector.load %arg6[%c0_12, %c0_13] : memref<2x3xf32, #tpu.memory_space<vmem>>, vector<2x3xf32>
    tpu.vector_store %arg6[%c0_12, %c0_13], %17 {strides = array<i32>} : memref<2x3xf32, #tpu.memory_space<vmem>>, vector<2x3xf32>,
    %19 = vector.extract_strided_slice %16 {offsets = [0, 3], sizes = [2, 1], strides = [1, 1]} : vector<2x4xf32> to vector<2x1xf32>
    %20 = math.tanh %19 : vector<2x1xf32>
    %c0_14 = arith.constant 0 : index
    %c0_15 = arith.constant 0 : index
    %21 = vector.load %arg7[%c0_14, %c0_15] : memref<2x1xf32, #tpu.memory_space<vmem>>, vector<2x1xf32>
    tpu.vector_store %arg7[%c0_14, %c0_15], %20 {strides = array<i32>} : memref<2x1xf32, #tpu.memory_space<vmem>>, vector<2x1xf32>,
    return
  }
  func.func @transform_0(%arg0: i32) -> (i32, i32) {
    %c0_i32 = arith.constant 0 : i32
    %c0_i32_0 = arith.constant 0 : i32
    %c0_i32_1 = arith.constant 0 : i32
    return %c0_i32, %c0_i32_0 : i32, i32
  }
  func.func @transform_1(%arg0: i32) -> (i32, i32) {
    %c0_i32 = arith.constant 0 : i32
    %c0_i32_0 = arith.constant 0 : i32
    %c0_i32_1 = arith.constant 0 : i32
    return %c0_i32, %c0_i32_0 : i32, i32
  }
  func.func @transform_2(%arg0: i32) -> (i32, i32) {
    %c0_i32 = arith.constant 0 : i32
    %c0_i32_0 = arith.constant 0 : i32
    %c0_i32_1 = arith.constant 0 : i32
    return %c0_i32, %c0_i32_0 : i32, i32
  }
  func.func @transform_3(%arg0: i32) -> (i32, i32) {
    %c0_i32 = arith.constant 0 : i32
    %c0_i32_0 = arith.constant 0 : i32
    %c0_i32_1 = arith.constant 0 : i32
    return %c0_i32, %c0_i32_0 : i32, i32
  }
  func.func @transform_4(%arg0: i32) -> (i32, i32) {
    %c0_i32 = arith.constant 0 : i32
    %c0_i32_0 = arith.constant 0 : i32
    %c0_i32_1 = arith.constant 0 : i32
    return %c0_i32, %c0_i32_0 : i32, i32
  }
  func.func @transform_5(%arg0: i32) -> (i32, i32) {
    %c0_i32 = arith.constant 0 : i32
    %c0_i32_0 = arith.constant 0 : i32
    %c0_i32_1 = arith.constant 0 : i32
    return %c0_i32, %c0_i32_0 : i32, i32
  }
  func.func @transform_6(%arg0: i32) -> (i32, i32) {
    %c0_i32 = arith.constant 0 : i32
    %c0_i32_0 = arith.constant 0 : i32
    %c0_i32_1 = arith.constant 0 : i32
    return %c0_i32, %c0_i32_0 : i32, i32
  }
}

</mosaic_0001>

<bundles_post_ra>
// kernel: network_forward.3
= control target key start
LH: loop header
LB: loop body
LE: loop exit
PB: predicated region body
PF: predicated region fallthrough
CT: control target
= control target key end

     0   :  { %v31_v30 = vlaneseq  ;;  %v674_v35 = vmov 1983009808   ;;  %v675_v38 = vmov 0.0   ;;  %s846_s0 = inlined_call_operand.vmem [shape: f32[2,512], index: 0, kind: input, shape index: {}]   ;;  %s847_s1 = inlined_call_operand.vmem [shape: bf16[512,64], index: 1, kind: input, shape index: {}]   ;;  %s848_s2 = inlined_call_operand.vmem [shape: f32[1,64], index: 2, kind: input, shape index: {}]   ;;  %s849_s3 = inlined_call_operand.vmem [shape: bf16[64,4], index: 3, kind: input, shape index: {}]   ;;  %s850_s4 = inlined_call_operand.vmem [shape: f32[1,4], index: 4, kind: input, shape index: {}]   ;;  %s851_s5 = inlined_call_operand.hbm [shape: f32[2,3], index: 5, kind: output, shape index: {0}]   ;;  %s852_s6 = inlined_call_operand.vmem [shape: f32[2,1], index: 6, kind: output, shape index: {1}]  }
   0x1   :  { %v612_v0 = vld [vmem:[%s847_s1 + $0x40] sm:$0xff]   ;;  %v616_v4 = vld [vmem:[%s847_s1 + $0x48] sm:$0xff]   ;;  %v620_v8 = vld [vmem:[%s847_s1 + $0x50] sm:$0xff]   ;;  %v29_v36 = vunpack.c.l.s4 %v674_v35 }
   0x2   :  { %v613_v1 = vld [vmem:[%s847_s1 + $0xc0] sm:$0xff]   ;;  %546 = vmatprep.subr.bf16.mxu0 %v612_v0  ;;  %v617_v5 = vld [vmem:[%s847_s1 + $0xc8] sm:$0xff]   ;;  %v621_v9 = vld [vmem:[%s847_s1 + $0xd0] sm:$0xff]   ;;  %v32_v37 = vshrl.u32 %v31_v30, 7 }
   0x3   :  { %v614_v2 = vld [vmem:[%s847_s1] sm:$0xff]   ;;  %568 = vmatprep.subr.bf16.mxu1 %v613_v1  ;;  %v618_v6 = vld [vmem:[%s847_s1 + $0x8] sm:$0xff]   ;;  %v622_v10 = vld [vmem:[%s847_s1 + $0x10] sm:$0xff]   ;;  %v30_v39 = vunpack.c.0.s8 %v29_v36 }
   0x4   :  { %v615_v3 = vld [vmem:[%s847_s1 + $0x80] sm:$0xff]   ;;  %547 = vmatpush3.bf16.msra.mxu0 %v614_v2  ;;  %v619_v7 = vld [vmem:[%s847_s1 + $0x88] sm:$0xff]   ;;  %v623_v11 = vld [vmem:[%s847_s1 + $0x90] sm:$0xff]  }
   0x5   :  { %569 = vmatpush3.bf16.msra.mxu1 %v615_v3  ;;  %548 = vmatprep.subr.bf16.mxu0 %v616_v4  ;;  %v624_v12 = vld [vmem:[%s847_s1 + $0x58] sm:$0xff]   ;;  %v628_v16 = vld [vmem:[%s847_s1 + $0x60] sm:$0xff]   ;;  %v632_v20 = vld [vmem:[%s847_s1 + $0x68] sm:$0xff]  }
   0x6   :  { %570 = vmatprep.subr.bf16.mxu1 %v617_v5  ;;  %v625_v13 = vld [vmem:[%s847_s1 + $0xd8] sm:$0xff]   ;;  %v629_v17 = vld [vmem:[%s847_s1 + $0xe0] sm:$0xff]   ;;  %v633_v21 = vld [vmem:[%s847_s1 + $0xe8] sm:$0xff]  }
   0x7   :  { %v626_v14 = vld [vmem:[%s847_s1 + $0x18] sm:$0xff]   ;;  %v630_v18 = vld [vmem:[%s847_s1 + $0x20] sm:$0xff]   ;;  %v634_v22 = vld [vmem:[%s847_s1 + $0x28] sm:$0xff]  }
   0x8   :  { %549 = vmatpush3.bf16.msra.mxu0 %v618_v6  ;;  %v627_v15 = vld [vmem:[%s847_s1 + $0x98] sm:$0xff]   ;;  %v631_v19 = vld [vmem:[%s847_s1 + $0xa0] sm:$0xff]   ;;  %v635_v23 = vld [vmem:[%s847_s1 + $0xa8] sm:$0xff]  }
   0x9   :  { %571 = vmatpush3.bf16.msra.mxu1 %v619_v7  ;;  %550 = vmatprep.subr.bf16.mxu0 %v620_v8  ;;  %v636_v24 = vld [vmem:[%s847_s1 + $0x70] sm:$0xff]   ;;  %v640_v28 = vld [vmem:[%s847_s1 + $0x78] sm:$0xff]   ;;  %v24_v33 = vld [vmem:[%s846_s0] sm:$0xff] }
   0xa   :  { %572 = vmatprep.subr.bf16.mxu1 %v621_v9  ;;  %v637_v25 = vld [vmem:[%s847_s1 + $0xf0] sm:$0xff]   ;;  %v641_v29 = vld [vmem:[%s847_s1 + $0xf8] sm:$0xff]   ;;  %v25_v34 = vmax.f32 %v24_v33, 0.0 }
   0xb   :  { %v638_v26 = vld [vmem:[%s847_s1 + $0x30] sm:$0xff]   ;;  %v642_v31 = vld [vmem:[%s847_s1 + $0x38] sm:$0xff]  }
   0xc   :  { %551 = vmatpush3.bf16.msra.mxu0 %v622_v10  ;;  %v639_v27 = vld [vmem:[%s847_s1 + $0xb0] sm:$0xff]   ;;  %v643_v32 = vld [vmem:[%s847_s1 + $0xb8] sm:$0xff]   ;;  %v27_v40 = vcombine.high %v25_v34, %v25_v34 }
   0xd   :  { %573 = vmatpush3.bf16.msra.mxu1 %v623_v11  ;;  %552 = vmatprep.subr.bf16.mxu0 %v624_v12 }
   0xe   :  { %574 = vmatprep.subr.bf16.mxu1 %v625_v13 }
  0x10   :  { %553 = vmatpush3.bf16.msra.mxu0 %v626_v14 }
  0x11   :  { %575 = vmatpush3.bf16.msra.mxu1 %v627_v15  ;;  %554 = vmatprep.subr.bf16.mxu0 %v628_v16 }
  0x12   :  { %576 = vmatprep.subr.bf16.mxu1 %v629_v17 }
  0x14   :  { %555 = vmatpush3.bf16.msra.mxu0 %v630_v18 }
  0x15   :  { %577 = vmatpush3.bf16.msra.mxu1 %v631_v19  ;;  %556 = vmatprep.subr.bf16.mxu0 %v632_v20 }
  0x16   :  { %578 = vmatprep.subr.bf16.mxu1 %v633_v21 }
  0x18   :  { %557 = vmatpush3.bf16.msra.mxu0 %v634_v22 }
  0x19   :  { %579 = vmatpush3.bf16.msra.mxu1 %v635_v23  ;;  %558 = vmatprep.subr.bf16.mxu0 %v636_v24 }
  0x1a   :  { %580 = vmatprep.subr.bf16.mxu1 %v637_v25 }
  0x1c   :  { %559 = vmatpush3.bf16.msra.mxu0 %v638_v26 }
  0x1d   :  { %581 = vmatpush3.bf16.msra.mxu1 %v639_v27  ;;  %560 = vmatprep.subr.bf16.mxu0 %v640_v28 }
  0x1e   :  { %582 = vmatprep.subr.bf16.mxu1 %v641_v29 }
  0x20   :  { %561 = vmatpush3.bf16.msra.mxu0 %v642_v31 }
  0x21   :  { %583 = vmatpush3.bf16.msra.mxu1 %v643_v32  ;;  %595 = vmatprep.subr.bf16.mxu0 %v675_v38 }
  0x22   :  { %12 = vsyncpa [#allocation3], 0  ;;  %v33_v41 = vsub.s32 %v30_v39, %v32_v37  ;;  %v644_v50 = vld [vmem:[%s849_s3] sm:$0xff]   ;;  %v645_v51 = vld [vmem:[%s849_s3 + $0x8] sm:$0xff]   ;;  %vm676_vm0 = vmmov 0   ;;  %vm436_vm1 = vcmask 523264  }
  0x23   :  { %v646_v52 = vld [vmem:[%s849_s3 + $0x10] sm:$0xff]   ;;  %v647_v53 = vld [vmem:[%s849_s3 + $0x18] sm:$0xff]   ;;  %v507_v56 = vld [vmem:[%s848_s2] ss:$0 sm:$0xff]  ;;  %s677_s24 = smov [#allocation2]   ;;  %vm480_vm2 = vcmask 17408  }
  0x24   :  { %v34_v42 = vrot.slane %v25_v34, %v33_v41  ;;  %v41_v43 = vrot.slane %v27_v40, %v33_v41  ;;  %v540_v5 = vld [vmem:[%s850_s4] ss:$0 sm:$0xff]  ;;  %s495_s2 = sshll.u32 %s677_s24, 4  ;;  %s496_s2 = int_to_ptr.vmem [resolvable:$true] %s495_s2 }
  0x25   :  { %s650_s25 = scalar_lea.vmem %s496_s2, 32  ;;  %p655_p1 = scmp.lt.s32.totalorder %s496_s2, %s496_s2 }
  0x26   :  { %v42_v44 = vcombine.high %v34_v42, %v34_v42  ;;  %v43_v45 = vcombine.high %v41_v43, %v41_v43  ;;  %v48_v46 = vpack.c.bf16 %v34_v42, %v34_v42  ;;  %v50_v47 = vpack.c.bf16 %v41_v43, %v41_v43  ;;  %p651_p0 = scmp.ne.s32.totalorder %s496_s2, %s650_s25  ;;  %p656_p2 = scmp.lt.s32.totalorder %s650_s25, %s650_s25 }
  0x28   :  { %v49_v48 = vpack.c.bf16 %v42_v44, %v42_v44  ;;  %v51_v49 = vpack.c.bf16 %v43_v45, %v43_v45  ;;  %p657_p3 = por %p656_p2, %p655_p1 }
  0x2a   :  { %347 = vmatprep.mubr.bf16.mxu0 %v49_v48  ;;  %387 = vmatprep.mubr.bf16.mxu1 %v51_v49  ;;  %p658_p4 = pnand %p657_p3, %p651_p0 }
  0x2b   :  { %348 = vmatmul.mubr.bf16.vlgmr.msra.gmra.mrb[0].mxu0 %v48_v46  ;;  %388 = vmatmul.mubr.bf16.vlgmr.msra.gmra.mrb[0].mxu1 %v50_v47 }
  0x2c   :  { %596 = vmatpush3.bf16.msra.mxu0 %v644_v50  ;;  %603 = vmatprep.mubr.msk.bf16.mxu0 %vm676_vm0, %v675_v38 }
  0x2d   :  { %597 = vmatprep.subr.bf16.mxu0 %v675_v38 }
  0x30   :  { %598 = vmatpush3.bf16.msra.mxu0 %v645_v51 }
  0x31   :  { %599 = vmatprep.subr.bf16.mxu0 %v675_v38 }
  0x34   :  { %600 = vmatpush3.bf16.msra.mxu0 %v646_v52 }
  0x35   :  { %601 = vmatprep.subr.bf16.mxu0 %v675_v38 }
  0x38   :  { %602 = vmatpush3.bf16.msra.mxu0 %v647_v53 }
  0xfe   :  { %v562_v54 = vpop.f32.mrb[0].mxu0  ;;  %v584_v55 = vpop.f32.mrb[0].mxu1 }
  0xff   :  { %v563_v57 = vpop.f32.mrb[1].mxu0  ;;  %v585_v58 = vpop.f32.mrb[1].mxu1 }
 0x100   :  { %v564_v59 = vadd.f32 %v563_v57, %v562_v54  ;;  %v586_v60 = vadd.f32 %v585_v58, %v584_v55  ;;  %v565_v61 = vpop.f32.mrb[2].mxu0  ;;  %v587_v62 = vpop.f32.mrb[2].mxu1 }
 0x101   :  { %v566_v63 = vpop.f32.mrb[3].mxu0  ;;  %v588_v0 = vpop.f32.mrb[3].mxu1 }
 0x102   :  { %v350_v1 = vadd.f32 %v564_v59, %v507_v56 }
 0x104   :  { %v390_v2 = vadd.f32 %v586_v60, %v350_v1 }
 0x106   :  { %v395_v3 = vmax.f32 %v390_v2, 0.0 }
 0x108   :  { %v396_v4 = vpack.c.bf16 %v395_v3, %v395_v3 }
 0x10a   :  { %604 = vmatmul.mubr.msk.bf16.vlgmr.msra.gmra.mrb[4].mxu0 %vm436_vm1, %v396_v4 }
 0x1dd   :  { %v474_v6 = vpop.f32.mrb[4].mxu0 }
 0x1de   :  { %v475_v7 = vadd.f32 %v540_v5, %v474_v6  ;;  %v605_v8 = vpop.f32.mrb[5].mxu0 }
 0x1df   :  { %v477_v9 = vpop.f32.mrb[6].mxu0 }
 0x1e0   :  { %648 = vtanh.f32 %v475_v7  ;;  %v606_v10 = vpop.f32.mrb[7].mxu0  ;;  %481 = vst.msk [vmem:[#allocation2] sm:$0x3] %vm480_vm2, %v475_v7 }
 0x1e1   :  { %661 = shalt.err (!%p658_p4)
}
 0x1e2   :  { %s662_s27 = scalar_lea.hbm %s851_s5, 32 }
 0x1e3   :  { %p663_p5 = scmp.ne.s32.totalorder %s851_s5, %s662_s27  ;;  %p666_p6 = scmp.lt.u32.totalorder %s662_s27, %s851_s5 }
 0x1e5   :  { %p668_p7 = pnand %p666_p6, %p663_p5 }
 0x1e7   :  { %671 = shalt.err (!%p668_p7)
}
 0x1e8   :  { %498 = dma.vmem_to_hbm [thread:$0]  %s496_s2, 32, %s851_s5, [#allocation3]   ;;  %vm487_vm3 = vcmask 1024  }
 0x1e9   :  { %s678_s10 = smov 125  }
 0x1ea   :  { %v649_v11 = vpop.eup %648 }
 0x1eb   :  { %484 = vrot.lane.b32.xlu0 %v649_v11, %s678_s10 }
 0x25d   :  { %v485_v12 = vpop.permute.xlu0 %484 }
 0x25e   :  { %488 = vst.msk [vmem:[%s852_s6] sm:$0x3] %vm487_vm3, %v485_v12 }
 0x25f   :  { %672 = dma.done.wait [#allocation3], 32  }
 0x260   :  { %673 = vsyncadd [#allocation3], 4294967264 }
 0x261   :  { %506 = vsyncpa [#allocation3], 1 }

// kernel: network_forward.2
= control target key start
LH: loop header
LB: loop body
LE: loop exit
PB: predicated region body
PF: predicated region fallthrough
CT: control target
= control target key end

     0   :  { %s5244_s13 = smov 0   ;;  %s5246_s14 = smov 0   ;;  %s7002_s0 = inlined_call_operand.vmem [shape: f32[2,8,8,8], index: 0, kind: input, shape index: {}]   ;;  %s7003_s1 = inlined_call_operand.vmem [shape: bf16[72,32], index: 1, kind: input, shape index: {}]   ;;  %s7004_s2 = inlined_call_operand.vmem [shape: f32[1,32], index: 2, kind: input, shape index: {}]   ;;  %s7005_s3 = inlined_call_operand.vmem [shape: bf16[2,288,32], index: 3, kind: input, shape index: {}]   ;;  %s7006_s4 = inlined_call_operand.vmem [shape: f32[2,1,32], index: 4, kind: input, shape index: {}]   ;;  %s7007_s5 = inlined_call_operand.vmem [shape: bf16[2,288,32], index: 5, kind: input, shape index: {}]   ;;  %s7008_s6 = inlined_call_operand.vmem [shape: f32[2,1,32], index: 6, kind: input, shape index: {}]   ;;  %s7009_s7 = inlined_call_operand.vmem [shape: bf16[288,24], index: 7, kind: input, shape index: {}]   ;;  %s7010_s8 = inlined_call_operand.vmem [shape: f32[1,24], index: 8, kind: input, shape index: {}]   ;;  %s7011_s9 = inlined_call_operand.vmem [shape: f32[2,16,64], index: 9, kind: output, shape index: {0}]   ;;  %s7012_s10 = inlined_call_operand.vmem [shape: f32[2,64,8], index: 10, kind: output, shape index: {1}]  }
   0x1   :  { %s5248_s15 = smov 0  }
   0x2 LB: > { %s30_s16 = sadd.s32 1, %s5167_s14  ;;  %p4588_p0 = scmp.ge.s32.totalorder %s5171_s15, 1  ;;  %s5171_s15 = sphi %s5248_s15, %s21_s15   ;;  %s5167_s14 = sphi %s5246_s14, %s7019_s14   ;;  %s5163_s13 = sphi %s5244_s13, %s7018_s13  }
   0x3   : > { %p31_p1 = scmp.ge.s32.totalorder %s30_s16, 2  ;;  %p365_p2 = scmp.lt.s32.totalorder %s5171_s15, 3 }
   0x5   : > { %s7021_s16 = smov (%p31_p1, %s30_s16), 0  ;;  %p366_p3 = pnand %p4588_p0, %p365_p2 }
   0x6   : > { %p434_p4 = scmp.lt.s32.totalorder (!%p366_p3), %s5163_s13, 1  ;;  %p4591_p5 = scmp.ne.s32.totalorder (!%p366_p3), %s5163_s13, 0 }
   0x7   : > { %369 = sbr.rel (%p366_p3) target bundleno = 2009 (0x7d9), region = 56 }
   0xe   : > { %s5266_s17 = scalar_select %p434_p4, %s5163_s13, 1 }
   0xf   : > { %468 = sbr.rel (%p4591_p5) target bundleno = 533 (0x215), region = 60  ;;  %vm469_vm0 = vcmask (!%p4591_p5), 261120   ;;  %vm471_vm1 = vcmask (!%p4591_p5), 254976   ;;  %v5291_v0 = vld [vmem:[%s7002_s0 + $0x8] sm:$0xff] (!%p4591_p5)  ;;  %v5296_v1 = vld [vmem:[%s7002_s0 + $0x10] sm:$0xff] (!%p4591_p5)  ;;  %vm568_vm2 = vcmask (!%p4591_p5), 64512  }
  0x10   : > { %s5049_s18 = smul.u32 144, %s5266_s17  ;;  %s441_s21 = scalar_lea.vmem %s7006_s4, %s5266_s17  ;;  %v5173_v2 = vmov (!%p4591_p5), 0.0   ;;  %v551_v3 = vld [vmem:[%s7002_s0] sm:$0xff] (!%p4591_p5)  ;;  %v560_v4 = vld [vmem:[%s7002_s0 + $0x48] sm:$0xff] (!%p4591_p5)  ;;  %v561_v5 = vld [vmem:[%s7002_s0 + $0x50] sm:$0xff] (!%p4591_p5)  ;;  %vm1214_vm3 = vcmask (!%p4591_p5), 1043456  }
  0x11   : > { %475 = vst.msk [vmem:[#allocation2 + $0x20] sm:$0xff] (!%p4591_p5), %vm469_vm0, %v5173_v2  ;;  %477 = vst.msk [vmem:[#allocation2 + $0x30] sm:$0xff] (!%p4591_p5), %vm469_vm0, %v5173_v2  ;;  %v559_v6 = vld [vmem:[%s7002_s0 + $0x40] sm:$0xff] (!%p4591_p5)  ;;  %v562_v7 = vld [vmem:[%s7002_s0 + $0x58] sm:$0xff] (!%p4591_p5)  ;;  %s5174_s29 = smov (!%p4591_p5), 8   ;;  %s5175_s11 = smov (!%p4591_p5), 16  }
  0x12   : > { %s5280_s27 = scalar_lea.vmem %s7005_s3, %s5049_s18  ;;  %s5285_s30 = scalar_lea.vmem %s7007_s5, %s5049_s18  ;;  %476 = vst.msk [vmem:[#allocation2 + $0x28] sm:$0x3] (!%p4591_p5), %vm471_vm1, %v5173_v2  ;;  %478 = vst.msk [vmem:[#allocation2 + $0x38] sm:$0x3] (!%p4591_p5), %vm471_vm1, %v5173_v2  ;;  %v554_v8 = vld [vmem:[%s7002_s0 + $0x18] sm:$0xff] (!%p4591_p5)  ;;  %v563_v9 = vld [vmem:[%s7002_s0 + $0x60] sm:$0xff] (!%p4591_p5) }
  0x13   : > { %470 = vst.msk [vmem:[#allocation2] sm:$0xff] (!%p4591_p5), %vm469_vm0, %v5173_v2  ;;  %473 = vst.msk [vmem:[#allocation2 + $0x10] sm:$0xff] (!%p4591_p5), %vm469_vm0, %v5173_v2  ;;  %v555_v10 = vld [vmem:[%s7002_s0 + $0x20] sm:$0xff] (!%p4591_p5)  ;;  %v564_v11 = vld [vmem:[%s7002_s0 + $0x68] sm:$0xff] (!%p4591_p5)  ;;  %s5176_s12 = smov (!%p4591_p5), 24   ;;  %s5177_s19 = smov (!%p4591_p5), 32  }
  0x14   : > { %472 = vst.msk [vmem:[#allocation2 + $0x8] sm:$0x3] (!%p4591_p5), %vm471_vm1, %v5173_v2  ;;  %474 = vst.msk [vmem:[#allocation2 + $0x18] sm:$0x3] (!%p4591_p5), %vm471_vm1, %v5173_v2  ;;  %v565_v12 = vld [vmem:[%s7002_s0 + $0x70] sm:$0xff] (!%p4591_p5)  ;;  %v556_v13 = vld [vmem:[%s7002_s0 + $0x28] sm:$0xff] (!%p4591_p5) }
  0x15   : > { %479 = vst.msk [vmem:[#allocation2 + $0x40] sm:$0xff] (!%p4591_p5), %vm469_vm0, %v5173_v2  ;;  %481 = vst.msk [vmem:[#allocation2 + $0x50] sm:$0xff] (!%p4591_p5), %vm469_vm0, %v5173_v2  ;;  %v557_v14 = vld [vmem:[%s7002_s0 + $0x30] sm:$0xff] (!%p4591_p5)  ;;  %v566_v15 = vld [vmem:[%s7002_s0 + $0x78] sm:$0xff] (!%p4591_p5)  ;;  %s5178_s20 = smov (!%p4591_p5), 40   ;;  %s5179_s23 = smov (!%p4591_p5), 48  }
  0x16   : > { %480 = vst.msk [vmem:[#allocation2 + $0x48] sm:$0x3] %vm471_vm1, %v5173_v2  ;;  %482 = vst.msk [vmem:[#allocation2 + $0x58] sm:$0x3] %vm471_vm1, %v5173_v2  ;;  %v558_v16 = vld [vmem:[%s7002_s0 + $0x38] sm:$0xff]  ;;  %s5180_s22 = smov 56  }
  0x17   : > { %483 = vst.msk [vmem:[#allocation2 + $0x60] sm:$0xff] %vm469_vm0, %v5173_v2  ;;  %485 = vst.msk [vmem:[#allocation2 + $0x70] sm:$0xff] %vm469_vm0, %v5173_v2  ;;  %s5181_s24 = smov 64   ;;  %vm683_vm4 = vcmask 130112   ;;  %vm748_vm5 = vcmask 195712   ;;  %vm813_vm6 = vcmask 261312  }
  0x18   : > { %484 = vst.msk [vmem:[#allocation2 + $0x68] sm:$0x3] %vm471_vm1, %v5173_v2  ;;  %486 = vst.msk [vmem:[#allocation2 + $0x78] sm:$0x3] %vm471_vm1, %v5173_v2  ;;  %vm878_vm7 = vcmask 326912   ;;  %vm943_vm8 = vcmask 392512  }
  0x19   : > { %487 = vst.msk [vmem:[#allocation2 + $0x80] sm:$0xff] %vm469_vm0, %v5173_v2  ;;  %489 = vst.msk [vmem:[#allocation2 + $0x90] sm:$0xff] %vm469_vm0, %v5173_v2  ;;  %vm1009_vm9 = vcmask 458112   ;;  %vm1074_vm10 = vcmask 523712   ;;  %vm1139_vm11 = vcmask 589312   ;;  %vm1189_vm12 = vcmask 588800  }
  0x1a   : > { %488 = vst.msk [vmem:[#allocation2 + $0x88] sm:$0x3] %vm471_vm1, %v5173_v2  ;;  %490 = vst.msk [vmem:[#allocation2 + $0x98] sm:$0x3] %vm471_vm1, %v5173_v2 }
  0x1b   : > { %491 = vst.msk [vmem:[#allocation2 + $0xa0] sm:$0xff] %vm469_vm0, %v5173_v2  ;;  %493 = vst.msk [vmem:[#allocation2 + $0xb0] sm:$0xff] %vm469_vm0, %v5173_v2  ;;  %v627_v17 = vld [vmem:[#allocation2 + $0x1] sm:$0xff] }
  0x1c   : > { %492 = vst.msk [vmem:[#allocation2 + $0xa8] sm:$0x3] %vm471_vm1, %v5173_v2  ;;  %494 = vst.msk [vmem:[#allocation2 + $0xb8] sm:$0x3] %vm471_vm1, %v5173_v2  ;;  %v692_v31 = vld [vmem:[#allocation2 + $0x2] sm:$0xff] }
  0x1d   : > { %495 = vst.msk [vmem:[#allocation2 + $0xc0] sm:$0xff] %vm469_vm0, %v5173_v2  ;;  %497 = vst.msk [vmem:[#allocation2 + $0xd0] sm:$0xff] %vm469_vm0, %v5173_v2 }
  0x1e   : > { %496 = vst.msk [vmem:[#allocation2 + $0xc8] sm:$0x3] %vm471_vm1, %v5173_v2  ;;  %498 = vst.msk [vmem:[#allocation2 + $0xd8] sm:$0x3] %vm471_vm1, %v5173_v2 }
  0x1f   : > { %499 = vst.msk [vmem:[#allocation2 + $0xe0] sm:$0xff] %vm469_vm0, %v5173_v2  ;;  %501 = vst.msk [vmem:[#allocation2 + $0xf0] sm:$0xff] %vm469_vm0, %v5173_v2 }
  0x20   : > { %500 = vst.msk [vmem:[#allocation2 + $0xe8] sm:$0x3] %vm471_vm1, %v5173_v2  ;;  %502 = vst.msk [vmem:[#allocation2 + $0xf8] sm:$0x3] %vm471_vm1, %v5173_v2 }
  0x21   : > { %503 = vst.msk [vmem:[#allocation2 + $0x100] sm:$0xff] %vm469_vm0, %v5173_v2  ;;  %505 = vst.msk [vmem:[#allocation2 + $0x110] sm:$0xff] %vm469_vm0, %v5173_v2 }
  0x22   : > { %504 = vst.msk [vmem:[#allocation2 + $0x108] sm:$0x3] %vm471_vm1, %v5173_v2  ;;  %506 = vst.msk [vmem:[#allocation2 + $0x118] sm:$0x3] %vm471_vm1, %v5173_v2 }
  0x23   : > { %507 = vst.msk [vmem:[#allocation2 + $0x120] sm:$0xff] %vm469_vm0, %v5173_v2  ;;  %509 = vst.msk [vmem:[#allocation2 + $0x130] sm:$0xff] %vm469_vm0, %v5173_v2  ;;  %v635_v18 = vld [vmem:[#allocation2 + $0xa1] sm:$0xff] }
  0x24   : > { %508 = vst.msk [vmem:[#allocation2 + $0x128] sm:$0x3] %vm471_vm1, %v5173_v2  ;;  %510 = vst.msk [vmem:[#allocation2 + $0x138] sm:$0x3] %vm471_vm1, %v5173_v2  ;;  %v700_v29 = vld [vmem:[#allocation2 + $0xa2] sm:$0xff] }
  0x25   : > { %511 = vst.msk [vmem:[#allocation3] sm:$0xff] %vm469_vm0, %v5173_v2  ;;  %513 = vst.msk [vmem:[#allocation3 + $0x10] sm:$0xff] %vm469_vm0, %v5173_v2 }
  0x26   : > { %512 = vst.msk [vmem:[#allocation3 + $0x8] sm:$0x3] %vm471_vm1, %v5173_v2  ;;  %514 = vst.msk [vmem:[#allocation3 + $0x18] sm:$0x3] %vm471_vm1, %v5173_v2 }
  0x27   : > { %515 = vst.msk [vmem:[#allocation3 + $0x20] sm:$0xff] %vm469_vm0, %v5173_v2  ;;  %517 = vst.msk [vmem:[#allocation3 + $0x30] sm:$0xff] %vm469_vm0, %v5173_v2 }
  0x28   : > { %516 = vst.msk [vmem:[#allocation3 + $0x28] sm:$0x3] %vm471_vm1, %v5173_v2  ;;  %518 = vst.msk [vmem:[#allocation3 + $0x38] sm:$0x3] %vm471_vm1, %v5173_v2 }
  0x29   : > { %519 = vst.msk [vmem:[#allocation3 + $0x40] sm:$0xff] %vm469_vm0, %v5173_v2  ;;  %521 = vst.msk [vmem:[#allocation3 + $0x50] sm:$0xff] %vm469_vm0, %v5173_v2 }
  0x2a   : > { %520 = vst.msk [vmem:[#allocation3 + $0x48] sm:$0x3] %vm471_vm1, %v5173_v2  ;;  %522 = vst.msk [vmem:[#allocation3 + $0x58] sm:$0x3] %vm471_vm1, %v5173_v2 }
  0x2b   : > { %523 = vst.msk [vmem:[#allocation3 + $0x60] sm:$0xff] %vm469_vm0, %v5173_v2  ;;  %525 = vst.msk [vmem:[#allocation3 + $0x70] sm:$0xff] %vm469_vm0, %v5173_v2 }
  0x2c   : > { %524 = vst.msk [vmem:[#allocation3 + $0x68] sm:$0x3] %vm471_vm1, %v5173_v2  ;;  %526 = vst.msk [vmem:[#allocation3 + $0x78] sm:$0x3] %vm471_vm1, %v5173_v2 }
  0x2d   : > { %527 = vst.msk [vmem:[#allocation3 + $0x80] sm:$0xff] %vm469_vm0, %v5173_v2  ;;  %529 = vst.msk [vmem:[#allocation3 + $0x90] sm:$0xff] %vm469_vm0, %v5173_v2 }
  0x2e   : > { %528 = vst.msk [vmem:[#allocation3 + $0x88] sm:$0x3] %vm471_vm1, %v5173_v2  ;;  %530 = vst.msk [vmem:[#allocation3 + $0x98] sm:$0x3] %vm471_vm1, %v5173_v2 }
  0x2f   : > { %531 = vst.msk [vmem:[#allocation3 + $0xa0] sm:$0xff] %vm469_vm0, %v5173_v2  ;;  %533 = vst.msk [vmem:[#allocation3 + $0xb0] sm:$0xff] %vm469_vm0, %v5173_v2 }
  0x30   : > { %532 = vst.msk [vmem:[#allocation3 + $0xa8] sm:$0x3] %vm471_vm1, %v5173_v2  ;;  %534 = vst.msk [vmem:[#allocation3 + $0xb8] sm:$0x3] %vm471_vm1, %v5173_v2 }
  0x31   : > { %535 = vst.msk [vmem:[#allocation3 + $0xc0] sm:$0xff] %vm469_vm0, %v5173_v2  ;;  %537 = vst.msk [vmem:[#allocation3 + $0xd0] sm:$0xff] %vm469_vm0, %v5173_v2 }
  0x32   : > { %536 = vst.msk [vmem:[#allocation3 + $0xc8] sm:$0x3] %vm471_vm1, %v5173_v2  ;;  %538 = vst.msk [vmem:[#allocation3 + $0xd8] sm:$0x3] %vm471_vm1, %v5173_v2 }
  0x33   : > { %539 = vst.msk [vmem:[#allocation3 + $0xe0] sm:$0xff] %vm469_vm0, %v5173_v2  ;;  %541 = vst.msk [vmem:[#allocation3 + $0xf0] sm:$0xff] %vm469_vm0, %v5173_v2 }
  0x34   : > { %540 = vst.msk [vmem:[#allocation3 + $0xe8] sm:$0x3] %vm471_vm1, %v5173_v2  ;;  %542 = vst.msk [vmem:[#allocation3 + $0xf8] sm:$0x3] %vm471_vm1, %v5173_v2 }
  0x35   : > { %543 = vst.msk [vmem:[#allocation3 + $0x100] sm:$0xff] %vm469_vm0, %v5173_v2  ;;  %545 = vst.msk [vmem:[#allocation3 + $0x110] sm:$0xff] %vm469_vm0, %v5173_v2 }
  0x36   : > { %544 = vst.msk [vmem:[#allocation3 + $0x108] sm:$0x3] %vm471_vm1, %v5173_v2  ;;  %546 = vst.msk [vmem:[#allocation3 + $0x118] sm:$0x3] %vm471_vm1, %v5173_v2 }
  0x37   : > { %547 = vst.msk [vmem:[#allocation3 + $0x120] sm:$0xff] %vm469_vm0, %v5173_v2  ;;  %549 = vst.msk [vmem:[#allocation3 + $0x130] sm:$0xff] %vm469_vm0, %v5173_v2 }
  0x38   : > { %548 = vst.msk [vmem:[#allocation3 + $0x128] sm:$0x3] %vm471_vm1, %v5173_v2  ;;  %550 = vst.msk [vmem:[#allocation3 + $0x138] sm:$0x3] %vm471_vm1, %v5173_v2 }
  0x39   : > { %570 = vst.msk [vmem:[#allocation2 + $0x21] sm:$0xff] %vm568_vm2, %v5291_v0  ;;  %571 = vst.msk [vmem:[#allocation2 + $0x31] sm:$0xff] %vm568_vm2, %v5296_v1  ;;  %v595_v1 = vld [vmem:[#allocation2] sm:$0xff] }
  0x3a   : > { %569 = vst.msk [vmem:[#allocation2 + $0x11] sm:$0xff] %vm568_vm2, %v551_v3  ;;  %578 = vst.msk [vmem:[#allocation2 + $0xc1] sm:$0xff] %vm568_vm2, %v560_v4  ;;  %v603_v3 = vld [vmem:[#allocation2 + $0xa0] sm:$0xff] }
  0x3b   : > { %579 = vst.msk [vmem:[#allocation2 + $0xd1] sm:$0xff] %vm568_vm2, %v561_v5  ;;  %577 = vst.msk [vmem:[#allocation2 + $0xb1] sm:$0xff] %vm568_vm2, %v559_v6 }
  0x3c   : > { %580 = vst.msk [vmem:[#allocation2 + $0xe1] sm:$0xff] %vm568_vm2, %v562_v7  ;;  %572 = vst.msk [vmem:[#allocation2 + $0x41] sm:$0xff] %vm568_vm2, %v554_v8 }
  0x3d   : > { %581 = vst.msk [vmem:[#allocation2 + $0xf1] sm:$0xff] %vm568_vm2, %v563_v9  ;;  %573 = vst.msk [vmem:[#allocation2 + $0x51] sm:$0xff] %vm568_vm2, %v555_v10 }
  0x3e   : > { %582 = vst.msk [vmem:[#allocation2 + $0x101] sm:$0xff] %vm568_vm2, %v564_v11  ;;  %583 = vst.msk [vmem:[#allocation2 + $0x111] sm:$0xff] %vm568_vm2, %v565_v12 }
  0x3f   : > { %574 = vst.msk [vmem:[#allocation2 + $0x61] sm:$0xff] %vm568_vm2, %v556_v13  ;;  %575 = vst.msk [vmem:[#allocation2 + $0x71] sm:$0xff] %vm568_vm2, %v557_v14 }
  0x40   : > { %584 = vst.msk [vmem:[#allocation2 + $0x121] sm:$0xff] %vm568_vm2, %v566_v15  ;;  %576 = vst.msk [vmem:[#allocation2 + $0x81] sm:$0xff] %vm568_vm2, %v558_v16  ;;  %v5518_v19 = vld [vmem:[#allocation2 + $0x21] sm:$0xff]  ;;  %v5520_v20 = vld [vmem:[#allocation2 + $0x31] sm:$0xff] }
  0x41   : > { %v5522_v21 = vld [vmem:[#allocation2 + $0x11] sm:$0xff]  ;;  %v5526_v22 = vpack.c.bf16 %v5520_v20, %v5518_v19  ;;  %v5529_v24 = vld [vmem:[#allocation2 + $0xc1] sm:$0xff] }
  0x42   : > { %v643_v23 = vpack.c.bf16 %v5522_v21, %v627_v17  ;;  %v5531_v25 = vld [vmem:[#allocation2 + $0xd1] sm:$0xff]  ;;  %v766_v33 = vld [vmem:[#allocation2 + $0xc0] sm:$0xff]  ;;  %v838_v8 = vpack.c.bf16 %v5518_v19, %v5522_v21 }
  0x43   : > { %v5533_v26 = vld [vmem:[#allocation2 + $0xb1] sm:$0xff]  ;;  %661 = vrot.lane.b32.xlu1 %v5526_v22, %s5174_s29  ;;  %v5540_v27 = vpack.c.bf16 %v5531_v25, %v5529_v24  ;;  %v5547_v35 = vld [vmem:[#allocation2 + $0xc2] sm:$0xff] }
  0x44   : > { %659 = vrot.lane.b32.xlu0 %v643_v23, %s5174_s29  ;;  %v647_v28 = vpack.c.bf16 %v5533_v26, %v635_v18  ;;  %v5543_v30 = vld [vmem:[#allocation2 + $0xb2] sm:$0xff]  ;;  %v758_v37 = vld [vmem:[#allocation2 + $0x20] sm:$0xff]  ;;  %v842_v7 = vpack.c.bf16 %v5529_v24, %v5533_v26 }
  0x45   : > { %v5545_v32 = vld [vmem:[#allocation2 + $0x12] sm:$0xff]  ;;  %v712_v40 = vpack.c.bf16 %v5543_v30, %v700_v29  ;;  %v5558_v42 = vld [vmem:[#allocation2 + $0x22] sm:$0xff]  ;;  %v907_v13 = vpack.c.bf16 %v5547_v35, %v5543_v30 }
  0x46   : > { %v767_v34 = vld [vmem:[#allocation2 + $0xd0] sm:$0xff]  ;;  %v708_v41 = vpack.c.bf16 %v5545_v32, %v692_v31  ;;  %v768_v44 = vld [vmem:[#allocation2 + $0xe0] sm:$0xff]  ;;  %v903_v14 = vpack.c.bf16 %v5558_v42, %v5545_v32 }
  0x47   : > { %v5549_v36 = vld [vmem:[#allocation2 + $0xd2] sm:$0xff]  ;;  %v5551_v39 = vpack.c.bf16 %v767_v34, %v766_v33  ;;  %669 = vrot.lane.b32.xlu1 %v5540_v27, %s5174_s29  ;;  %v760_v46 = vld [vmem:[#allocation2 + $0x40] sm:$0xff]  ;;  %v778_v4 = vpack.c.bf16 %v768_v44, %v767_v34 }
  0x48   : > { %v759_v38 = vld [vmem:[#allocation2 + $0x30] sm:$0xff]  ;;  %667 = vrot.lane.b32.xlu0 %v647_v28, %s5174_s29  ;;  %v5582_v51 = vpack.c.bf16 %v5549_v36, %v5547_v35  ;;  %v5592_v55 = vld [vmem:[#allocation2 + $0x100] sm:$0xff]  ;;  %v5093_v28 = vld [vmem:[%s7003_s1 + $0x18] sm:$0xff]  }
  0x49   : > { %v5560_v43 = vld [vmem:[#allocation2 + $0x32] sm:$0xff]  ;;  %v5562_v45 = vpack.c.bf16 %v759_v38, %v758_v37  ;;  %624 = vst.msk [vmem:[#allocation4 + $0x78] sm:$0xff] %vm568_vm2, %v5551_v39  ;;  %v5594_v56 = vld [vmem:[#allocation2 + $0x60] sm:$0xff]  ;;  %v774_v5 = vpack.c.bf16 %v760_v46, %v759_v38 }
  0x4a   : > { %v5564_v47 = vld [vmem:[#allocation2 + $0xf0] sm:$0xff]  ;;  %v5586_v52 = vpack.c.bf16 %v5560_v43, %v5558_v42  ;;  %v833_v9 = vld [vmem:[#allocation2 + $0xe1] sm:$0xff] }
  0x4b   : > { %v5566_v48 = vld [vmem:[#allocation2 + $0x50] sm:$0xff]  ;;  %v5571_v49 = vpack.c.bf16 %v5564_v47, %v768_v44  ;;  %620 = vst.msk [vmem:[#allocation4 + $0x18] sm:$0xff] %vm568_vm2, %v5562_v45  ;;  %732 = vrot.lane.b32.xlu1 %v712_v40, %s5175_s11  ;;  %v779_v58 = vpack.c.bf16 %v5592_v55, %v5564_v47  ;;  %v825_v10 = vld [vmem:[#allocation2 + $0x41] sm:$0xff]  ;;  %v843_v11 = vpack.c.bf16 %v833_v9, %v5531_v25 }
  0x4c   : > { %v5574_v50 = vpack.c.bf16 %v5566_v48, %v760_v46  ;;  %724 = vrot.lane.b32.xlu0 %v708_v41, %s5175_s11  ;;  %v765_v53 = vld [vmem:[#allocation2 + $0xb0] sm:$0xff]  ;;  %v775_v59 = vpack.c.bf16 %v5594_v56, %v5566_v48  ;;  %v839_v12 = vpack.c.bf16 %v825_v10, %v5520_v20  ;;  %v898_v15 = vld [vmem:[#allocation2 + $0xe2] sm:$0xff] }
  0x4d   : > { %625 = vst.msk [vmem:[#allocation4 + $0x90] sm:$0xff] %vm568_vm2, %v5571_v49  ;;  %v757_v54 = vld [vmem:[#allocation2 + $0x10] sm:$0xff]  ;;  %v777_v62 = vpack.c.bf16 %v766_v33, %v765_v53  ;;  %v615_v6 = vpack.c.bf16 %v765_v53, %v603_v3  ;;  %v890_v16 = vld [vmem:[#allocation2 + $0x42] sm:$0xff]  ;;  %v908_v17 = vpack.c.bf16 %v898_v15, %v5549_v36 }
  0x4e   : > { %621 = vst.msk [vmem:[#allocation4 + $0x30] sm:$0xff] %vm568_vm2, %v5574_v50  ;;  %v5596_v57 = vld [vmem:[#allocation2 + $0x110] sm:$0xff]  ;;  %v773_v63 = vpack.c.bf16 %v758_v37, %v757_v54  ;;  %v611_v2 = vpack.c.bf16 %v757_v54, %v595_v1  ;;  %v904_v18 = vpack.c.bf16 %v890_v16, %v5560_v43  ;;  %v5090_v19 = vld [vmem:[%s7003_s1] sm:$0xff]   ;;  %v5091_v20 = vld [vmem:[%s7003_s1 + $0x8] sm:$0xff]  }
  0x4f   : > { %v5602_v60 = vld [vmem:[#allocation2 + $0x70] sm:$0xff]  ;;  %v5606_v61 = vpack.c.bf16 %v5596_v57, %v5592_v55  ;;  %734 = vrot.lane.b32.xlu1 %v5582_v51, %s5175_s11  ;;  %623 = vst.msk [vmem:[#allocation4 + $0x60] sm:$0xff] %vm568_vm2, %v615_v6  ;;  %4931 = vmatprep.subr.bf16.mxu0 %v5090_v19  ;;  %v641_v33 = vld [vmem:[#allocation2 + $0x101] sm:$0xff] }
  0x50   : > { %726 = vrot.lane.b32.xlu0 %v5586_v52, %s5175_s11  ;;  %v5614_v0 = vpack.c.bf16 %v5602_v60, %v5594_v56  ;;  %619 = vst.msk [vmem:[#allocation4] sm:$0xff] %vm568_vm2, %v611_v2  ;;  %5017 = vmatprep.subr.bf16.mxu1 %v5090_v19  ;;  %v5660_v21 = vld [vmem:[#allocation2 + $0xf1] sm:$0xff]  ;;  %v633_v35 = vld [vmem:[#allocation2 + $0x61] sm:$0xff] }
  0x51   : > { %626 = vst.msk [vmem:[#allocation4 + $0xa8] sm:$0xff] %vm568_vm2, %v5606_v61  ;;  %4932 = vmatpush3.bf16.msra.mxu0 %v5090_v19  ;;  %5022 = vmatpush3.bf16.msra.mxu1 %v5090_v19  ;;  %v5662_v23 = vld [vmem:[#allocation2 + $0x51] sm:$0xff]  ;;  %v1039_v25 = vpack.c.bf16 %v5660_v21, %v833_v9  ;;  %v698_v41 = vld [vmem:[#allocation2 + $0x62] sm:$0xff] }
  0x52   : > { %622 = vst.msk [vmem:[#allocation4 + $0x48] sm:$0xff] %vm568_vm2, %v5614_v0  ;;  %4933 = vmatprep.subr.bf16.mxu0 %v5091_v20  ;;  %5018 = vmatprep.subr.bf16.mxu1 %v5091_v20  ;;  %v5092_v24 = vld [vmem:[%s7003_s1 + $0x10] sm:$0xff]   ;;  %v1035_v26 = vpack.c.bf16 %v5662_v23, %v825_v10  ;;  %v764_v46 = vld [vmem:[#allocation2 + $0x80] sm:$0xff] }
  0x53   : > { %797 = vrot.lane.b32.xlu1 %v777_v62, %s5176_s12  ;;  %v1094_v29 = vld [vmem:[#allocation2 + $0xf2] sm:$0xff]  ;;  %v837_v53 = vld [vmem:[#allocation2 + $0x121] sm:$0xff] }
  0x54   : > { %789 = vrot.lane.b32.xlu0 %v773_v63, %s5176_s12  ;;  %v1086_v30 = vld [vmem:[#allocation2 + $0x52] sm:$0xff]  ;;  %v1104_v31 = vpack.c.bf16 %v1094_v29, %v898_v15  ;;  %v829_v47 = vld [vmem:[#allocation2 + $0x81] sm:$0xff] }
  0x55   : > { %4934 = vmatpush3.bf16.msra.mxu0 %v5091_v20  ;;  %5023 = vmatpush3.bf16.msra.mxu1 %v5091_v20  ;;  %v1100_v32 = vpack.c.bf16 %v1086_v30, %v890_v16  ;;  %v642_v34 = vld [vmem:[#allocation2 + $0x111] sm:$0xff]  ;;  %v905_v56 = vpack.c.bf16 %v698_v41, %v1086_v30 }
  0x56   : > { %4935 = vmatprep.subr.bf16.mxu0 %v5092_v24  ;;  %5019 = vmatprep.subr.bf16.mxu1 %v5092_v24  ;;  %v634_v36 = vld [vmem:[#allocation2 + $0x71] sm:$0xff]  ;;  %v650_v37 = vpack.c.bf16 %v642_v34, %v641_v33  ;;  %v845_v48 = vpack.c.bf16 %v837_v53, %v642_v34 }
  0x57   : > { %799 = vrot.lane.b32.xlu1 %v778_v4, %s5176_s12  ;;  %v646_v38 = vpack.c.bf16 %v634_v36, %v633_v35  ;;  %v707_v40 = vld [vmem:[#allocation2 + $0x112] sm:$0xff]  ;;  %v841_v54 = vpack.c.bf16 %v829_v47, %v634_v36 }
  0x58   : > { %791 = vrot.lane.b32.xlu0 %v774_v5, %s5176_s12  ;;  %v699_v42 = vld [vmem:[#allocation2 + $0x72] sm:$0xff] }
  0x59   : > { %4936 = vmatpush3.bf16.msra.mxu0 %v5092_v24  ;;  %5024 = vmatpush3.bf16.msra.mxu1 %v5092_v24  ;;  %v711_v44 = vpack.c.bf16 %v699_v42, %v698_v41  ;;  %v968_v62 = vld [vmem:[#allocation2 + $0x130] sm:$0xff] }
  0x5a   : > { %4937 = vmatprep.subr.bf16.mxu0 %v5093_v28  ;;  %5020 = vmatprep.subr.bf16.mxu1 %v5093_v28  ;;  %v960_v63 = vld [vmem:[#allocation2 + $0x90] sm:$0xff] }
  0x5b   : > { %862 = vrot.lane.b32.xlu1 %v842_v7, %s5177_s19  ;;  %v972_v2 = vpack.c.bf16 %v960_v63, %v764_v46  ;;  %v1033_v3 = vld [vmem:[#allocation2 + $0x131] sm:$0xff] }
  0x5c   : > { %854 = vrot.lane.b32.xlu0 %v838_v8, %s5177_s19  ;;  %v1025_v4 = vld [vmem:[#allocation2 + $0x91] sm:$0xff]  ;;  %v1041_v5 = vpack.c.bf16 %v1033_v3, %v837_v53 }
  0x5d   : > { %4938 = vmatpush3.bf16.msra.mxu0 %v5093_v28  ;;  %5025 = vmatpush3.bf16.msra.mxu1 %v5093_v28  ;;  %v1037_v6 = vpack.c.bf16 %v1025_v4, %v829_v47  ;;  %v1090_v8 = vld [vmem:[#allocation2 + $0x92] sm:$0xff] }
  0x5f   : > { %864 = vrot.lane.b32.xlu1 %v843_v11, %s5177_s19 }
  0x60   : > { %856 = vrot.lane.b32.xlu0 %v839_v12, %s5177_s19 }
  0x63   : > { %927 = vrot.lane.b32.xlu1 %v907_v13, %s5178_s20 }
  0x64   : > { %919 = vrot.lane.b32.xlu0 %v903_v14, %s5178_s20 }
  0x67   : > { %929 = vrot.lane.b32.xlu1 %v908_v17, %s5178_s20 }
  0x68   : > { %921 = vrot.lane.b32.xlu0 %v904_v18, %s5178_s20 }
  0x6b   : > { %993 = vrot.lane.b32.xlu1 %v5551_v39, %s5179_s23  ;;  %v706_v39 = vld [vmem:[#allocation2 + $0x102] sm:$0xff] }
  0x6c   : > { %985 = vrot.lane.b32.xlu0 %v5562_v45, %s5179_s23  ;;  %v715_v43 = vpack.c.bf16 %v707_v40, %v706_v39  ;;  %v772_v45 = vld [vmem:[#allocation2 + $0x120] sm:$0xff]  ;;  %v909_v55 = vpack.c.bf16 %v706_v39, %v1094_v29 }
  0x6d   : > { %v976_v1 = vpack.c.bf16 %v968_v62, %v772_v45 }
  0x6f   : > { %995 = vrot.lane.b32.xlu1 %v5571_v49, %s5179_s23  ;;  %v780_v49 = vpack.c.bf16 %v772_v45, %v5596_v57  ;;  %v902_v57 = vld [vmem:[#allocation2 + $0x122] sm:$0xff] }
  0x70   : > { %987 = vrot.lane.b32.xlu0 %v5574_v50, %s5179_s23  ;;  %v776_v50 = vpack.c.bf16 %v764_v46, %v5602_v60 }
  0x73   : > { %1058 = vrot.lane.b32.xlu1 %v5540_v27, %s5180_s22 }
  0x74   : > { %1050 = vrot.lane.b32.xlu0 %v5526_v22, %s5180_s22  ;;  %v5094_v22 = vld [vmem:[%s7003_s1 + $0x20] ss:$0 sps:$4 sm:$0xff]  }
  0x75   : > { %5047 = vmatprep.subr.msk.bf16.mxu0 %vm1214_vm3, %v5094_v22  ;;  %5048 = vmatprep.subr.msk.bf16.mxu1 %vm1214_vm3, %v5094_v22  ;;  %v1216_v27 = vsel %vm1214_vm3, %v5094_v22, 0 }
  0x76   : > { %4940 = vmatpush3.bf16.msra.mxu0 %v1216_v27  ;;  %5026 = vmatpush3.bf16.msra.mxu1 %v1216_v27 }
  0x77   : > { %1060 = vrot.lane.b32.xlu1 %v1039_v25, %s5180_s22 }
  0x78   : > { %1052 = vrot.lane.b32.xlu0 %v1035_v26, %s5180_s22 }
  0x7b   : > { %1123 = vrot.lane.b32.xlu1 %v5582_v51, %s5181_s24  ;;  %v844_v51 = vpack.c.bf16 %v641_v33, %v5660_v21 }
  0x7c   : > { %1115 = vrot.lane.b32.xlu0 %v5586_v52, %s5181_s24  ;;  %v840_v52 = vpack.c.bf16 %v633_v35, %v5662_v23 }
  0x7f   : > { %671 = vrot.lane.b32.xlu1 %v1039_v25, %s5174_s29 }
  0x80   : > { %663 = vrot.lane.b32.xlu0 %v1035_v26, %s5174_s29 }
  0x83   : > { %1125 = vrot.lane.b32.xlu1 %v1104_v31, %s5181_s24 }
  0x84   : > { %1117 = vrot.lane.b32.xlu0 %v1100_v32, %s5181_s24 }
  0x87   : > { %673 = vrot.lane.b32.xlu1 %v650_v37, %s5174_s29 }
  0x88   : > { %665 = vrot.lane.b32.xlu0 %v646_v38, %s5174_s29 }
  0x8b   : > { %736 = vrot.lane.b32.xlu1 %v1104_v31, %s5175_s11 }
  0x8c   : > { %728 = vrot.lane.b32.xlu0 %v1100_v32, %s5175_s11 }
  0x8f   : > { %738 = vrot.lane.b32.xlu1 %v715_v43, %s5175_s11 }
  0x90   : > { %730 = vrot.lane.b32.xlu0 %v711_v44, %s5175_s11 }
  0x93   : > { %801 = vrot.lane.b32.xlu1 %v779_v58, %s5176_s12  ;;  %v894_v58 = vld [vmem:[#allocation2 + $0x82] sm:$0xff] }
  0x94   : > { %793 = vrot.lane.b32.xlu0 %v775_v59, %s5176_s12  ;;  %v910_v59 = vpack.c.bf16 %v902_v57, %v707_v40  ;;  %v906_v60 = vpack.c.bf16 %v894_v58, %v699_v42  ;;  %v1102_v12 = vpack.c.bf16 %v1090_v8, %v894_v58 }
  0x97   : > { %803 = vrot.lane.b32.xlu1 %v780_v49, %s5176_s12 }
  0x98   : > { %795 = vrot.lane.b32.xlu0 %v776_v50, %s5176_s12 }
  0x9b   : > { %866 = vrot.lane.b32.xlu1 %v844_v51, %s5177_s19 }
  0x9c   : > { %858 = vrot.lane.b32.xlu0 %v840_v52, %s5177_s19 }
  0x9f   : > { %868 = vrot.lane.b32.xlu1 %v845_v48, %s5177_s19 }
  0xa0   : > { %860 = vrot.lane.b32.xlu0 %v841_v54, %s5177_s19 }
  0xa3   : > { %931 = vrot.lane.b32.xlu1 %v909_v55, %s5178_s20 }
  0xa4   : > { %923 = vrot.lane.b32.xlu0 %v905_v56, %s5178_s20 }
  0xa7   : > { %933 = vrot.lane.b32.xlu1 %v910_v59, %s5178_s20 }
  0xa8   : > { %925 = vrot.lane.b32.xlu0 %v906_v60, %s5178_s20 }
  0xab   : > { %997 = vrot.lane.b32.xlu1 %v5606_v61, %s5179_s23 }
  0xac   : > { %989 = vrot.lane.b32.xlu0 %v5614_v0, %s5179_s23  ;;  %v1098_v0 = vld [vmem:[#allocation2 + $0x132] sm:$0xff] }
  0xad   : > { %v1106_v11 = vpack.c.bf16 %v1098_v0, %v902_v57 }
  0xaf   : > { %999 = vrot.lane.b32.xlu1 %v976_v1, %s5179_s23 }
  0xb0   : > { %991 = vrot.lane.b32.xlu0 %v972_v2, %s5179_s23 }
  0xb3   : > { %1062 = vrot.lane.b32.xlu1 %v650_v37, %s5180_s22 }
  0xb4   : > { %1054 = vrot.lane.b32.xlu0 %v646_v38, %s5180_s22 }
  0xb5   : > { %v662_v7 = vpop.permute.xlu1 %661 }
  0xb6   : > { %v660_v61 = vpop.permute.xlu0 %659  ;;  %685 = vst.msk [vmem:[#allocation4 + $0x18] sm:$0xff] %vm683_vm4, %v662_v7 }
  0xb7   : > { %684 = vst.msk [vmem:[#allocation4] sm:$0xff] %vm683_vm4, %v660_v61  ;;  %1064 = vrot.lane.b32.xlu1 %v1041_v5, %s5180_s22 }
  0xb8   : > { %1056 = vrot.lane.b32.xlu0 %v1037_v6, %s5180_s22 }
  0xb9   : > { %v670_v9 = vpop.permute.xlu1 %669 }
  0xba   : > { %v668_v10 = vpop.permute.xlu0 %667  ;;  %689 = vst.msk [vmem:[#allocation4 + $0x78] sm:$0xff] %vm683_vm4, %v670_v9 }
  0xbb   : > { %688 = vst.msk [vmem:[#allocation4 + $0x60] sm:$0xff] %vm683_vm4, %v668_v10  ;;  %1127 = vrot.lane.b32.xlu1 %v715_v43, %s5181_s24 }
  0xbc   : > { %1119 = vrot.lane.b32.xlu0 %v711_v44, %s5181_s24 }
  0xbd   : > { %v733_v13 = vpop.permute.xlu1 %732 }
  0xbe   : > { %v725_v14 = vpop.permute.xlu0 %724  ;;  %753 = vst.msk [vmem:[#allocation4 + $0x60] sm:$0xff] %vm748_vm5, %v733_v13 }
  0xbf   : > { %749 = vst.msk [vmem:[#allocation4] sm:$0xff] %vm748_vm5, %v725_v14  ;;  %1129 = vrot.lane.b32.xlu1 %v1106_v11, %s5181_s24 }
  0xc0   : > { %1121 = vrot.lane.b32.xlu0 %v1102_v12, %s5181_s24 }
  0xc1   : > { %v735_v15 = vpop.permute.xlu1 %734 }
  0xc2   : > { %v727_v16 = vpop.permute.xlu0 %726  ;;  %754 = vst.msk [vmem:[#allocation4 + $0x78] sm:$0xff] %vm748_vm5, %v735_v15 }
  0xc3   : > { %750 = vst.msk [vmem:[#allocation4 + $0x18] sm:$0xff] %vm748_vm5, %v727_v16 }
  0xc5   : > { %v798_v17 = vpop.permute.xlu1 %797 }
  0xc6   : > { %v790_v18 = vpop.permute.xlu0 %789  ;;  %818 = vst.msk [vmem:[#allocation4 + $0x60] sm:$0xff] %vm813_vm6, %v798_v17  ;;  %v4592_v17 = vld [vmem:[%s7004_s2] ss:$0 sm:$0xff] }
  0xc7   : > { %814 = vst.msk [vmem:[#allocation4] sm:$0xff] %vm813_vm6, %v790_v18 }
  0xc9   : > { %v800_v19 = vpop.permute.xlu1 %799 }
  0xca   : > { %v792_v20 = vpop.permute.xlu0 %791  ;;  %819 = vst.msk [vmem:[#allocation4 + $0x78] sm:$0xff] %vm813_vm6, %v800_v19 }
  0xcb   : > { %815 = vst.msk [vmem:[#allocation4 + $0x18] sm:$0xff] %vm813_vm6, %v792_v20 }
  0xcd   : > { %v863_v21 = vpop.permute.xlu1 %862 }
  0xce   : > { %v855_v23 = vpop.permute.xlu0 %854  ;;  %883 = vst.msk [vmem:[#allocation4 + $0x60] sm:$0xff] %vm878_vm7, %v863_v21 }
  0xcf   : > { %879 = vst.msk [vmem:[#allocation4] sm:$0xff] %vm878_vm7, %v855_v23 }
  0xd1   : > { %v865_v24 = vpop.permute.xlu1 %864 }
  0xd2   : > { %v857_v25 = vpop.permute.xlu0 %856  ;;  %884 = vst.msk [vmem:[#allocation4 + $0x78] sm:$0xff] %vm878_vm7, %v865_v24 }
  0xd3   : > { %880 = vst.msk [vmem:[#allocation4 + $0x18] sm:$0xff] %vm878_vm7, %v857_v25 }
  0xd5   : > { %v928_v26 = vpop.permute.xlu1 %927 }
  0xd6   : > { %v920_v28 = vpop.permute.xlu0 %919  ;;  %948 = vst.msk [vmem:[#allocation4 + $0x60] sm:$0xff] %vm943_vm8, %v928_v26 }
  0xd7   : > { %944 = vst.msk [vmem:[#allocation4] sm:$0xff] %vm943_vm8, %v920_v28 }
  0xd9   : > { %v930_v22 = vpop.permute.xlu1 %929 }
  0xda   : > { %v922_v27 = vpop.permute.xlu0 %921  ;;  %949 = vst.msk [vmem:[#allocation4 + $0x78] sm:$0xff] %vm943_vm8, %v930_v22 }
  0xdb   : > { %945 = vst.msk [vmem:[#allocation4 + $0x18] sm:$0xff] %vm943_vm8, %v922_v27 }
  0xdd   : > { %v994_v29 = vpop.permute.xlu1 %993 }
  0xde   : > { %v986_v30 = vpop.permute.xlu0 %985  ;;  %1014 = vst.msk [vmem:[#allocation4 + $0x60] sm:$0xff] %vm1009_vm9, %v994_v29 }
  0xdf   : > { %1010 = vst.msk [vmem:[#allocation4] sm:$0xff] %vm1009_vm9, %v986_v30 }
  0xe1   : > { %v996_v31 = vpop.permute.xlu1 %995 }
  0xe2   : > { %v988_v32 = vpop.permute.xlu0 %987  ;;  %1015 = vst.msk [vmem:[#allocation4 + $0x78] sm:$0xff] %vm1009_vm9, %v996_v31 }
  0xe3   : > { %1011 = vst.msk [vmem:[#allocation4 + $0x18] sm:$0xff] %vm1009_vm9, %v988_v32 }
  0xe5   : > { %v1059_v33 = vpop.permute.xlu1 %1058 }
  0xe6   : > { %v1051_v34 = vpop.permute.xlu0 %1050  ;;  %1079 = vst.msk [vmem:[#allocation4 + $0x60] sm:$0xff] %vm1074_vm10, %v1059_v33 }
  0xe7   : > { %1075 = vst.msk [vmem:[#allocation4] sm:$0xff] %vm1074_vm10, %v1051_v34 }
  0xe9   : > { %v1061_v35 = vpop.permute.xlu1 %1060 }
  0xea   : > { %v1053_v36 = vpop.permute.xlu0 %1052  ;;  %1080 = vst.msk [vmem:[#allocation4 + $0x78] sm:$0xff] %vm1074_vm10, %v1061_v35 }
  0xeb   : > { %1076 = vst.msk [vmem:[#allocation4 + $0x18] sm:$0xff] %vm1074_vm10, %v1053_v36 }
  0xed   : > { %v1124_v37 = vpop.permute.xlu1 %1123 }
  0xee   : > { %v1116_v38 = vpop.permute.xlu0 %1115  ;;  %1144 = vst.msk [vmem:[#allocation4 + $0x60] sm:$0xff] %vm1139_vm11, %v1124_v37 }
  0xef   : > { %1140 = vst.msk [vmem:[#allocation4] sm:$0xff] %vm1139_vm11, %v1116_v38 }
  0xf1   : > { %v672_v39 = vpop.permute.xlu1 %671 }
  0xf2   : > { %v664_v40 = vpop.permute.xlu0 %663  ;;  %690 = vst.msk [vmem:[#allocation4 + $0x90] sm:$0xff] %vm683_vm4, %v672_v39 }
  0xf3   : > { %686 = vst.msk [vmem:[#allocation4 + $0x30] sm:$0xff] %vm683_vm4, %v664_v40 }
  0xf5   : > { %v1126_v41 = vpop.permute.xlu1 %1125  ;;  %v1152_v44 = vld [vmem:[#allocation4 + $0x60] sm:$0xff] }
  0xf6   : > { %v1118_v42 = vpop.permute.xlu0 %1117  ;;  %v1148_v43 = vld [vmem:[#allocation4] sm:$0xff]  ;;  %1145 = vst.msk [vmem:[#allocation4 + $0x78] sm:$0xff] %vm1139_vm11, %v1126_v41  ;;  %4949 = vmatprep.mubr.msk.bf16.mxu1 %vm1189_vm12, %v1152_v44 }
  0xf7   : > { %1141 = vst.msk [vmem:[#allocation4 + $0x18] sm:$0xff] %vm1139_vm11, %v1118_v42  ;;  %4941 = vmatprep.mubr.msk.bf16.mxu0 %vm1189_vm12, %v1148_v43 }
  0xf9   : > { %v674_v45 = vpop.permute.xlu1 %673 }
  0xfa   : > { %v666_v46 = vpop.permute.xlu0 %665  ;;  %691 = vst.msk [vmem:[#allocation4 + $0xa8] sm:$0xff] %vm683_vm4, %v674_v45 }
  0xfb   : > { %687 = vst.msk [vmem:[#allocation4 + $0x48] sm:$0xff] %vm683_vm4, %v666_v46 }
  0xfd   : > { %v737_v49 = vpop.permute.xlu1 %736  ;;  %v1153_v52 = vld [vmem:[#allocation4 + $0x78] sm:$0xff] }
  0xfe   : > { %v729_v50 = vpop.permute.xlu0 %728  ;;  %v1149_v51 = vld [vmem:[#allocation4 + $0x18] sm:$0xff]  ;;  %755 = vst.msk [vmem:[#allocation4 + $0x90] sm:$0xff] %vm748_vm5, %v737_v49  ;;  %4950 = vmatmul.mubr.msk.bf16.vlgmr.msra.gmra.mrb[0].mxu1 %vm1189_vm12, %v1153_v52 }
  0xff   : > { %751 = vst.msk [vmem:[#allocation4 + $0x30] sm:$0xff] %vm748_vm5, %v729_v50  ;;  %4942 = vmatmul.mubr.msk.bf16.vlgmr.msra.gmra.mrb[0].mxu0 %vm1189_vm12, %v1149_v51 }
 0x101   : > { %v739_v53 = vpop.permute.xlu1 %738 }
 0x102   : > { %v731_v47 = vpop.permute.xlu0 %730  ;;  %756 = vst.msk [vmem:[#allocation4 + $0xa8] sm:$0xff] %vm748_vm5, %v739_v53 }
 0x103   : > { %752 = vst.msk [vmem:[#allocation4 + $0x48] sm:$0xff] %vm748_vm5, %v731_v47 }
 0x105   : > { %v802_v48 = vpop.permute.xlu1 %801 }
 0x106   : > { %v794_v54 = vpop.permute.xlu0 %793  ;;  %820 = vst.msk [vmem:[#allocation4 + $0x90] sm:$0xff] %vm813_vm6, %v802_v48 }
 0x107   : > { %816 = vst.msk [vmem:[#allocation4 + $0x30] sm:$0xff] %vm813_vm6, %v794_v54 }
 0x109   : > { %v804_v55 = vpop.permute.xlu1 %803 }
 0x10a   : > { %v796_v56 = vpop.permute.xlu0 %795  ;;  %821 = vst.msk [vmem:[#allocation4 + $0xa8] sm:$0xff] %vm813_vm6, %v804_v55 }
 0x10b   : > { %817 = vst.msk [vmem:[#allocation4 + $0x48] sm:$0xff] %vm813_vm6, %v796_v56 }
 0x10d   : > { %v867_v57 = vpop.permute.xlu1 %866 }
 0x10e   : > { %v859_v58 = vpop.permute.xlu0 %858  ;;  %885 = vst.msk [vmem:[#allocation4 + $0x90] sm:$0xff] %vm878_vm7, %v867_v57 }
 0x10f   : > { %881 = vst.msk [vmem:[#allocation4 + $0x30] sm:$0xff] %vm878_vm7, %v859_v58 }
 0x111   : > { %v869_v59 = vpop.permute.xlu1 %868 }
 0x112   : > { %v861_v60 = vpop.permute.xlu0 %860  ;;  %886 = vst.msk [vmem:[#allocation4 + $0xa8] sm:$0xff] %vm878_vm7, %v869_v59 }
 0x113   : > { %882 = vst.msk [vmem:[#allocation4 + $0x48] sm:$0xff] %vm878_vm7, %v861_v60 }
 0x115   : > { %v932_v62 = vpop.permute.xlu1 %931 }
 0x116   : > { %v924_v63 = vpop.permute.xlu0 %923  ;;  %950 = vst.msk [vmem:[#allocation4 + $0x90] sm:$0xff] %vm943_vm8, %v932_v62 }
 0x117   : > { %946 = vst.msk [vmem:[#allocation4 + $0x30] sm:$0xff] %vm943_vm8, %v924_v63 }
 0x119   : > { %v934_v1 = vpop.permute.xlu1 %933 }
 0x11a   : > { %v926_v2 = vpop.permute.xlu0 %925  ;;  %951 = vst.msk [vmem:[#allocation4 + $0xa8] sm:$0xff] %vm943_vm8, %v934_v1 }
 0x11b   : > { %947 = vst.msk [vmem:[#allocation4 + $0x48] sm:$0xff] %vm943_vm8, %v926_v2 }
 0x11d   : > { %v998_v3 = vpop.permute.xlu1 %997 }
 0x11e   : > { %v990_v4 = vpop.permute.xlu0 %989  ;;  %1016 = vst.msk [vmem:[#allocation4 + $0x90] sm:$0xff] %vm1009_vm9, %v998_v3 }
 0x11f   : > { %1012 = vst.msk [vmem:[#allocation4 + $0x30] sm:$0xff] %vm1009_vm9, %v990_v4 }
 0x121   : > { %v1000_v5 = vpop.permute.xlu1 %999 }
 0x122   : > { %v992_v6 = vpop.permute.xlu0 %991  ;;  %1017 = vst.msk [vmem:[#allocation4 + $0xa8] sm:$0xff] %vm1009_vm9, %v1000_v5 }
 0x123   : > { %1013 = vst.msk [vmem:[#allocation4 + $0x48] sm:$0xff] %vm1009_vm9, %v992_v6 }
 0x125   : > { %v1063_v7 = vpop.permute.xlu1 %1062 }
 0x126   : > { %v1055_v61 = vpop.permute.xlu0 %1054  ;;  %1081 = vst.msk [vmem:[#allocation4 + $0x90] sm:$0xff] %vm1074_vm10, %v1063_v7 }
 0x127   : > { %1077 = vst.msk [vmem:[#allocation4 + $0x30] sm:$0xff] %vm1074_vm10, %v1055_v61 }
 0x129   : > { %v1065_v0 = vpop.permute.xlu1 %1064 }
 0x12a   : > { %v1057_v8 = vpop.permute.xlu0 %1056  ;;  %1082 = vst.msk [vmem:[#allocation4 + $0xa8] sm:$0xff] %vm1074_vm10, %v1065_v0 }
 0x12b   : > { %1078 = vst.msk [vmem:[#allocation4 + $0x48] sm:$0xff] %vm1074_vm10, %v1057_v8 }
 0x12d   : > { %v1128_v9 = vpop.permute.xlu1 %1127 }
 0x12e   : > { %v1120_v10 = vpop.permute.xlu0 %1119  ;;  %1146 = vst.msk [vmem:[#allocation4 + $0x90] sm:$0xff] %vm1139_vm11, %v1128_v9 }
 0x12f   : > { %1142 = vst.msk [vmem:[#allocation4 + $0x30] sm:$0xff] %vm1139_vm11, %v1120_v10 }
 0x131   : > { %v1130_v11 = vpop.permute.xlu1 %1129 }
 0x132   : > { %v1122_v12 = vpop.permute.xlu0 %1121  ;;  %1147 = vst.msk [vmem:[#allocation4 + $0xa8] sm:$0xff] %vm1139_vm11, %v1130_v11 }
 0x133   : > { %1143 = vst.msk [vmem:[#allocation4 + $0x48] sm:$0xff] %vm1139_vm11, %v1122_v12 }
 0x135   : > { %v1154_v14 = vld [vmem:[#allocation4 + $0x90] sm:$0xff] }
 0x136   : > { %v1150_v13 = vld [vmem:[#allocation4 + $0x30] sm:$0xff]  ;;  %4953 = vmatprep.mubr.msk.bf16.mxu1 %vm1189_vm12, %v1154_v14 }
 0x137   : > { %4945 = vmatprep.mubr.msk.bf16.mxu0 %vm1189_vm12, %v1150_v13 }
 0x139   : > { %v1155_v16 = vld [vmem:[#allocation4 + $0xa8] sm:$0xff] }
 0x13a   : > { %v1151_v15 = vld [vmem:[#allocation4 + $0x48] sm:$0xff]  ;;  %4954 = vmatmul.mubr.msk.bf16.gmra.mrb[4].mxu1 %vm1189_vm12, %v1155_v16 }
 0x13b   : > { %4946 = vmatmul.mubr.msk.bf16.gmra.mrb[4].mxu0 %vm1189_vm12, %v1151_v15 }
 0x1d1   : > { %v4951_v19 = vpop.f32.mrb[0].mxu1 }
 0x1d2   : > { %v4943_v18 = vpop.f32.mrb[0].mxu0  ;;  %v1293_v21 = vadd.f32 %v4951_v19, %v4592_v17  ;;  %v1284_v24 = vpop.f32.mrb[1].mxu1 }
 0x1d3   : > { %v1261_v20 = vadd.f32 %v4943_v18, %v4592_v17  ;;  %v1252_v23 = vpop.f32.mrb[1].mxu0  ;;  %v1285_v26 = vadd.f32 %v4592_v17, %v1284_v24  ;;  %v4952_v22 = vpop.f32.mrb[2].mxu1 }
 0x1d4   : > { %v1253_v25 = vadd.f32 %v4592_v17, %v1252_v23  ;;  %v4944_v28 = vpop.f32.mrb[2].mxu0  ;;  %1326 = vst.msk [vmem:[#allocation3 + $0xd1] sm:$0xff] %vm469_vm0, %v1293_v21  ;;  %v1296_v29 = vadd.f32 %v4952_v22, %v4592_v17  ;;  %v1287_v31 = vpop.f32.mrb[3].mxu1 }
 0x1d5   : > { %1318 = vst.msk [vmem:[#allocation3 + $0x31] sm:$0xff] %vm469_vm0, %v1261_v20  ;;  %v1264_v27 = vadd.f32 %v4944_v28, %v4592_v17  ;;  %v1255_v30 = vpop.f32.mrb[3].mxu0  ;;  %1324 = vst.msk [vmem:[#allocation3 + $0xb1] sm:$0xff] %vm469_vm0, %v1285_v26  ;;  %v1288_v33 = vadd.f32 %v4592_v17, %v1287_v31 }
 0x1d6   : > { %1316 = vst.msk [vmem:[#allocation3 + $0x11] sm:$0xff] %vm469_vm0, %v1253_v25  ;;  %v1256_v32 = vadd.f32 %v4592_v17, %v1255_v30  ;;  %1327 = vst.msk [vmem:[#allocation3 + $0xe1] sm:$0xff] %vm469_vm0, %v1296_v29 }
 0x1d7   : > { %1319 = vst.msk [vmem:[#allocation3 + $0x41] sm:$0xff] %vm469_vm0, %v1264_v27  ;;  %1325 = vst.msk [vmem:[#allocation3 + $0xc1] sm:$0xff] %vm469_vm0, %v1288_v33 }
 0x1d8   : > { %1317 = vst.msk [vmem:[#allocation3 + $0x21] sm:$0xff] %vm469_vm0, %v1256_v32 }
 0x20d   : > { %v4955_v35 = vpop.f32.mrb[4].mxu1 }
 0x20e   : > { %v4947_v34 = vpop.f32.mrb[4].mxu0  ;;  %v1309_v37 = vadd.f32 %v4955_v35, %v4592_v17  ;;  %v1300_v39 = vpop.f32.mrb[5].mxu1 }
 0x20f   : > { %v1277_v36 = vadd.f32 %v4947_v34, %v4592_v17  ;;  %v1268_v38 = vpop.f32.mrb[5].mxu0  ;;  %v1301_v41 = vadd.f32 %v4592_v17, %v1300_v39  ;;  %v4956_v43 = vpop.f32.mrb[6].mxu1 }
 0x210   : > { %v1269_v40 = vadd.f32 %v4592_v17, %v1268_v38  ;;  %v4948_v42 = vpop.f32.mrb[6].mxu0  ;;  %1330 = vst.msk [vmem:[#allocation3 + $0x111] sm:$0xff] %vm469_vm0, %v1309_v37  ;;  %v1312_v45 = vadd.f32 %v4956_v43, %v4592_v17  ;;  %v1303_v49 = vpop.f32.mrb[7].mxu1 }
 0x211   : > { %1322 = vst.msk [vmem:[#allocation3 + $0x71] sm:$0xff] %vm469_vm0, %v1277_v36  ;;  %v1280_v44 = vadd.f32 %v4948_v42, %v4592_v17  ;;  %v1271_v46 = vpop.f32.mrb[7].mxu0  ;;  %1328 = vst.msk [vmem:[#allocation3 + $0xf1] sm:$0xff] %vm469_vm0, %v1301_v41  ;;  %v1304_v51 = vadd.f32 %v4592_v17, %v1303_v49 }
 0x212   : > { %1320 = vst.msk [vmem:[#allocation3 + $0x51] sm:$0xff] %vm469_vm0, %v1269_v40  ;;  %v1272_v50 = vadd.f32 %v4592_v17, %v1271_v46  ;;  %1331 = vst.msk [vmem:[#allocation3 + $0x121] sm:$0xff] %vm469_vm0, %v1312_v45 }
 0x213   : > { %1323 = vst.msk [vmem:[#allocation3 + $0x81] sm:$0xff] %vm469_vm0, %v1280_v44  ;;  %1329 = vst.msk [vmem:[#allocation3 + $0x101] sm:$0xff] %vm469_vm0, %v1304_v51 }
 0x214   : > { %1321 = vst.msk [vmem:[#allocation3 + $0x61] sm:$0xff] %vm469_vm0, %v1272_v50 }
 0x215 PF: > { %v1710_v52 = vld [vmem:[#allocation3 + $0x12] sm:$0xff]  ;;  %v5822_v53 = vld [vmem:[#allocation3 + $0x22] sm:$0xff]  ;;  %s5182_s11 = smov 32   ;;  %vm1409_vm13 = vcmask 261120   ;;  %s5183_s12 = smov 64   ;;  %vm1490_vm14 = vcmask 523520  }
 0x216   : > { %v1791_v47 = vld [vmem:[#allocation3 + $0x20] sm:$0xff]  ;;  %v1726_v48 = vmax.f32 %v1710_v52, 0.0  ;;  %v1727_v54 = vmax.f32 %v5822_v53, 0.0  ;;  %v5825_v55 = vld [vmem:[#allocation3 + $0x30] sm:$0xff]  ;;  %s5184_s19 = smov 96   ;;  %vm1571_vm15 = vcmask 785920   ;;  %s7017_s23 = scalar_lea.vmem %s7008_s6, %s5266_s17 }
 0x217   : > { %v1807_v56 = vmax.f32 %v1791_v47, 0.0  ;;  %v1418_v57 = vld [vmem:[#allocation3 + $0x1] sm:$0xff]  ;;  %v5827_v58 = vld [vmem:[#allocation3 + $0x11] sm:$0xff]  ;;  %v1808_v59 = vmax.f32 %v5825_v55, 0.0  ;;  %vm1653_vm0 = vcmask 1048320   ;;  %p4660_p6 = scmp.ne.s32.totalorder %s5163_s13, 1 }
 0x218   : > { %v1434_v60 = vmax.f32 %v1418_v57, 0.0  ;;  %v1435_v62 = vmax.f32 %v5827_v58, 0.0  ;;  %v1499_v63 = vld [vmem:[#allocation3 + $0x2] sm:$0xff]  ;;  %v1742_v2 = vpack.c.bf16 %v1727_v54, %v1726_v48  ;;  %v5835_v4 = vld [vmem:[#allocation3 + $0x31] sm:$0xff]  ;;  %s5185_s17 = smov (!%p4660_p6), 64   ;;  %s5186_s13 = smov (!%p4660_p6), 32  }
 0x219   : > { %v5831_v1 = vld [vmem:[#allocation3 + $0x21] sm:$0xff]  ;;  %v1515_v3 = vmax.f32 %v1499_v63, 0.0  ;;  %v5837_v5 = vld [vmem:[#allocation3 + $0x10] sm:$0xff]  ;;  %v1823_v6 = vpack.c.bf16 %v1808_v59, %v1807_v56  ;;  %v1888_v9 = vmax.f32 %v5835_v4, 0.0  ;;  %s5187_s22 = smov (!%p4660_p6), 96   ;;  %vm4425_vm1 = vcmask (!%p4660_p6), 64512  }
 0x21a   : > { %v1887_v7 = vmax.f32 %v5831_v1, 0.0  ;;  %v5842_v61 = vld [vmem:[#allocation3 + $0x40] sm:$0xff]  ;;  %v5844_v0 = vld [vmem:[#allocation3 + $0x50] sm:$0xff]  ;;  %1758 = vrot.lane.b32.xlu0 %v1742_v2, %s5182_s11  ;;  %v1450_v8 = vpack.c.bf16 %v1435_v62, %v1434_v60  ;;  %v1597_v13 = vmax.f32 %v5837_v5, 0.0  ;;  %v5097_v57 = vld [vmem:[%s5280_s27 + $0x48] sm:$0xff]   ;;  %vm4347_vm2 = vcmask (!%p4660_p6), 523264  }
 0x21b   : > { %v1712_v10 = vld [vmem:[#allocation3 + $0x32] sm:$0xff]  ;;  %v1809_v11 = vmax.f32 %v5842_v61, 0.0  ;;  %1839 = vrot.lane.b32.xlu1 %v1823_v6, %s5183_s12  ;;  %v1531_v12 = vpack.c.bf16 %v1726_v48, %v1515_v3  ;;  %v5853_v14 = vld [vmem:[#allocation3 + $0x42] sm:$0xff]  ;;  %v1810_v15 = vmax.f32 %v5844_v0, 0.0  ;;  %1411 = vst.msk [vmem:[#allocation4 + $0x18] sm:$0xff] %vm1409_vm13, %v1823_v6 }
 0x21c   : > { %v5856_v16 = vld [vmem:[#allocation3 + $0x60] sm:$0xff]  ;;  %v5858_v17 = vld [vmem:[#allocation3 + $0x70] sm:$0xff]  ;;  %v1903_v20 = vpack.c.bf16 %v1888_v9, %v1887_v7  ;;  %v1728_v21 = vmax.f32 %v1712_v10, 0.0  ;;  %v1729_v23 = vmax.f32 %v5853_v14, 0.0  ;;  %v1613_v25 = vpack.c.bf16 %v1807_v56, %v1597_v13  ;;  %v5105_v5 = vld [vmem:[%s5280_s27 + $0x68] sm:$0xff]  }
 0x21d   : > { %v1824_v18 = vpack.c.bf16 %v1810_v15, %v1809_v11  ;;  %v1811_v19 = vmax.f32 %v5856_v16, 0.0  ;;  %v1812_v24 = vmax.f32 %v5858_v17, 0.0  ;;  %v5881_v28 = vld [vmem:[#allocation3 + $0xc0] sm:$0xff]  ;;  %v5883_v22 = vld [vmem:[#allocation3 + $0xd0] sm:$0xff]  ;;  %v1614_v60 = vpack.c.bf16 %v1809_v11, %v1808_v59  ;;  %v5098_v59 = vld [vmem:[%s5280_s27 + $0x8] sm:$0xff]  }
 0x21e   : > { %1466 = vrot.lane.b32.xlu0 %v1450_v8, %s5182_s11  ;;  %v1743_v27 = vpack.c.bf16 %v1729_v23, %v1728_v21  ;;  %v1873_v29 = vld [vmem:[#allocation3 + $0x41] sm:$0xff]  ;;  %v1874_v30 = vld [vmem:[#allocation3 + $0x51] sm:$0xff]  ;;  %v1815_v31 = vmax.f32 %v5881_v28, 0.0  ;;  %v1816_v32 = vmax.f32 %v5883_v22, 0.0  ;;  %v1532_v39 = vpack.c.bf16 %v1728_v21, %v1727_v54 }
 0x21f   : > { %1547 = vrot.lane.b32.xlu1 %v1531_v12, %s5183_s12  ;;  %1412 = vst.msk [vmem:[#allocation4 + $0x30] sm:$0xff] %vm1409_vm13, %v1824_v18  ;;  %v5879_v26 = vpack.c.bf16 %v1812_v24, %v1811_v19  ;;  %v5893_v33 = vld [vmem:[#allocation3 + $0xe0] sm:$0xff]  ;;  %v5895_v34 = vld [vmem:[#allocation3 + $0xf0] sm:$0xff]  ;;  %v1889_v35 = vmax.f32 %v1873_v29, 0.0  ;;  %v1890_v36 = vmax.f32 %v1874_v30, 0.0  ;;  %v1694_v21 = vpack.c.bf16 %v1887_v7, %v1435_v62  ;;  %v5101_v7 = vld [vmem:[%s5280_s27 + $0x58] sm:$0xff]  }
 0x220   : > { %v1714_v37 = vld [vmem:[#allocation3 + $0x52] sm:$0xff]  ;;  %v5902_v38 = vpack.c.bf16 %v1816_v32, %v1815_v31  ;;  %v1715_v40 = vld [vmem:[#allocation3 + $0x62] sm:$0xff]  ;;  %v1817_v41 = vmax.f32 %v5893_v33, 0.0  ;;  %v1818_v42 = vmax.f32 %v5895_v34, 0.0  ;;  %1991 = vst.msk [vmem:[#allocation4 + $0x10] sm:$0xff] %vm1409_vm13, %v1532_v39 }
 0x221   : > { %1413 = vst.msk [vmem:[#allocation4 + $0x48] sm:$0xff] %vm1409_vm13, %v5879_v26  ;;  %v5909_v43 = vld [vmem:[#allocation3 + $0x100] sm:$0xff]  ;;  %v5911_v44 = vld [vmem:[#allocation3 + $0x110] sm:$0xff]  ;;  %v1730_v49 = vmax.f32 %v1714_v37, 0.0  ;;  %v1904_v47 = vpack.c.bf16 %v1890_v36, %v1889_v35  ;;  %v1731_v48 = vmax.f32 %v1715_v40, 0.0  ;;  %1702 = vst.msk [vmem:[#allocation4 + $0x8] sm:$0xff] %vm1409_vm13, %v1694_v21 }
 0x222   : > { %1919 = vrot.lane.b32.xlu0 %v1903_v20, %s5184_s19  ;;  %v5913_v45 = vld [vmem:[#allocation3 + $0x61] sm:$0xff]  ;;  %v5915_v46 = vld [vmem:[#allocation3 + $0x71] sm:$0xff]  ;;  %1415 = vst.msk [vmem:[#allocation4 + $0x78] sm:$0xff] %vm1409_vm13, %v5902_v38  ;;  %v5925_v51 = vpack.c.bf16 %v1818_v42, %v1817_v41  ;;  %v7014_v54 = vmax.f32 %v5909_v43, 0.0  ;;  %v7013_v56 = vmax.f32 %v5911_v44, 0.0 }
 0x223   : > { %1629 = vrot.lane.b32.xlu1 %v1613_v25, %s5184_s19  ;;  %v5919_v50 = vld [vmem:[#allocation3 + $0x72] sm:$0xff]  ;;  %v5095_v52 = vld [vmem:[%s5280_s27 + $0x40] sm:$0xff]   ;;  %v1891_v3 = vmax.f32 %v5913_v45, 0.0  ;;  %v1892_v6 = vmax.f32 %v5915_v46, 0.0  ;;  %v1744_v10 = vpack.c.bf16 %v1731_v48, %v1730_v49  ;;  %v1695_v25 = vpack.c.bf16 %v1889_v35, %v1888_v9 }
 0x224   : > { %v5096_v53 = vld [vmem:[%s5280_s27] sm:$0xff]   ;;  %4709 = vmatprep.subr.bf16.mxu0 %v5095_v52  ;;  %1416 = vst.msk [vmem:[#allocation4 + $0x90] sm:$0xff] %vm1409_vm13, %v5925_v51  ;;  %v5944_v2 = vpack.c.bf16 %v7013_v56, %v7014_v54  ;;  %v5099_v8 = vld [vmem:[%s5280_s27 + $0x50] sm:$0xff]   ;;  %v1732_v11 = vmax.f32 %v5919_v50, 0.0  ;;  %v5102_v45 = vld [vmem:[%s5280_s27 + $0x18] sm:$0xff]  }
 0x225   : > { %v5936_v63 = vld [vmem:[#allocation3 + $0x81] sm:$0xff]  ;;  %4710 = vmatpush3.bf16.msra.mxu0 %v5096_v53  ;;  %v5956_v12 = vld [vmem:[#allocation3 + $0x90] sm:$0xff]  ;;  %v1696_v58 = vpack.c.bf16 %v1891_v3, %v1890_v36  ;;  %1703 = vst.msk [vmem:[#allocation4 + $0x20] sm:$0xff] %vm1409_vm13, %v1695_v25 }
 0x226   : > { %1760 = vrot.lane.b32.xlu0 %v1743_v27, %s5182_s11  ;;  %v5948_v61 = vld [vmem:[#allocation3 + $0x82] sm:$0xff]  ;;  %4711 = vmatprep.subr.bf16.mxu0 %v5097_v57  ;;  %1417 = vst.msk [vmem:[#allocation4 + $0xa8] sm:$0xff] %vm1409_vm13, %v5944_v2  ;;  %v1984_v27 = vpack.c.bf16 %v1730_v49, %v1729_v23  ;;  %v5972_v29 = vld [vmem:[#allocation3 + $0xb2] sm:$0xff]  ;;  %v5986_v4 = vpack.c.bf16 %v1732_v11, %v1731_v48  ;;  %v1814_v35 = vmax.f32 %v5956_v12, 0.0 }
 0x227   : > { %1468 = vrot.lane.b32.xlu1 %v1903_v20, %s5182_s11  ;;  %v5950_v55 = vld [vmem:[#allocation3 + $0x80] sm:$0xff]  ;;  %v1893_v20 = vmax.f32 %v5936_v63, 0.0  ;;  %v5100_v30 = vld [vmem:[%s5280_s27 + $0x10] sm:$0xff]   ;;  %v1733_v9 = vmax.f32 %v5948_v61, 0.0  ;;  %1704 = vst.msk [vmem:[#allocation4 + $0x38] sm:$0xff] %vm1409_vm13, %v1696_v58  ;;  %v1734_v49 = vmax.f32 %v5972_v29, 0.0  ;;  %v1905_v48 = vpack.c.bf16 %v1892_v6, %v1891_v3 }
 0x228   : > { %v5978_v1 = vld [vmem:[#allocation3 + $0xc2] sm:$0xff]  ;;  %1992 = vst.msk [vmem:[#allocation4 + $0x28] sm:$0xff] %vm1409_vm13, %v1984_v27  ;;  %v1813_v14 = vmax.f32 %v5950_v55, 0.0  ;;  %v5991_v23 = vld [vmem:[#allocation3 + $0xb1] sm:$0xff]  ;;  %1993 = vst.msk [vmem:[#allocation4 + $0x40] sm:$0xff] %vm1409_vm13, %v5986_v4 }
 0x229   : > { %4712 = vmatpush3.bf16.msra.mxu0 %v5098_v59  ;;  %v1697_v62 = vpack.c.bf16 %v1893_v20, %v1892_v6  ;;  %v5998_v37 = vld [vmem:[#allocation3 + $0xc1] sm:$0xff]  ;;  %v6008_v53 = vld [vmem:[#allocation3 + $0xd1] sm:$0xff]  ;;  %v1735_v57 = vmax.f32 %v5978_v1, 0.0 }
 0x22a   : > { %1841 = vrot.lane.b32.xlu0 %v1824_v18, %s5183_s12  ;;  %v5958_v18 = vld [vmem:[#allocation3 + $0x91] sm:$0xff]  ;;  %4713 = vmatprep.subr.bf16.mxu0 %v5099_v8  ;;  %v6002_v40 = vld [vmem:[#allocation3 + $0xa1] sm:$0xff]  ;;  %v1895_v25 = vmax.f32 %v5998_v37, 0.0 }
 0x22b   : > { %1549 = vrot.lane.b32.xlu1 %v1532_v39, %s5183_s12  ;;  %1705 = vst.msk [vmem:[#allocation4 + $0x50] sm:$0xff] %vm1409_vm13, %v1697_v62  ;;  %v1894_v36 = vmax.f32 %v5958_v18, 0.0  ;;  %v1369_v39 = vld [vmem:[#allocation3] sm:$0xff]  ;;  %v6016_v59 = vld [vmem:[#allocation3 + $0xd2] sm:$0xff]  ;;  %v1442_v0 = vmax.f32 %v6002_v40, 0.0  ;;  %v5112_v50 = vld [vmem:[%s5280_s27 + $0x88] sm:$0xff]   ;;  %v1746_v63 = vpack.c.bf16 %v1735_v57, %v1734_v49 }
 0x22c   : > { %v1385_v46 = vmax.f32 %v1369_v39, 0.0  ;;  %v6006_v52 = vld [vmem:[#allocation3 + $0xa2] sm:$0xff]  ;;  %v6030_v12 = vld [vmem:[#allocation3 + $0xf2] sm:$0xff]  ;;  %v1736_v58 = vmax.f32 %v6016_v59, 0.0 }
 0x22d   : > { %4714 = vmatpush3.bf16.msra.mxu0 %v5100_v30  ;;  %v6026_v3 = vld [vmem:[#allocation3 + $0xe2] sm:$0xff]  ;;  %v1523_v16 = vmax.f32 %v6006_v52, 0.0  ;;  %v2001_v62 = vld [vmem:[#allocation4 + $0x10] sm:$0xff]  ;;  %v1738_v39 = vmax.f32 %v6030_v12, 0.0 }
 0x22e   : > { %1921 = vrot.lane.b32.xlu0 %v1904_v47, %s5184_s19  ;;  %4715 = vmatprep.subr.bf16.mxu0 %v5101_v7  ;;  %v1401_v8 = vpack.c.bf16 %v1597_v13, %v1385_v46  ;;  %v6028_v6 = vld [vmem:[#allocation3 + $0xe1] sm:$0xff]  ;;  %v1958_v46 = vld [vmem:[#allocation3 + $0x92] sm:$0xff] }
 0x22f   : > { %1631 = vrot.lane.b32.xlu1 %v1614_v60, %s5184_s19  ;;  %v6014_v60 = vld [vmem:[#allocation3 + $0xb0] sm:$0xff]  ;;  %v5104_v21 = vld [vmem:[%s5280_s27 + $0x20] sm:$0xff]   ;;  %v1897_v7 = vmax.f32 %v6028_v6, 0.0  ;;  %v5106_v40 = vld [vmem:[%s5280_s27 + $0x28] sm:$0xff]   ;;  %v1974_v52 = vmax.f32 %v1958_v46, 0.0  ;;  %4961 = vmatprep.mubr.msk.bf16.mxu1 %vm1409_vm13, %v2001_v62  ;;  %v1535_v18 = vpack.c.bf16 %v1734_v49, %v1523_v16 }
 0x230   : > { %1410 = vst.msk [vmem:[#allocation4] sm:$0xff] %vm1409_vm13, %v1401_v8  ;;  %v5110_v13 = vld [vmem:[%s5280_s27 + $0x80] sm:$0xff]   ;;  %v1605_v30 = vmax.f32 %v6014_v60, 0.0  ;;  %v1826_v8 = vpack.c.bf16 %v1814_v35, %v1813_v14  ;;  %v1906_v35 = vpack.c.bf16 %v1894_v36, %v1893_v20  ;;  %v1882_v20 = vld [vmem:[#allocation3 + $0xf1] sm:$0xff] }
 0x231   : > { %4716 = vmatpush3.bf16.msra.mxu0 %v5102_v45  ;;  %4957 = vmatprep.subr.bf16.mxu1 %v5110_v13  ;;  %v5107_v45 = vld [vmem:[%s5280_s27 + $0x70] sm:$0xff]   ;;  %v2007_v54 = vld [vmem:[#allocation4 + $0x40] sm:$0xff] }
 0x232   : > { %1762 = vrot.lane.b32.xlu0 %v1744_v10, %s5182_s11  ;;  %v1615_v10 = vpack.c.bf16 %v1811_v19, %v1810_v15  ;;  %v1745_v15 = vpack.c.bf16 %v1733_v9, %v1732_v11  ;;  %v1896_v19 = vmax.f32 %v6008_v53, 0.0  ;;  %v1737_v11 = vmax.f32 %v6026_v3, 0.0  ;;  %4958 = vmatpush3.bf16.msra.mxu1 %v5110_v13  ;;  %v5109_v13 = vld [vmem:[%s5280_s27 + $0x78] sm:$0xff]   ;;  %v1883_v1 = vld [vmem:[#allocation3 + $0x101] sm:$0xff]  ;;  %v1806_v62 = vld [vmem:[#allocation3 + $0x130] sm:$0xff] }
 0x233   : > { %1470 = vrot.lane.b32.xlu1 %v1904_v47, %s5182_s11  ;;  %v5103_v47 = vld [vmem:[%s5280_s27 + $0x60] sm:$0xff]   ;;  %4959 = vmatprep.subr.bf16.mxu1 %v5112_v50  ;;  %v1617_v29 = vpack.c.bf16 %v1815_v31, %v1605_v30  ;;  %v1724_v31 = vld [vmem:[#allocation3 + $0x112] sm:$0xff] }
 0x234   : > { %4717 = vmatprep.subr.bf16.mxu0 %v5103_v47  ;;  %v1377_v47 = vld [vmem:[#allocation3 + $0xa0] sm:$0xff]  ;;  %v1699_v17 = vpack.c.bf16 %v1897_v7, %v1896_v19  ;;  %v1988_v55 = vpack.c.bf16 %v1738_v39, %v1737_v11  ;;  %v1884_v53 = vld [vmem:[#allocation3 + $0x111] sm:$0xff] }
 0x235   : > { %4718 = vmatpush3.bf16.msra.mxu0 %v5104_v21  ;;  %v2004_v21 = vld [vmem:[#allocation4 + $0x28] sm:$0xff]  ;;  %v1393_v56 = vmax.f32 %v1377_v47, 0.0  ;;  %v1966_v3 = vld [vmem:[#allocation3 + $0x132] sm:$0xff] }
 0x236   : > { %1843 = vrot.lane.b32.xlu0 %v5879_v26, %s5183_s12  ;;  %v1443_v26 = vmax.f32 %v5991_v23, 0.0  ;;  %4719 = vmatprep.subr.bf16.mxu0 %v5105_v5  ;;  %v1986_v5 = vpack.c.bf16 %v1974_v52, %v1733_v9  ;;  %1707 = vst.msk [vmem:[#allocation4 + $0x80] sm:$0xff] %vm1409_vm13, %v1699_v17  ;;  %1996 = vst.msk [vmem:[#allocation4 + $0x88] sm:$0xff] %vm1409_vm13, %v1988_v55  ;;  %v1898_v9 = vmax.f32 %v1882_v20, 0.0  ;;  %v1723_v28 = vld [vmem:[#allocation3 + $0x102] sm:$0xff]  ;;  %v1982_v16 = vmax.f32 %v1966_v3, 0.0 }
 0x237   : > { %1551 = vrot.lane.b32.xlu1 %v1984_v27, %s5183_s12  ;;  %4960 = vmatpush3.bf16.msra.mxu1 %v5112_v50  ;;  %v1725_v49 = vld [vmem:[#allocation3 + $0x122] sm:$0xff]  ;;  %v1739_v59 = vmax.f32 %v1723_v28, 0.0 }
 0x238   : > { %v1698_v27 = vpack.c.bf16 %v1895_v25, %v1443_v26  ;;  %1994 = vst.msk [vmem:[#allocation4 + $0x58] sm:$0xff] %vm1409_vm13, %v1986_v5  ;;  %v1908_v60 = vpack.c.bf16 %v1898_v9, %v1897_v7  ;;  %v1805_v50 = vld [vmem:[#allocation3 + $0x120] sm:$0xff] }
 0x239   : > { %4720 = vmatpush3.bf16.msra.mxu0 %v5106_v40  ;;  %v1821_v7 = vmax.f32 %v1805_v50, 0.0 }
 0x23a   : > { %1923 = vrot.lane.b32.xlu0 %v1905_v48, %s5184_s19  ;;  %1706 = vst.msk [vmem:[#allocation4 + $0x68] sm:$0xff] %vm1409_vm13, %v1698_v27  ;;  %4721 = vmatprep.subr.bf16.mxu0 %v5107_v45 }
 0x23b   : > { %1633 = vrot.lane.b32.xlu1 %v1615_v10, %s5184_s19  ;;  %v5108_v10 = vld [vmem:[%s5280_s27 + $0x30] sm:$0xff]   ;;  %4962 = vmatmul.mubr.msk.bf16.vlgmr.msra.gmra.mrb[0].mxu1 %vm1409_vm13, %v2004_v21 }
 0x23c   : > { %4965 = vmatprep.mubr.msk.bf16.mxu1 %vm1409_vm13, %v2007_v54  ;;  %v1987_v54 = vpack.c.bf16 %v1736_v58, %v1735_v57  ;;  %v1885_v57 = vld [vmem:[#allocation3 + $0x121] sm:$0xff] }
 0x23d   : > { %4722 = vmatpush3.bf16.msra.mxu0 %v5108_v10  ;;  %v2016_v36 = vld [vmem:[#allocation4 + $0x88] sm:$0xff]  ;;  %v1901_v27 = vmax.f32 %v1885_v57, 0.0 }
 0x23e   : > { %1764 = vrot.lane.b32.xlu0 %v1745_v15, %s5182_s11  ;;  %v1405_v15 = vpack.c.bf16 %v1605_v30, %v1393_v56  ;;  %v1616_v56 = vpack.c.bf16 %v1813_v14, %v1812_v24  ;;  %4723 = vmatprep.subr.bf16.mxu0 %v5109_v13  ;;  %v1454_v24 = vpack.c.bf16 %v1443_v26, %v1442_v0  ;;  %v1899_v14 = vmax.f32 %v1883_v1, 0.0 }
 0x23f   : > { %1472 = vrot.lane.b32.xlu1 %v1905_v48, %s5182_s11  ;;  %v5111_v48 = vld [vmem:[%s5280_s27 + $0x38] sm:$0xff]   ;;  %1995 = vst.msk [vmem:[#allocation4 + $0x70] sm:$0xff] %vm1409_vm13, %v1987_v54  ;;  %v1740_v26 = vmax.f32 %v1724_v31, 0.0  ;;  %v1741_v0 = vmax.f32 %v1725_v49, 0.0 }
 0x240   : > { %1414 = vst.msk [vmem:[#allocation4 + $0x60] sm:$0xff] %vm1409_vm13, %v1405_v15  ;;  %v2010_v61 = vld [vmem:[#allocation4 + $0x58] sm:$0xff]  ;;  %v1700_v37 = vpack.c.bf16 %v1899_v14, %v1898_v9 }
 0x241   : > { %4724 = vmatpush3.bf16.msra.mxu0 %v5111_v48  ;;  %v1989_v30 = vpack.c.bf16 %v1740_v26, %v1739_v59 }
 0x242   : > { %1845 = vrot.lane.b32.xlu0 %v1826_v8, %s5183_s12  ;;  %1708 = vst.msk [vmem:[#allocation4 + $0x98] sm:$0xff] %vm1409_vm13, %v1700_v37 }
 0x243   : > { %1553 = vrot.lane.b32.xlu1 %v5986_v4, %s5183_s12  ;;  %4966 = vmatmul.mubr.msk.bf16.gmra.mrb[4].mxu1 %vm1409_vm13, %v2010_v61  ;;  %v1907_v4 = vpack.c.bf16 %v1896_v19, %v1895_v25  ;;  %v1618_v25 = vpack.c.bf16 %v1817_v41, %v1816_v32  ;;  %v1900_v19 = vmax.f32 %v1884_v53, 0.0  ;;  %1997 = vst.msk [vmem:[#allocation4 + $0xa0] sm:$0xff] %vm1409_vm13, %v1989_v30  ;;  %v7015_v41 = vmax.f32 %v5909_v43, 0.0 }
 0x245   : > { %v1701_v6 = vpack.c.bf16 %v1901_v27, %v1900_v19  ;;  %v1909_v32 = vpack.c.bf16 %v1900_v19, %v1899_v14  ;;  %v1619_v12 = vpack.c.bf16 %v7015_v41, %v1818_v42  ;;  %v7016_v42 = vmax.f32 %v5911_v44, 0.0 }
 0x246   : > { %1925 = vrot.lane.b32.xlu0 %v1906_v35, %s5184_s19  ;;  %v2013_v23 = vld [vmem:[#allocation4 + $0x70] sm:$0xff] }
 0x247   : > { %1635 = vrot.lane.b32.xlu1 %v1616_v56, %s5184_s19  ;;  %4969 = vmatprep.mubr.msk.bf16.mxu1 %vm1409_vm13, %v2013_v23  ;;  %1709 = vst.msk [vmem:[#allocation4 + $0xb0] sm:$0xff] %vm1409_vm13, %v1701_v6  ;;  %v1620_v43 = vpack.c.bf16 %v1821_v7, %v7016_v42 }
 0x24a   : > { %1766 = vrot.lane.b32.xlu0 %v1746_v63, %s5182_s11  ;;  %v2019_v22 = vld [vmem:[#allocation4 + $0xa0] sm:$0xff] }
 0x24b   : > { %1474 = vrot.lane.b32.xlu1 %v1454_v24, %s5182_s11  ;;  %4970 = vmatmul.mubr.msk.bf16.gmra.mrb[8].mxu1 %vm1409_vm13, %v2016_v36 }
 0x24c   : > { %4973 = vmatprep.mubr.msk.bf16.mxu1 %vm1409_vm13, %v2019_v22 }
 0x24e   : > { %1847 = vrot.lane.b32.xlu0 %v5902_v38, %s5183_s12  ;;  %v1747_v38 = vpack.c.bf16 %v1737_v11, %v1736_v58  ;;  %v1990_v58 = vpack.c.bf16 %v1982_v16, %v1741_v0  ;;  %v1749_v11 = vpack.c.bf16 %v1741_v0, %v1740_v26 }
 0x24f   : > { %1555 = vrot.lane.b32.xlu1 %v1535_v18, %s5183_s12 }
 0x250   : > { %1998 = vst.msk [vmem:[#allocation4 + $0xb8] sm:$0xff] %vm1409_vm13, %v1990_v58 }
 0x252   : > { %1927 = vrot.lane.b32.xlu0 %v1907_v4, %s5184_s19 }
 0x253   : > { %1637 = vrot.lane.b32.xlu1 %v1617_v29, %s5184_s19 }
 0x256   : > { %1768 = vrot.lane.b32.xlu0 %v1747_v38, %s5182_s11 }
 0x257   : > { %1476 = vrot.lane.b32.xlu1 %v1907_v4, %s5182_s11  ;;  %v2022_v33 = vld [vmem:[#allocation4 + $0xb8] sm:$0xff] }
 0x258   : > { %4974 = vmatmul.mubr.msk.bf16.gmra.mrb[12].mxu1 %vm1409_vm13, %v2022_v33 }
 0x25a   : > { %1849 = vrot.lane.b32.xlu0 %v5925_v51, %s5183_s12  ;;  %v1748_v51 = vpack.c.bf16 %v1739_v59, %v1738_v39  ;;  %v1886_v39 = vld [vmem:[#allocation3 + $0x131] sm:$0xff] }
 0x25b   : > { %1557 = vrot.lane.b32.xlu1 %v1987_v54, %s5183_s12  ;;  %v1902_v45 = vmax.f32 %v1886_v39, 0.0 }
 0x25d   : > { %v1910_v34 = vpack.c.bf16 %v1902_v45, %v1901_v27 }
 0x25e   : > { %1929 = vrot.lane.b32.xlu0 %v1908_v60, %s5184_s19 }
 0x25f   : > { %1639 = vrot.lane.b32.xlu1 %v1618_v25, %s5184_s19 }
 0x262   : > { %1770 = vrot.lane.b32.xlu0 %v1748_v51, %s5182_s11 }
 0x263   : > { %1478 = vrot.lane.b32.xlu1 %v1908_v60, %s5182_s11 }
 0x266   : > { %1851 = vrot.lane.b32.xlu0 %v5944_v2, %s5183_s12  ;;  %v1822_v2 = vmax.f32 %v1806_v62, 0.0 }
 0x267   : > { %1559 = vrot.lane.b32.xlu1 %v1988_v55, %s5183_s12 }
 0x268   : > { %v1830_v40 = vpack.c.bf16 %v1822_v2, %v1821_v7 }
 0x26a   : > { %1931 = vrot.lane.b32.xlu0 %v1909_v32, %s5184_s19 }
 0x26b   : > { %1641 = vrot.lane.b32.xlu1 %v1619_v12, %s5184_s19 }
 0x26e   : > { %1772 = vrot.lane.b32.xlu0 %v1749_v11, %s5182_s11 }
 0x26f   : > { %1480 = vrot.lane.b32.xlu1 %v1909_v32, %s5182_s11 }
 0x272   : > { %1853 = vrot.lane.b32.xlu0 %v1830_v40, %s5183_s12 }
 0x273   : > { %1561 = vrot.lane.b32.xlu1 %v1989_v30, %s5183_s12 }
 0x276   : > { %1933 = vrot.lane.b32.xlu0 %v1910_v34, %s5184_s19 }
 0x277   : > { %1643 = vrot.lane.b32.xlu1 %v1620_v43, %s5184_s19 }
 0x28c   : > { %v1759_v46 = vpop.permute.xlu0 %1758 }
 0x28d   : > { %1782 = vst.msk [vmem:[#allocation4 + $0x8] sm:$0xff] %vm1490_vm14, %v1759_v46  ;;  %v1840_v52 = vpop.permute.xlu1 %1839 }
 0x28e   : > { %1863 = vst.msk [vmem:[#allocation4 + $0x8] sm:$0xff] %vm1571_vm15, %v1840_v52 }
 0x290   : > { %v1467_v47 = vpop.permute.xlu0 %1466 }
 0x291   : > { %1491 = vst.msk [vmem:[#allocation4] sm:$0xff] %vm1490_vm14, %v1467_v47  ;;  %v1548_v8 = vpop.permute.xlu1 %1547 }
 0x292   : > { %1572 = vst.msk [vmem:[#allocation4] sm:$0xff] %vm1571_vm15, %v1548_v8 }
 0x294   : > { %v1920_v44 = vpop.permute.xlu0 %1919 }
 0x295   : > { %1943 = vst.msk [vmem:[#allocation4 + $0x8] sm:$0xff] %vm1653_vm0, %v1920_v44  ;;  %v1630_v10 = vpop.permute.xlu1 %1629  ;;  %v6226_v44 = vld [vmem:[%s5285_s30 + $0x80] sm:$0xff]  }
 0x296   : > { %1654 = vst.msk [vmem:[#allocation4] sm:$0xff] %vm1653_vm0, %v1630_v10  ;;  %4977 = vmatprep.subr.bf16.mxu0 %v6226_v44 }
 0x298   : > { %v1761_v21 = vpop.permute.xlu0 %1760 }
 0x299   : > { %1783 = vst.msk [vmem:[#allocation4 + $0x20] sm:$0xff] %vm1490_vm14, %v1761_v21  ;;  %v1469_v13 = vpop.permute.xlu1 %1468 }
 0x29a   : > { %1492 = vst.msk [vmem:[#allocation4 + $0x18] sm:$0xff] %vm1490_vm14, %v1469_v13 }
 0x29c   : > { %v1842_v5 = vpop.permute.xlu0 %1841  ;;  %v2000_v15 = vld [vmem:[#allocation4 + $0x8] sm:$0xff] }
 0x29d   : > { %1864 = vst.msk [vmem:[#allocation4 + $0x20] sm:$0xff] %vm1571_vm15, %v1842_v5  ;;  %v1550_v35 = vpop.permute.xlu1 %1549  ;;  %2193 = vmatprep.mubr.bf16.mxu0 %v2000_v15  ;;  %v1999_v48 = vld [vmem:[#allocation4] sm:$0xff]  ;;  %v6237_v5 = vld [vmem:[%s5285_s30 + $0x88] sm:$0xff]  }
 0x29e   : > { %1573 = vst.msk [vmem:[#allocation4 + $0x18] sm:$0xff] %vm1571_vm15, %v1550_v35  ;;  %2194 = vmatmul.mubr.bf16.vlgmr.msra.gmra.mrb[0].mxu0 %v1999_v48 }
 0x29f   : > { %4978 = vmatpush3.bf16.msra.mxu0 %v6226_v44 }
 0x2a0   : > { %v1922_v56 = vpop.permute.xlu0 %1921  ;;  %4979 = vmatprep.subr.bf16.mxu0 %v6237_v5 }
 0x2a1   : > { %1944 = vst.msk [vmem:[#allocation4 + $0x20] sm:$0xff] %vm1653_vm0, %v1922_v56  ;;  %v1632_v63 = vpop.permute.xlu1 %1631 }
 0x2a2   : > { %1655 = vst.msk [vmem:[#allocation4 + $0x18] sm:$0xff] %vm1653_vm0, %v1632_v63 }
 0x2a3   : > { %4980 = vmatpush3.bf16.msra.mxu0 %v6237_v5 }
 0x2a4   : > { %v1763_v17 = vpop.permute.xlu0 %1762 }
 0x2a5   : > { %1784 = vst.msk [vmem:[#allocation4 + $0x38] sm:$0xff] %vm1490_vm14, %v1763_v17  ;;  %v1471_v24 = vpop.permute.xlu1 %1470 }
 0x2a6   : > { %1493 = vst.msk [vmem:[#allocation4 + $0x30] sm:$0xff] %vm1490_vm14, %v1471_v24 }
 0x2a8   : > { %v1844_v54 = vpop.permute.xlu0 %1843  ;;  %v2003_v61 = vld [vmem:[#allocation4 + $0x20] sm:$0xff] }
 0x2a9   : > { %1865 = vst.msk [vmem:[#allocation4 + $0x38] sm:$0xff] %vm1571_vm15, %v1844_v54  ;;  %v1552_v55 = vpop.permute.xlu1 %1551  ;;  %2201 = vmatprep.mubr.bf16.mxu0 %v2003_v61  ;;  %v2002_v18 = vld [vmem:[#allocation4 + $0x18] sm:$0xff] }
 0x2aa   : > { %1574 = vst.msk [vmem:[#allocation4 + $0x30] sm:$0xff] %vm1571_vm15, %v1552_v55  ;;  %2202 = vmatmul.mubr.bf16.gmra.mrb[4].mxu0 %v2002_v18  ;;  %v5115_v55 = vld [vmem:[%s5285_s30 + $0x40] sm:$0xff]  }
 0x2ab   : > { %v5116_v18 = vld [vmem:[%s5285_s30] sm:$0xff]   ;;  %4783 = vmatprep.subr.bf16.mxu1 %v5115_v55 }
 0x2ac   : > { %v1924_v20 = vpop.permute.xlu0 %1923  ;;  %4784 = vmatpush3.bf16.msra.mxu1 %v5116_v18  ;;  %v5125_v18 = vld [vmem:[%s5285_s30 + $0x68] sm:$0xff]  }
 0x2ad   : > { %1945 = vst.msk [vmem:[#allocation4 + $0x38] sm:$0xff] %vm1653_vm0, %v1924_v20  ;;  %v1634_v1 = vpop.permute.xlu1 %1633  ;;  %v5117_v20 = vld [vmem:[%s5285_s30 + $0x48] sm:$0xff]  }
 0x2ae   : > { %1656 = vst.msk [vmem:[#allocation4 + $0x30] sm:$0xff] %vm1653_vm0, %v1634_v1  ;;  %v5118_v1 = vld [vmem:[%s5285_s30 + $0x8] sm:$0xff]   ;;  %4785 = vmatprep.subr.bf16.mxu1 %v5117_v20 }
 0x2b0   : > { %v1765_v4 = vpop.permute.xlu0 %1764  ;;  %4786 = vmatpush3.bf16.msra.mxu1 %v5118_v1 }
 0x2b1   : > { %1785 = vst.msk [vmem:[#allocation4 + $0x50] sm:$0xff] %vm1490_vm14, %v1765_v4  ;;  %v1473_v29 = vpop.permute.xlu1 %1472 }
 0x2b2   : > { %1494 = vst.msk [vmem:[#allocation4 + $0x48] sm:$0xff] %vm1490_vm14, %v1473_v29 }
 0x2b4   : > { %v1846_v9 = vpop.permute.xlu0 %1845  ;;  %v2006_v14 = vld [vmem:[#allocation4 + $0x38] sm:$0xff] }
 0x2b5   : > { %1866 = vst.msk [vmem:[#allocation4 + $0x50] sm:$0xff] %vm1571_vm15, %v1846_v9  ;;  %v1554_v23 = vpop.permute.xlu1 %1553  ;;  %2209 = vmatprep.mubr.bf16.mxu0 %v2006_v14  ;;  %v2005_v36 = vld [vmem:[#allocation4 + $0x30] sm:$0xff]  ;;  %v6268_v9 = vld [vmem:[%s441_s21] ss:$0 sm:$0xff] }
 0x2b6   : > { %1575 = vst.msk [vmem:[#allocation4 + $0x48] sm:$0xff] %vm1571_vm15, %v1554_v23  ;;  %2210 = vmatmul.mubr.bf16.gmra.mrb[8].mxu0 %v2005_v36 }
 0x2b8   : > { %v1926_v38 = vpop.permute.xlu0 %1925 }
 0x2b9   : > { %1946 = vst.msk [vmem:[#allocation4 + $0x50] sm:$0xff] %vm1653_vm0, %v1926_v38  ;;  %v1636_v37 = vpop.permute.xlu1 %1635 }
 0x2ba   : > { %1657 = vst.msk [vmem:[#allocation4 + $0x48] sm:$0xff] %vm1653_vm0, %v1636_v37 }
 0x2bc   : > { %v1767_v28 = vpop.permute.xlu0 %1766 }
 0x2bd   : > { %1786 = vst.msk [vmem:[#allocation4 + $0x68] sm:$0xff] %vm1490_vm14, %v1767_v28  ;;  %v1475_v31 = vpop.permute.xlu1 %1474 }
 0x2be   : > { %1495 = vst.msk [vmem:[#allocation4 + $0x60] sm:$0xff] %vm1490_vm14, %v1475_v31 }
 0x2c0   : > { %v1848_v49 = vpop.permute.xlu0 %1847  ;;  %v2009_v53 = vld [vmem:[#allocation4 + $0x50] sm:$0xff] }
 0x2c1   : > { %1867 = vst.msk [vmem:[#allocation4 + $0x68] sm:$0xff] %vm1571_vm15, %v1848_v49  ;;  %v1556_v57 = vpop.permute.xlu1 %1555  ;;  %2217 = vmatprep.mubr.bf16.mxu0 %v2009_v53  ;;  %v2008_v60 = vld [vmem:[#allocation4 + $0x48] sm:$0xff]  ;;  %v5119_v49 = vld [vmem:[%s5285_s30 + $0x50] sm:$0xff]  }
 0x2c2   : > { %1576 = vst.msk [vmem:[#allocation4 + $0x60] sm:$0xff] %vm1571_vm15, %v1556_v57  ;;  %2218 = vmatmul.mubr.bf16.gmra.mrb[12].mxu0 %v2008_v60  ;;  %v5120_v57 = vld [vmem:[%s5285_s30 + $0x10] sm:$0xff]   ;;  %4787 = vmatprep.subr.bf16.mxu1 %v5119_v49  ;;  %v2473_v60 = vld [vmem:[#allocation2 + $0x1] sm:$0xff] }
 0x2c3   : > { %4788 = vmatpush3.bf16.msra.mxu1 %v5120_v57 }
 0x2c4   : > { %v1928_v59 = vpop.permute.xlu0 %1927 }
 0x2c5   : > { %1947 = vst.msk [vmem:[#allocation4 + $0x68] sm:$0xff] %vm1653_vm0, %v1928_v59  ;;  %v1638_v26 = vpop.permute.xlu1 %1637  ;;  %v5121_v59 = vld [vmem:[%s5285_s30 + $0x58] sm:$0xff]  }
 0x2c6   : > { %1658 = vst.msk [vmem:[#allocation4 + $0x60] sm:$0xff] %vm1653_vm0, %v1638_v26  ;;  %v5122_v26 = vld [vmem:[%s5285_s30 + $0x18] sm:$0xff]   ;;  %4789 = vmatprep.subr.bf16.mxu1 %v5121_v59 }
 0x2c7   : > { %4790 = vmatpush3.bf16.msra.mxu1 %v5122_v26 }
 0x2c8   : > { %v1769_v3 = vpop.permute.xlu0 %1768 }
 0x2c9   : > { %1787 = vst.msk [vmem:[#allocation4 + $0x80] sm:$0xff] %vm1490_vm14, %v1769_v3  ;;  %v1477_v25 = vpop.permute.xlu1 %1476 }
 0x2ca   : > { %1496 = vst.msk [vmem:[#allocation4 + $0x78] sm:$0xff] %vm1490_vm14, %v1477_v25  ;;  %v2425_v25 = vld [vmem:[#allocation2] sm:$0xff] }
 0x2cc   : > { %v1850_v0 = vpop.permute.xlu0 %1849  ;;  %v2012_v16 = vld [vmem:[#allocation4 + $0x68] sm:$0xff] }
 0x2cd   : > { %1868 = vst.msk [vmem:[#allocation4 + $0x80] sm:$0xff] %vm1571_vm15, %v1850_v0  ;;  %v1558_v19 = vpop.permute.xlu1 %1557  ;;  %2225 = vmatprep.mubr.bf16.mxu0 %v2012_v16  ;;  %v2011_v27 = vld [vmem:[#allocation4 + $0x60] sm:$0xff] }
 0x2ce   : > { %1577 = vst.msk [vmem:[#allocation4 + $0x78] sm:$0xff] %vm1571_vm15, %v1558_v19  ;;  %2226 = vmatmul.mubr.bf16.gmra.mrb[16].mxu0 %v2011_v27  ;;  %v2489_v27 = vmax.f32 %v2473_v60, 0.0 }
 0x2d0   : > { %v1930_v30 = vpop.permute.xlu0 %1929 }
 0x2d1   : > { %1948 = vst.msk [vmem:[#allocation4 + $0x80] sm:$0xff] %vm1653_vm0, %v1930_v30  ;;  %v1640_v58 = vpop.permute.xlu1 %1639  ;;  %v2553_v30 = vld [vmem:[#allocation2 + $0x2] sm:$0xff] }
 0x2d2   : > { %1659 = vst.msk [vmem:[#allocation4 + $0x78] sm:$0xff] %vm1653_vm0, %v1640_v58 }
 0x2d4   : > { %v1771_v51 = vpop.permute.xlu0 %1770 }
 0x2d5   : > { %1788 = vst.msk [vmem:[#allocation4 + $0x98] sm:$0xff] %vm1490_vm14, %v1771_v51  ;;  %v1479_v6 = vpop.permute.xlu1 %1478 }
 0x2d6   : > { %1497 = vst.msk [vmem:[#allocation4 + $0x90] sm:$0xff] %vm1490_vm14, %v1479_v6 }
 0x2d8   : > { %v1852_v22 = vpop.permute.xlu0 %1851  ;;  %v2015_v32 = vld [vmem:[#allocation4 + $0x80] sm:$0xff] }
 0x2d9   : > { %1869 = vst.msk [vmem:[#allocation4 + $0x98] sm:$0xff] %vm1571_vm15, %v1852_v22  ;;  %v1560_v33 = vpop.permute.xlu1 %1559  ;;  %2233 = vmatprep.mubr.bf16.mxu0 %v2015_v32  ;;  %v2014_v41 = vld [vmem:[#allocation4 + $0x78] sm:$0xff]  ;;  %v2441_v32 = vmax.f32 %v2425_v25, 0.0 }
 0x2da   : > { %1578 = vst.msk [vmem:[#allocation4 + $0x90] sm:$0xff] %vm1571_vm15, %v1560_v33  ;;  %2234 = vmatmul.mubr.bf16.gmra.mrb[20].mxu0 %v2014_v41 }
 0x2dc   : > { %v1932_v12 = vpop.permute.xlu0 %1931 }
 0x2dd   : > { %1949 = vst.msk [vmem:[#allocation4 + $0x98] sm:$0xff] %vm1653_vm0, %v1932_v12  ;;  %v1642_v50 = vpop.permute.xlu1 %1641 }
 0x2de   : > { %1660 = vst.msk [vmem:[#allocation4 + $0x90] sm:$0xff] %vm1653_vm0, %v1642_v50  ;;  %v5123_v50 = vld [vmem:[%s5285_s30 + $0x60] sm:$0xff]  }
 0x2df   : > { %4791 = vmatprep.subr.bf16.mxu1 %v5123_v50 }
 0x2e0   : > { %v1773_v62 = vpop.permute.xlu0 %1772 }
 0x2e1   : > { %1789 = vst.msk [vmem:[#allocation4 + $0xb0] sm:$0xff] %vm1490_vm14, %v1773_v62  ;;  %v1481_v11 = vpop.permute.xlu1 %1480  ;;  %v5124_v62 = vld [vmem:[%s5285_s30 + $0x20] sm:$0xff]  }
 0x2e2   : > { %1498 = vst.msk [vmem:[#allocation4 + $0xa8] sm:$0xff] %vm1490_vm14, %v1481_v11  ;;  %4792 = vmatpush3.bf16.msra.mxu1 %v5124_v62 }
 0x2e3   : > { %4793 = vmatprep.subr.bf16.mxu1 %v5125_v18 }
 0x2e4   : > { %v1854_v7 = vpop.permute.xlu0 %1853  ;;  %v2018_v2 = vld [vmem:[#allocation4 + $0x98] sm:$0xff] }
 0x2e5   : > { %1870 = vst.msk [vmem:[#allocation4 + $0xb0] sm:$0xff] %vm1571_vm15, %v1854_v7  ;;  %v1562_v39 = vpop.permute.xlu1 %1561  ;;  %2241 = vmatprep.mubr.bf16.mxu0 %v2018_v2  ;;  %v2017_v40 = vld [vmem:[#allocation4 + $0x90] sm:$0xff]  ;;  %v2569_v2 = vmax.f32 %v2553_v30, 0.0 }
 0x2e6   : > { %1579 = vst.msk [vmem:[#allocation4 + $0xa8] sm:$0xff] %vm1571_vm15, %v1562_v39  ;;  %2242 = vmatmul.mubr.bf16.gmra.mrb[24].mxu0 %v2017_v40 }
 0x2e8   : > { %v1934_v45 = vpop.permute.xlu0 %1933 }
 0x2e9   : > { %1950 = vst.msk [vmem:[#allocation4 + $0xb0] sm:$0xff] %vm1653_vm0, %v1934_v45  ;;  %v1644_v34 = vpop.permute.xlu1 %1643 }
 0x2ea   : > { %1661 = vst.msk [vmem:[#allocation4 + $0xa8] sm:$0xff] %vm1653_vm0, %v1644_v34 }
 0x2f0   : > { %v2021_v42 = vld [vmem:[#allocation4 + $0xb0] sm:$0xff] }
 0x2f1   : > { %2249 = vmatprep.mubr.bf16.mxu0 %v2021_v42  ;;  %v2020_v43 = vld [vmem:[#allocation4 + $0xa8] sm:$0xff] }
 0x2f2   : > { %2250 = vmatmul.mubr.bf16.gmra.mrb[28].mxu0 %v2020_v43 }
 0x30e   : > { %v6221_v46 = vpop.f32.mrb[0].mxu1 }
 0x30f   : > { %v2292_v52 = vpop.f32.mrb[1].mxu1 }
 0x310   : > { %v6223_v47 = vpop.f32.mrb[2].mxu1 }
 0x311   : > { %v2295_v8 = vpop.f32.mrb[3].mxu1 }
 0x316   : > { %v6228_v10 = vpop.f32.mrb[4].mxu1 }
 0x317   : > { %v6231_v21 = vpop.f32.mrb[5].mxu1 }
 0x318   : > { %v6234_v13 = vpop.f32.mrb[6].mxu1 }
 0x319   : > { %v6239_v15 = vpop.f32.mrb[7].mxu1 }
 0x31e   : > { %v6243_v35 = vpop.f32.mrb[8].mxu1 }
 0x31f   : > { %v6245_v48 = vpop.f32.mrb[9].mxu1 }
 0x320   : > { %v6247_v56 = vpop.f32.mrb[10].mxu1 }
 0x321   : > { %v6249_v63 = vpop.f32.mrb[11].mxu1 }
 0x32b   : > { %v6251_v17 = vpop.f32.mrb[12].mxu1 }
 0x32c   : > { %v6253_v24 = vpop.f32.mrb[13].mxu1 }
 0x32d   : > { %v6255_v54 = vpop.f32.mrb[14].mxu1 }
 0x32e   : > { %v6257_v61 = vpop.f32.mrb[15].mxu1 }
 0x371   : > { %v4725_v4 = vpop.f32.mrb[0].mxu0 }
 0x372   : > { %v4726_v29 = vpop.f32.mrb[1].mxu0 }
 0x373   : > { %v4727_v14 = vadd.f32 %v4726_v29, %v4725_v4  ;;  %v4728_v23 = vpop.f32.mrb[2].mxu0  ;;  %v5126_v4 = vld [vmem:[%s5285_s30 + $0x28] sm:$0xff]  }
 0x374   : > { %v4729_v36 = vpop.f32.mrb[3].mxu0  ;;  %4794 = vmatpush3.bf16.msra.mxu1 %v5126_v4 }
 0x375   : > { %v4730_v38 = vadd.f32 %v4729_v36, %v4728_v23  ;;  %v2196_v37 = vadd.f32 %v4727_v14, %v6268_v9  ;;  %v5127_v23 = vld [vmem:[%s5285_s30 + $0x70] sm:$0xff]  }
 0x376   : > { %v5128_v36 = vld [vmem:[%s5285_s30 + $0x30] sm:$0xff]   ;;  %4795 = vmatprep.subr.bf16.mxu1 %v5127_v23 }
 0x377   : > { %v2293_v28 = vadd.f32 %v2292_v52, %v2196_v37  ;;  %v2199_v31 = vadd.f32 %v4730_v38, %v6268_v9 }
 0x378   : > { %4796 = vmatpush3.bf16.msra.mxu1 %v5128_v36 }
 0x379   : > { %2356 = vst.msk [vmem:[#allocation2 + $0x11] sm:$0xff] %vm1409_vm13, %v2293_v28  ;;  %v2296_v53 = vadd.f32 %v2295_v8, %v2199_v31 }
 0x37b   : > { %2357 = vst.msk [vmem:[#allocation2 + $0x21] sm:$0xff] %vm1409_vm13, %v2296_v53 }
 0x37d   : > { %v4731_v3 = vpop.f32.mrb[4].mxu0 }
 0x37e   : > { %v4732_v0 = vpop.f32.mrb[5].mxu0 }
 0x37f   : > { %v4733_v16 = vadd.f32 %v4732_v0, %v4731_v3  ;;  %v4734_v19 = vpop.f32.mrb[6].mxu0  ;;  %v5129_v0 = vld [vmem:[%s5285_s30 + $0x78] sm:$0xff]  }
 0x380   : > { %v4735_v58 = vpop.f32.mrb[7].mxu0  ;;  %v2474_v51 = vld [vmem:[#allocation2 + $0x11] sm:$0xff]  ;;  %4797 = vmatprep.subr.bf16.mxu1 %v5129_v0 }
 0x381   : > { %v2761_v6 = vld [vmem:[#allocation2 + $0x12] sm:$0xff]  ;;  %v2204_v33 = vadd.f32 %v4733_v16, %v6268_v9  ;;  %v4736_v41 = vadd.f32 %v4735_v58, %v4734_v19  ;;  %v2490_v12 = vmax.f32 %v2474_v51, 0.0 }
 0x382   : > { %v2633_v22 = vld [vmem:[#allocation2 + $0x10] sm:$0xff]  ;;  %v3002_v11 = vld [vmem:[#allocation2 + $0x22] sm:$0xff]  ;;  %v2777_v7 = vmax.f32 %v2761_v6, 0.0  ;;  %v5130_v16 = vld [vmem:[%s5285_s30 + $0x38] sm:$0xff]  }
 0x383   : > { %v2649_v39 = vmax.f32 %v2633_v22, 0.0  ;;  %v2475_v40 = vld [vmem:[#allocation2 + $0x21] sm:$0xff]  ;;  %v3018_v45 = vmax.f32 %v3002_v11, 0.0  ;;  %v2301_v34 = vadd.f32 %v6221_v46, %v2204_v33  ;;  %v2207_v42 = vadd.f32 %v4736_v41, %v6268_v9  ;;  %4798 = vmatpush3.bf16.msra.mxu1 %v5130_v16 }
 0x384   : > { %v2505_v43 = vpack.c.bf16 %v2490_v12, %v2489_v27  ;;  %v2634_v52 = vld [vmem:[#allocation2 + $0x20] sm:$0xff]  ;;  %v2491_v8 = vmax.f32 %v2475_v40, 0.0  ;;  %v2585_v29 = vpack.c.bf16 %v2777_v7, %v2569_v2  ;;  %5027 = vmatprep.subr.bf16.mxu1 %v6226_v44 }
 0x385   : > { %v2457_v55 = vpack.c.bf16 %v2649_v39, %v2441_v32  ;;  %2358 = vst.msk [vmem:[#allocation2 + $0x31] sm:$0xff] %vm1409_vm13, %v2301_v34  ;;  %v2304_v20 = vadd.f32 %v6223_v47, %v2207_v42  ;;  %v2793_v1 = vpack.c.bf16 %v3018_v45, %v2777_v7  ;;  %v2650_v14 = vmax.f32 %v2634_v52, 0.0 }
 0x386   : > { %2521 = vrot.lane.b32.xlu1 %v2505_v43, %s5182_s11  ;;  %v2745_v46 = vpack.c.bf16 %v2491_v8, %v2490_v12 }
 0x387   : > { %2465 = vst.msk [vmem:[#allocation4] sm:$0xff] %vm1409_vm13, %v2457_v55  ;;  %2359 = vst.msk [vmem:[#allocation2 + $0x41] sm:$0xff] %vm1409_vm13, %v2304_v20  ;;  %2809 = vrot.lane.b32.xlu0 %v2793_v1, %s5182_s11  ;;  %v2665_v31 = vpack.c.bf16 %v2650_v14, %v2649_v39 }
 0x388   : > { %2753 = vst.msk [vmem:[#allocation4 + $0x8] sm:$0xff] %vm1409_vm13, %v2745_v46 }
 0x389   : > { %v4737_v47 = vpop.f32.mrb[8].mxu0 }
 0x38a   : > { %2601 = vrot.lane.b32.xlu1 %v2585_v29, %s5183_s12  ;;  %v4738_v38 = vpop.f32.mrb[9].mxu0 }
 0x38b   : > { %v4739_v37 = vadd.f32 %v4738_v38, %v4737_v47  ;;  %v4740_v28 = vpop.f32.mrb[10].mxu0 }
 0x38c   : > { %v3003_v49 = vld [vmem:[#allocation2 + $0x32] sm:$0xff]  ;;  %v4741_v53 = vpop.f32.mrb[11].mxu0 }
 0x38d   : > { %v2843_v57 = vld [vmem:[#allocation2 + $0x30] sm:$0xff]  ;;  %v3019_v59 = vmax.f32 %v3003_v49, 0.0  ;;  %v2212_v26 = vadd.f32 %v4739_v37, %v6268_v9  ;;  %v4742_v3 = vadd.f32 %v4741_v53, %v4740_v28 }
 0x38e   : > { %v2476_v60 = vld [vmem:[#allocation2 + $0x31] sm:$0xff]  ;;  %2681 = vrot.lane.b32.xlu1 %v2665_v31, %s5184_s19  ;;  %v2859_v25 = vmax.f32 %v2843_v57, 0.0  ;;  %v2477_v27 = vld [vmem:[#allocation2 + $0x41] sm:$0xff] }
 0x38f   : > { %v2492_v19 = vmax.f32 %v2476_v60, 0.0  ;;  %v3034_v30 = vpack.c.bf16 %v3019_v59, %v3018_v45  ;;  %v2309_v58 = vadd.f32 %v6231_v21, %v2212_v26  ;;  %v2215_v51 = vadd.f32 %v4742_v3, %v6268_v9  ;;  %v3004_v33 = vld [vmem:[#allocation2 + $0x42] sm:$0xff]  ;;  %v3009_v53 = vld [vmem:[#allocation2 + $0x92] sm:$0xff] }
 0x390   : > { %v2874_v6 = vpack.c.bf16 %v2859_v25, %v2650_v14  ;;  %v2493_v32 = vmax.f32 %v2477_v27, 0.0  ;;  %v2636_v12 = vld [vmem:[#allocation2 + $0x40] sm:$0xff]  ;;  %v3020_v50 = vmax.f32 %v3004_v33, 0.0  ;;  %v3025_v3 = vmax.f32 %v3009_v53, 0.0 }
 0x391   : > { %v2506_v22 = vpack.c.bf16 %v2492_v19, %v2491_v8  ;;  %3042 = vst.msk [vmem:[#allocation4 + $0x10] sm:$0xff] %vm1409_vm13, %v3034_v30  ;;  %2360 = vst.msk [vmem:[#allocation2 + $0x51] sm:$0xff] %vm1409_vm13, %v2309_v58  ;;  %v2312_v41 = vadd.f32 %v6239_v15, %v2215_v51  ;;  %v2652_v62 = vmax.f32 %v2636_v12, 0.0 }
 0x392   : > { %2890 = vrot.lane.b32.xlu0 %v2874_v6, %s5183_s12  ;;  %2466 = vst.msk [vmem:[#allocation4 + $0x18] sm:$0xff] %vm1409_vm13, %v2874_v6  ;;  %v2746_v21 = vpack.c.bf16 %v2493_v32, %v2492_v19  ;;  %v2794_v34 = vpack.c.bf16 %v3020_v50, %v3019_v59 }
 0x393   : > { %2523 = vrot.lane.b32.xlu1 %v2506_v22, %s5182_s11  ;;  %2361 = vst.msk [vmem:[#allocation2 + $0x61] sm:$0xff] %vm1409_vm13, %v2312_v41  ;;  %v2666_v42 = vpack.c.bf16 %v2652_v62, %v2859_v25 }
 0x394   : > { %2754 = vst.msk [vmem:[#allocation4 + $0x20] sm:$0xff] %vm1409_vm13, %v2746_v21 }
 0x395   : > { %v4743_v11 = vpop.f32.mrb[12].mxu0 }
 0x396   : > { %2970 = vrot.lane.b32.xlu0 %v2506_v22, %s5184_s19  ;;  %v4744_v15 = vpop.f32.mrb[13].mxu0 }
 0x397   : > { %2603 = vrot.lane.b32.xlu1 %v3034_v30, %s5183_s12  ;;  %v4745_v7 = vadd.f32 %v4744_v15, %v4743_v11  ;;  %v4746_v2 = vpop.f32.mrb[14].mxu0 }
 0x398   : > { %v3005_v39 = vld [vmem:[#allocation2 + $0x52] sm:$0xff]  ;;  %v4747_v40 = vpop.f32.mrb[15].mxu0 }
 0x399   : > { %v3052_v45 = vld [vmem:[#allocation4 + $0x10] sm:$0xff]  ;;  %v3021_v52 = vmax.f32 %v3005_v39, 0.0  ;;  %v2220_v8 = vadd.f32 %v4745_v7, %v6268_v9  ;;  %v4748_v55 = vadd.f32 %v4747_v40, %v4746_v2 }
 0x39a   : > { %v2845_v43 = vld [vmem:[#allocation2 + $0x50] sm:$0xff]  ;;  %4981 = vmatprep.mubr.msk.bf16.mxu0 %vm1409_vm13, %v3052_v45  ;;  %2811 = vrot.lane.b32.xlu0 %v2794_v34, %s5182_s11  ;;  %v2479_v4 = vld [vmem:[#allocation2 + $0x61] sm:$0xff] }
 0x39b   : > { %v2861_v18 = vmax.f32 %v2845_v43, 0.0  ;;  %v2478_v20 = vld [vmem:[#allocation2 + $0x51] sm:$0xff]  ;;  %2683 = vrot.lane.b32.xlu1 %v2666_v42, %s5184_s19  ;;  %v3035_v46 = vpack.c.bf16 %v3021_v52, %v3020_v50  ;;  %v2317_v29 = vadd.f32 %v6228_v10, %v2220_v8  ;;  %v2223_v14 = vadd.f32 %v4748_v55, %v6268_v9  ;;  %v3006_v38 = vld [vmem:[#allocation2 + $0x62] sm:$0xff] }
 0x39c   : > { %v2494_v1 = vmax.f32 %v2478_v20, 0.0  ;;  %v2495_v36 = vmax.f32 %v2479_v4, 0.0  ;;  %v2638_v28 = vld [vmem:[#allocation2 + $0x60] sm:$0xff]  ;;  %v3022_v31 = vmax.f32 %v3006_v38, 0.0  ;;  %v2849_v43 = vld [vmem:[#allocation2 + $0x90] sm:$0xff] }
 0x39d   : > { %v2875_v23 = vpack.c.bf16 %v2861_v18, %v2652_v62  ;;  %3043 = vst.msk [vmem:[#allocation4 + $0x28] sm:$0xff] %vm1409_vm13, %v3035_v46  ;;  %2362 = vst.msk [vmem:[#allocation2 + $0x71] sm:$0xff] %vm1409_vm13, %v2317_v29  ;;  %v2320_v37 = vadd.f32 %v6234_v13, %v2223_v14  ;;  %v2654_v49 = vmax.f32 %v2638_v28, 0.0  ;;  %v2481_v34 = vld [vmem:[#allocation2 + $0xa1] sm:$0xff]  ;;  %v2929_v20 = vld [vmem:[#allocation2 + $0x91] sm:$0xff]  ;;  %v2865_v14 = vmax.f32 %v2849_v43, 0.0 }
 0x39e   : > { %v2507_v47 = vpack.c.bf16 %v2494_v1, %v2493_v32  ;;  %v2747_v10 = vpack.c.bf16 %v2495_v36, %v2494_v1  ;;  %v2795_v16 = vpack.c.bf16 %v3022_v31, %v3021_v52  ;;  %v2945_v53 = vmax.f32 %v2929_v20, 0.0 }
 0x39f   : > { %2892 = vrot.lane.b32.xlu0 %v2875_v23, %s5183_s12  ;;  %2467 = vst.msk [vmem:[#allocation4 + $0x30] sm:$0xff] %vm1409_vm13, %v2875_v23  ;;  %2363 = vst.msk [vmem:[#allocation2 + $0x81] sm:$0xff] %vm1409_vm13, %v2320_v37  ;;  %v2667_v19 = vpack.c.bf16 %v2654_v49, %v2861_v18  ;;  %v2497_v18 = vmax.f32 %v2481_v34, 0.0 }
 0x3a0   : > { %2525 = vrot.lane.b32.xlu1 %v2507_v47, %s5182_s11  ;;  %2755 = vst.msk [vmem:[#allocation4 + $0x38] sm:$0xff] %vm1409_vm13, %v2747_v10 }
 0x3a1   : > { %v4749_v57 = vpop.f32.mrb[16].mxu0 }
 0x3a2   : > { %v4750_v13 = vpop.f32.mrb[17].mxu0 }
 0x3a3   : > { %2972 = vrot.lane.b32.xlu0 %v2507_v47, %s5184_s19  ;;  %v4751_v60 = vadd.f32 %v4750_v13, %v4749_v57  ;;  %v4752_v59 = vpop.f32.mrb[18].mxu0  ;;  %v2561_v47 = vld [vmem:[#allocation2 + $0xa2] sm:$0xff] }
 0x3a4   : > { %2605 = vrot.lane.b32.xlu1 %v3035_v46, %s5183_s12  ;;  %v3007_v26 = vld [vmem:[#allocation2 + $0x72] sm:$0xff]  ;;  %v4753_v25 = vpop.f32.mrb[19].mxu0  ;;  %v3055_v0 = vld [vmem:[#allocation4 + $0x28] sm:$0xff] }
 0x3a5   : > { %v2847_v27 = vld [vmem:[#allocation2 + $0x70] sm:$0xff]  ;;  %v3023_v30 = vmax.f32 %v3007_v26, 0.0  ;;  %v4754_v58 = vadd.f32 %v4753_v25, %v4752_v59  ;;  %4982 = vmatmul.mubr.msk.bf16.vlgmr.msra.gmra.mrb[32].mxu0 %vm1409_vm13, %v3055_v0  ;;  %v2228_v51 = vadd.f32 %v4751_v60, %v6268_v9  ;;  %v2577_v26 = vmax.f32 %v2561_v47, 0.0 }
 0x3a6   : > { %v2863_v6 = vmax.f32 %v2847_v27, 0.0  ;;  %v2480_v22 = vld [vmem:[#allocation2 + $0x71] sm:$0xff]  ;;  %v3008_v32 = vld [vmem:[#allocation2 + $0x82] sm:$0xff] }
 0x3a7   : > { %2813 = vrot.lane.b32.xlu0 %v2795_v16, %s5182_s11  ;;  %v2496_v33 = vmax.f32 %v2480_v22, 0.0  ;;  %v6332_v41 = vld [vmem:[#allocation2 + $0x81] sm:$0xff]  ;;  %v3036_v12 = vpack.c.bf16 %v3023_v30, %v3022_v31  ;;  %v3024_v21 = vmax.f32 %v3008_v32, 0.0  ;;  %v2325_v50 = vadd.f32 %v6245_v48, %v2228_v51 }
 0x3a8   : > { %2685 = vrot.lane.b32.xlu1 %v2667_v19, %s5184_s19  ;;  %v2231_v62 = vadd.f32 %v4754_v58, %v6268_v9  ;;  %v2876_v11 = vpack.c.bf16 %v2863_v6, %v2654_v49  ;;  %v2944_v7 = vmax.f32 %v6332_v41, 0.0  ;;  %v2640_v40 = vld [vmem:[#allocation2 + $0x80] sm:$0xff] }
 0x3a9   : > { %v2508_v15 = vpack.c.bf16 %v2496_v33, %v2495_v36  ;;  %3044 = vst.msk [vmem:[#allocation4 + $0x40] sm:$0xff] %vm1409_vm13, %v3036_v12  ;;  %v3037_v2 = vpack.c.bf16 %v3025_v3, %v3024_v21  ;;  %2364 = vst.msk [vmem:[#allocation2 + $0xb1] sm:$0xff] %vm1409_vm13, %v2325_v50  ;;  %v2656_v45 = vmax.f32 %v2640_v40, 0.0  ;;  %v2796_v46 = vpack.c.bf16 %v3024_v21, %v3023_v30 }
 0x3aa   : > { %v2328_v39 = vadd.f32 %v6249_v63, %v2231_v62  ;;  %2468 = vst.msk [vmem:[#allocation4 + $0x48] sm:$0xff] %vm1409_vm13, %v2876_v11  ;;  %v2748_v48 = vpack.c.bf16 %v2944_v7, %v2496_v33  ;;  %v2433_v63 = vld [vmem:[#allocation2 + $0xa0] sm:$0xff] }
 0x3ab   : > { %2894 = vrot.lane.b32.xlu0 %v2876_v11, %s5183_s12  ;;  %3045 = vst.msk [vmem:[#allocation4 + $0x58] sm:$0xff] %vm1409_vm13, %v3037_v2  ;;  %v2668_v29 = vpack.c.bf16 %v2656_v45, %v2863_v6  ;;  %v2449_v36 = vmax.f32 %v2433_v63, 0.0  ;;  %v2877_v25 = vpack.c.bf16 %v2865_v14, %v2656_v45  ;;  %v2957_v6 = vpack.c.bf16 %v2945_v53, %v2944_v7 }
 0x3ac   : > { %2527 = vrot.lane.b32.xlu1 %v2508_v15, %s5182_s11  ;;  %2365 = vst.msk [vmem:[#allocation2 + $0xc1] sm:$0xff] %vm1409_vm13, %v2328_v39  ;;  %2756 = vst.msk [vmem:[#allocation4 + $0x50] sm:$0xff] %vm1409_vm13, %v2748_v48 }
 0x3ad   : > { %v4755_v42 = vpop.f32.mrb[20].mxu0 }
 0x3ae   : > { %v4756_v52 = vpop.f32.mrb[21].mxu0 }
 0x3af   : > { %2974 = vrot.lane.b32.xlu0 %v2508_v15, %s5184_s19  ;;  %v4757_v8 = vadd.f32 %v4756_v52, %v4755_v42  ;;  %v4758_v55 = vpop.f32.mrb[22].mxu0 }
 0x3b0   : > { %2607 = vrot.lane.b32.xlu1 %v3036_v12, %s5183_s12  ;;  %v4759_v1 = vpop.f32.mrb[23].mxu0  ;;  %v3058_v4 = vld [vmem:[#allocation4 + $0x40] sm:$0xff]  ;;  %v2482_v23 = vld [vmem:[#allocation2 + $0xb1] sm:$0xff] }
 0x3b1   : > { %v2236_v38 = vadd.f32 %v4757_v8, %v6268_v9  ;;  %v4760_v37 = vadd.f32 %v4759_v1, %v4758_v55  ;;  %4985 = vmatprep.mubr.msk.bf16.mxu0 %vm1409_vm13, %v3058_v4  ;;  %v2498_v28 = vmax.f32 %v2482_v23, 0.0  ;;  %v2562_v10 = vld [vmem:[#allocation2 + $0xb2] sm:$0xff] }
 0x3b2   : > { %v2641_v31 = vld [vmem:[#allocation2 + $0xb0] sm:$0xff]  ;;  %v3061_v49 = vld [vmem:[#allocation4 + $0x58] sm:$0xff]  ;;  %v2578_v0 = vmax.f32 %v2562_v10, 0.0 }
 0x3b3   : > { %2815 = vrot.lane.b32.xlu0 %v2796_v46, %s5182_s11  ;;  %v2657_v57 = vmax.f32 %v2641_v31, 0.0  ;;  %v2333_v13 = vadd.f32 %v6243_v35, %v2236_v38  ;;  %v2239_v60 = vadd.f32 %v4760_v37, %v6268_v9  ;;  %4986 = vmatmul.mubr.msk.bf16.gmra.mrb[36].mxu0 %vm1409_vm13, %v3061_v49  ;;  %v2509_v59 = vpack.c.bf16 %v2498_v28, %v2497_v18  ;;  %v2483_v3 = vld [vmem:[#allocation2 + $0xc1] sm:$0xff] }
 0x3b4   : > { %2687 = vrot.lane.b32.xlu1 %v2668_v29, %s5184_s19  ;;  %v2499_v16 = vmax.f32 %v2483_v3, 0.0  ;;  %v3010_v27 = vld [vmem:[#allocation2 + $0xc2] sm:$0xff]  ;;  %v2589_v22 = vpack.c.bf16 %v2578_v0, %v2577_v26 }
 0x3b5   : > { %v2461_v19 = vpack.c.bf16 %v2657_v57, %v2449_v36  ;;  %2366 = vst.msk [vmem:[#allocation2 + $0xd1] sm:$0xff] %vm1409_vm13, %v2333_v13  ;;  %v2336_v30 = vadd.f32 %v6247_v56, %v2239_v60  ;;  %v2642_v58 = vld [vmem:[#allocation2 + $0xc0] sm:$0xff]  ;;  %v3026_v51 = vmax.f32 %v3010_v27, 0.0 }
 0x3b6   : > { %v2749_v35 = vpack.c.bf16 %v2499_v16, %v2498_v28  ;;  %v2658_v32 = vmax.f32 %v2642_v58, 0.0 }
 0x3b7   : > { %2896 = vrot.lane.b32.xlu0 %v2877_v25, %s5183_s12  ;;  %2469 = vst.msk [vmem:[#allocation4 + $0x60] sm:$0xff] %vm1409_vm13, %v2461_v19  ;;  %2367 = vst.msk [vmem:[#allocation2 + $0xe1] sm:$0xff] %vm1409_vm13, %v2336_v30  ;;  %v2797_v11 = vpack.c.bf16 %v3026_v51, %v2578_v0 }
 0x3b8   : > { %2529 = vrot.lane.b32.xlu1 %v2509_v59, %s5182_s11  ;;  %2757 = vst.msk [vmem:[#allocation4 + $0x68] sm:$0xff] %vm1409_vm13, %v2749_v35  ;;  %v2669_v15 = vpack.c.bf16 %v2658_v32, %v2657_v57 }
 0x3b9   : > { %v4761_v33 = vpop.f32.mrb[24].mxu0 }
 0x3ba   : > { %v4762_v56 = vpop.f32.mrb[25].mxu0 }
 0x3bb   : > { %2976 = vrot.lane.b32.xlu0 %v2957_v6, %s5184_s19  ;;  %v4763_v12 = vadd.f32 %v4762_v56, %v4761_v33  ;;  %v4764_v21 = vpop.f32.mrb[26].mxu0 }
 0x3bc   : > { %2609 = vrot.lane.b32.xlu1 %v2589_v22, %s5183_s12  ;;  %v3011_v50 = vld [vmem:[#allocation2 + $0xd2] sm:$0xff]  ;;  %v4765_v62 = vpop.f32.mrb[27].mxu0 }
 0x3bd   : > { %v2851_v2 = vld [vmem:[#allocation2 + $0xd0] sm:$0xff]  ;;  %v3027_v41 = vmax.f32 %v3011_v50, 0.0  ;;  %v2244_v7 = vadd.f32 %v4763_v12, %v6268_v9  ;;  %v4766_v40 = vadd.f32 %v4765_v62, %v4764_v21 }
 0x3be   : > { %v2484_v39 = vld [vmem:[#allocation2 + $0xd1] sm:$0xff]  ;;  %v2867_v48 = vmax.f32 %v2851_v2, 0.0  ;;  %v2485_v34 = vld [vmem:[#allocation2 + $0xe1] sm:$0xff] }
 0x3bf   : > { %2817 = vrot.lane.b32.xlu0 %v2797_v11, %s5182_s11  ;;  %v2500_v45 = vmax.f32 %v2484_v39, 0.0  ;;  %v3038_v42 = vpack.c.bf16 %v3027_v41, %v3026_v51  ;;  %v2341_v43 = vadd.f32 %v6253_v24, %v2244_v7  ;;  %v2247_v63 = vadd.f32 %v4766_v40, %v6268_v9  ;;  %v3012_v18 = vld [vmem:[#allocation2 + $0xe2] sm:$0xff]  ;;  %v3017_v51 = vld [vmem:[#allocation2 + $0x132] sm:$0xff] }
 0x3c0   : > { %2689 = vrot.lane.b32.xlu1 %v2669_v15, %s5184_s19  ;;  %v2878_v52 = vpack.c.bf16 %v2867_v48, %v2658_v32  ;;  %v2501_v55 = vmax.f32 %v2485_v34, 0.0  ;;  %v2644_v1 = vld [vmem:[#allocation2 + $0xe0] sm:$0xff]  ;;  %v3028_v4 = vmax.f32 %v3012_v18, 0.0  ;;  %v3033_v12 = vmax.f32 %v3017_v51, 0.0 }
 0x3c1   : > { %v2510_v8 = vpack.c.bf16 %v2500_v45, %v2499_v16  ;;  %3046 = vst.msk [vmem:[#allocation4 + $0x70] sm:$0xff] %vm1409_vm13, %v3038_v42  ;;  %2368 = vst.msk [vmem:[#allocation2 + $0xf1] sm:$0xff] %vm1409_vm13, %v2341_v43  ;;  %v2344_v20 = vadd.f32 %v6257_v61, %v2247_v63  ;;  %v2660_v46 = vmax.f32 %v2644_v1, 0.0  ;;  %v2857_v43 = vld [vmem:[#allocation2 + $0x130] sm:$0xff] }
 0x3c2   : > { %2470 = vst.msk [vmem:[#allocation4 + $0x78] sm:$0xff] %vm1409_vm13, %v2878_v52  ;;  %v2750_v24 = vpack.c.bf16 %v2501_v55, %v2500_v45  ;;  %v2798_v37 = vpack.c.bf16 %v3028_v4, %v3027_v41 }
 0x3c3   : > { %2898 = vrot.lane.b32.xlu0 %v2878_v52, %s5183_s12  ;;  %2369 = vst.msk [vmem:[#allocation2 + $0x101] sm:$0xff] %vm1409_vm13, %v2344_v20  ;;  %v2670_v28 = vpack.c.bf16 %v2660_v46, %v2867_v48 }
 0x3c4   : > { %2531 = vrot.lane.b32.xlu1 %v2510_v8, %s5182_s11  ;;  %2758 = vst.msk [vmem:[#allocation4 + $0x80] sm:$0xff] %vm1409_vm13, %v2750_v24 }
 0x3c5   : > { %v4767_v29 = vpop.f32.mrb[28].mxu0 }
 0x3c6   : > { %v4768_v61 = vpop.f32.mrb[29].mxu0 }
 0x3c7   : > { %2978 = vrot.lane.b32.xlu0 %v2510_v8, %s5184_s19  ;;  %v4769_v14 = vadd.f32 %v4768_v61, %v4767_v29  ;;  %v4770_v23 = vpop.f32.mrb[30].mxu0  ;;  %v2873_v8 = vmax.f32 %v2857_v43, 0.0 }
 0x3c8   : > { %2611 = vrot.lane.b32.xlu1 %v3038_v42, %s5183_s12  ;;  %v3013_v47 = vld [vmem:[#allocation2 + $0xf2] sm:$0xff]  ;;  %v4771_v36 = vpop.f32.mrb[31].mxu0 }
 0x3c9   : > { %v3064_v38 = vld [vmem:[#allocation4 + $0x70] sm:$0xff]  ;;  %v3029_v31 = vmax.f32 %v3013_v47, 0.0  ;;  %v2252_v49 = vadd.f32 %v4769_v14, %v6268_v9  ;;  %v4772_v53 = vadd.f32 %v4771_v36, %v4770_v23 }
 0x3ca   : > { %v2853_v10 = vld [vmem:[#allocation2 + $0xf0] sm:$0xff]  ;;  %4989 = vmatprep.mubr.msk.bf16.mxu0 %vm1409_vm13, %v3064_v38  ;;  %v2487_v59 = vld [vmem:[#allocation2 + $0x101] sm:$0xff] }
 0x3cb   : > { %v2869_v57 = vmax.f32 %v2853_v10, 0.0  ;;  %v2486_v13 = vld [vmem:[#allocation2 + $0xf1] sm:$0xff]  ;;  %2819 = vrot.lane.b32.xlu0 %v2798_v37, %s5182_s11  ;;  %v3039_v26 = vpack.c.bf16 %v3029_v31, %v3028_v4  ;;  %v2349_v3 = vadd.f32 %v6251_v17, %v2252_v49  ;;  %v2255_v25 = vadd.f32 %v4772_v53, %v6268_v9  ;;  %v3014_v27 = vld [vmem:[#allocation2 + $0x102] sm:$0xff] }
 0x3cc   : > { %2691 = vrot.lane.b32.xlu1 %v2670_v28, %s5184_s19  ;;  %v2502_v60 = vmax.f32 %v2486_v13, 0.0  ;;  %v2503_v19 = vmax.f32 %v2487_v59, 0.0  ;;  %v2646_v58 = vld [vmem:[#allocation2 + $0x100] sm:$0xff]  ;;  %v3030_v9 = vmax.f32 %v3014_v27, 0.0 }
 0x3cd   : > { %v2879_v0 = vpack.c.bf16 %v2869_v57, %v2660_v46  ;;  %3047 = vst.msk [vmem:[#allocation4 + $0x88] sm:$0xff] %vm1409_vm13, %v3039_v26  ;;  %2370 = vst.msk [vmem:[#allocation2 + $0x111] sm:$0xff] %vm1409_vm13, %v2349_v3  ;;  %v2352_v30 = vadd.f32 %v6255_v54, %v2255_v25  ;;  %v2662_v35 = vmax.f32 %v2646_v58, 0.0 }
 0x3ce   : > { %v2511_v16 = vpack.c.bf16 %v2502_v60, %v2501_v55  ;;  %v2751_v17 = vpack.c.bf16 %v2503_v19, %v2502_v60  ;;  %v2799_v22 = vpack.c.bf16 %v3030_v9, %v3029_v31  ;;  %v2937_v55 = vld [vmem:[#allocation2 + $0x131] sm:$0xff] }
 0x3cf   : > { %2900 = vrot.lane.b32.xlu0 %v2879_v0, %s5183_s12  ;;  %2471 = vst.msk [vmem:[#allocation4 + $0x90] sm:$0xff] %vm1409_vm13, %v2879_v0  ;;  %2371 = vst.msk [vmem:[#allocation2 + $0x121] sm:$0xff] %vm1409_vm13, %v2352_v30  ;;  %v2671_v32 = vpack.c.bf16 %v2662_v35, %v2869_v57  ;;  %v2953_v20 = vmax.f32 %v2937_v55, 0.0 }
 0x3d0   : > { %2533 = vrot.lane.b32.xlu1 %v2511_v16, %s5182_s11  ;;  %2759 = vst.msk [vmem:[#allocation4 + $0x98] sm:$0xff] %vm1409_vm13, %v2751_v17 }
 0x3d3   : > { %2980 = vrot.lane.b32.xlu0 %v2511_v16, %s5184_s19 }
 0x3d4   : > { %2613 = vrot.lane.b32.xlu1 %v3039_v26, %s5183_s12  ;;  %v3015_v54 = vld [vmem:[#allocation2 + $0x112] sm:$0xff]  ;;  %v3067_v6 = vld [vmem:[#allocation4 + $0x88] sm:$0xff] }
 0x3d5   : > { %v2855_v33 = vld [vmem:[#allocation2 + $0x110] sm:$0xff]  ;;  %v3031_v56 = vmax.f32 %v3015_v54, 0.0  ;;  %4990 = vmatmul.mubr.msk.bf16.gmra.mrb[40].mxu0 %vm1409_vm13, %v3067_v6 }
 0x3d6   : > { %v2871_v21 = vmax.f32 %v2855_v33, 0.0  ;;  %v2488_v50 = vld [vmem:[#allocation2 + $0x111] sm:$0xff]  ;;  %v3016_v62 = vld [vmem:[#allocation2 + $0x122] sm:$0xff] }
 0x3d7   : > { %2821 = vrot.lane.b32.xlu0 %v2799_v22, %s5182_s11  ;;  %v2504_v11 = vmax.f32 %v2488_v50, 0.0  ;;  %v2936_v15 = vld [vmem:[#allocation2 + $0x121] sm:$0xff]  ;;  %v3040_v2 = vpack.c.bf16 %v3031_v56, %v3030_v9  ;;  %v3032_v39 = vmax.f32 %v3016_v62, 0.0 }
 0x3d8   : > { %2693 = vrot.lane.b32.xlu1 %v2671_v32, %s5184_s19  ;;  %v2880_v41 = vpack.c.bf16 %v2871_v21, %v2662_v35  ;;  %v2952_v40 = vmax.f32 %v2936_v15, 0.0  ;;  %v2648_v45 = vld [vmem:[#allocation2 + $0x120] sm:$0xff] }
 0x3d9   : > { %v2512_v7 = vpack.c.bf16 %v2504_v11, %v2503_v19  ;;  %3048 = vst.msk [vmem:[#allocation4 + $0xa0] sm:$0xff] %vm1409_vm13, %v3040_v2  ;;  %v3041_v48 = vpack.c.bf16 %v3033_v12, %v3032_v39  ;;  %v2664_v42 = vmax.f32 %v2648_v45, 0.0  ;;  %v2800_v63 = vpack.c.bf16 %v3032_v39, %v3031_v56 }
 0x3da   : > { %2472 = vst.msk [vmem:[#allocation4 + $0xa8] sm:$0xff] %vm1409_vm13, %v2880_v41  ;;  %v2752_v34 = vpack.c.bf16 %v2952_v40, %v2504_v11  ;;  %v2961_v1 = vpack.c.bf16 %v2953_v20, %v2952_v40 }
 0x3db   : > { %2902 = vrot.lane.b32.xlu0 %v2880_v41, %s5183_s12  ;;  %3049 = vst.msk [vmem:[#allocation4 + $0xb8] sm:$0xff] %vm1409_vm13, %v3041_v48  ;;  %v2672_v52 = vpack.c.bf16 %v2664_v42, %v2871_v21  ;;  %v2881_v18 = vpack.c.bf16 %v2873_v8, %v2664_v42 }
 0x3dc   : > { %2535 = vrot.lane.b32.xlu1 %v2512_v7, %s5182_s11  ;;  %2760 = vst.msk [vmem:[#allocation4 + $0xb0] sm:$0xff] %vm1409_vm13, %v2752_v34 }
 0x3df   : > { %2982 = vrot.lane.b32.xlu0 %v2512_v7, %s5184_s19 }
 0x3e0   : > { %2615 = vrot.lane.b32.xlu1 %v3040_v2, %s5183_s12 }
 0x3e3   : > { %2823 = vrot.lane.b32.xlu0 %v2800_v63, %s5182_s11 }
 0x3e4   : > { %2695 = vrot.lane.b32.xlu1 %v2672_v52, %s5184_s19 }
 0x3e7   : > { %2904 = vrot.lane.b32.xlu0 %v2881_v18, %s5183_s12 }
 0x3eb   : > { %2984 = vrot.lane.b32.xlu0 %v2961_v1, %s5184_s19  ;;  %s5188_s19 = smov (!%p4660_p6), 112  }
 0x3f8   : > { %v2522_v24 = vpop.permute.xlu1 %2521 }
 0x3f9   : > { %2545 = vst.msk [vmem:[#allocation4] sm:$0xff] %vm1490_vm14, %v2522_v24  ;;  %v2810_v4 = vpop.permute.xlu0 %2809  ;;  %v3070_v24 = vld [vmem:[#allocation4 + $0xa0] sm:$0xff] }
 0x3fa   : > { %2833 = vst.msk [vmem:[#allocation4 + $0x8] sm:$0xff] %vm1490_vm14, %v2810_v4  ;;  %v3073_v4 = vld [vmem:[#allocation4 + $0xb8] sm:$0xff] }
 0x3fc   : > { %v2602_v46 = vpop.permute.xlu1 %2601 }
 0x3fd   : > { %2625 = vst.msk [vmem:[#allocation4] sm:$0xff] %vm1571_vm15, %v2602_v46 }
 0x400   : > { %v2682_v29 = vpop.permute.xlu1 %2681 }
 0x401   : > { %2705 = vst.msk [vmem:[#allocation4] sm:$0xff] %vm1653_vm0, %v2682_v29 }
 0x404   : > { %v2891_v61 = vpop.permute.xlu0 %2890 }
 0x405   : > { %v2524_v14 = vpop.permute.xlu1 %2523  ;;  %2914 = vst.msk [vmem:[#allocation4 + $0x8] sm:$0xff] %vm1571_vm15, %v2891_v61 }
 0x406   : > { %2546 = vst.msk [vmem:[#allocation4 + $0x18] sm:$0xff] %vm1490_vm14, %v2524_v14 }
 0x408   : > { %v2971_v23 = vpop.permute.xlu0 %2970  ;;  %v3050_v31 = vld [vmem:[#allocation4] sm:$0xff] }
 0x409   : > { %v2604_v47 = vpop.permute.xlu1 %2603  ;;  %2994 = vst.msk [vmem:[#allocation4 + $0x8] sm:$0xff] %vm1653_vm0, %v2971_v23 }
 0x40a   : > { %2626 = vst.msk [vmem:[#allocation4 + $0x18] sm:$0xff] %vm1571_vm15, %v2604_v47 }
 0x40c   : > { %v2812_v36 = vpop.permute.xlu0 %2811 }
 0x40d   : > { %v2684_v38 = vpop.permute.xlu1 %2683  ;;  %2834 = vst.msk [vmem:[#allocation4 + $0x20] sm:$0xff] %vm1490_vm14, %v2812_v36 }
 0x40e   : > { %2706 = vst.msk [vmem:[#allocation4 + $0x18] sm:$0xff] %vm1653_vm0, %v2684_v38 }
 0x410   : > { %v3051_v10 = vld [vmem:[#allocation4 + $0x8] sm:$0xff] }
 0x411   : > { %v2893_v37 = vpop.permute.xlu0 %2892  ;;  %3244 = vmatprep.mubr.bf16.mxu1 %v3051_v10 }
 0x412   : > { %v2526_v28 = vpop.permute.xlu1 %2525  ;;  %2915 = vst.msk [vmem:[#allocation4 + $0x20] sm:$0xff] %vm1571_vm15, %v2893_v37  ;;  %3245 = vmatmul.mubr.bf16.vlgmr.msra.gmra.mrb[16].mxu1 %v3050_v31 }
 0x413   : > { %2547 = vst.msk [vmem:[#allocation4 + $0x30] sm:$0xff] %vm1490_vm14, %v2526_v28  ;;  %5029 = vmatpush3.bf16.msra.mxu1 %v6226_v44 }
 0x414   : > { %5028 = vmatprep.subr.bf16.mxu1 %v6237_v5 }
 0x415   : > { %v2973_v49 = vpop.permute.xlu0 %2972  ;;  %v3053_v44 = vld [vmem:[#allocation4 + $0x18] sm:$0xff] }
 0x416   : > { %v2606_v53 = vpop.permute.xlu1 %2605  ;;  %2995 = vst.msk [vmem:[#allocation4 + $0x20] sm:$0xff] %vm1653_vm0, %v2973_v49 }
 0x417   : > { %2627 = vst.msk [vmem:[#allocation4 + $0x30] sm:$0xff] %vm1571_vm15, %v2606_v53  ;;  %5030 = vmatpush3.bf16.msra.mxu1 %v6237_v5  ;;  %v6484_v53 = vld [vmem:[%s7017_s23] ss:$0 sm:$0xff] }
 0x419   : > { %v2814_v57 = vpop.permute.xlu0 %2813 }
 0x41a   : > { %v2686_v13 = vpop.permute.xlu1 %2685  ;;  %2835 = vst.msk [vmem:[#allocation4 + $0x38] sm:$0xff] %vm1490_vm14, %v2814_v57 }
 0x41b   : > { %2707 = vst.msk [vmem:[#allocation4 + $0x30] sm:$0xff] %vm1653_vm0, %v2686_v13 }
 0x41d   : > { %v2895_v60 = vpop.permute.xlu0 %2894  ;;  %v3054_v26 = vld [vmem:[#allocation4 + $0x20] sm:$0xff] }
 0x41e   : > { %v2528_v59 = vpop.permute.xlu1 %2527  ;;  %2916 = vst.msk [vmem:[#allocation4 + $0x38] sm:$0xff] %vm1571_vm15, %v2895_v60  ;;  %3252 = vmatprep.mubr.bf16.mxu1 %v3054_v26 }
 0x41f   : > { %2548 = vst.msk [vmem:[#allocation4 + $0x48] sm:$0xff] %vm1490_vm14, %v2528_v59  ;;  %3253 = vmatmul.mubr.bf16.gmra.mrb[20].mxu1 %v3053_v44 }
 0x421   : > { %v2975_v3 = vpop.permute.xlu0 %2974 }
 0x422   : > { %v2608_v25 = vpop.permute.xlu1 %2607  ;;  %2996 = vst.msk [vmem:[#allocation4 + $0x38] sm:$0xff] %vm1653_vm0, %v2975_v3  ;;  %v3056_v30 = vld [vmem:[#allocation4 + $0x30] sm:$0xff] }
 0x423   : > { %2628 = vst.msk [vmem:[#allocation4 + $0x48] sm:$0xff] %vm1571_vm15, %v2608_v25  ;;  %v2372_v3 = vld [vmem:[#allocation3 + $0x11] sm:$0xff] }
 0x425   : > { %v2816_v5 = vpop.permute.xlu0 %2815 }
 0x426   : > { %v2688_v0 = vpop.permute.xlu1 %2687  ;;  %2836 = vst.msk [vmem:[#allocation4 + $0x50] sm:$0xff] %vm1490_vm14, %v2816_v5 }
 0x427   : > { %2708 = vst.msk [vmem:[#allocation4 + $0x48] sm:$0xff] %vm1653_vm0, %v2688_v0  ;;  %v2373_v0 = vld [vmem:[#allocation3 + $0x21] sm:$0xff] }
 0x429   : > { %v2897_v16 = vpop.permute.xlu0 %2896  ;;  %v3057_v27 = vld [vmem:[#allocation4 + $0x38] sm:$0xff] }
 0x42a   : > { %v2530_v19 = vpop.permute.xlu1 %2529  ;;  %2917 = vst.msk [vmem:[#allocation4 + $0x50] sm:$0xff] %vm1571_vm15, %v2897_v16  ;;  %3260 = vmatprep.mubr.bf16.mxu1 %v3057_v27 }
 0x42b   : > { %2549 = vst.msk [vmem:[#allocation4 + $0x60] sm:$0xff] %vm1490_vm14, %v2530_v19  ;;  %3261 = vmatmul.mubr.bf16.gmra.mrb[24].mxu1 %v3056_v30 }
 0x42d   : > { %v2977_v58 = vpop.permute.xlu0 %2976 }
 0x42e   : > { %v2610_v17 = vpop.permute.xlu1 %2609  ;;  %2997 = vst.msk [vmem:[#allocation4 + $0x50] sm:$0xff] %vm1653_vm0, %v2977_v58  ;;  %v3059_v22 = vld [vmem:[#allocation4 + $0x48] sm:$0xff] }
 0x42f   : > { %2629 = vst.msk [vmem:[#allocation4 + $0x60] sm:$0xff] %vm1571_vm15, %v2610_v17 }
 0x431   : > { %v2818_v9 = vpop.permute.xlu0 %2817 }
 0x432   : > { %v2690_v35 = vpop.permute.xlu1 %2689  ;;  %2837 = vst.msk [vmem:[#allocation4 + $0x68] sm:$0xff] %vm1490_vm14, %v2818_v9 }
 0x433   : > { %2709 = vst.msk [vmem:[#allocation4 + $0x60] sm:$0xff] %vm1653_vm0, %v2690_v35 }
 0x435   : > { %v2899_v51 = vpop.permute.xlu0 %2898  ;;  %v3060_v6 = vld [vmem:[#allocation4 + $0x50] sm:$0xff] }
 0x436   : > { %v2532_v54 = vpop.permute.xlu1 %2531  ;;  %2918 = vst.msk [vmem:[#allocation4 + $0x68] sm:$0xff] %vm1571_vm15, %v2899_v51  ;;  %3268 = vmatprep.mubr.bf16.mxu1 %v3060_v6  ;;  %v2374_v6 = vld [vmem:[#allocation3 + $0x31] sm:$0xff] }
 0x437   : > { %2550 = vst.msk [vmem:[#allocation4 + $0x78] sm:$0xff] %vm1490_vm14, %v2532_v54  ;;  %3269 = vmatmul.mubr.bf16.gmra.mrb[28].mxu1 %v3059_v22 }
 0x439   : > { %v2979_v32 = vpop.permute.xlu0 %2978 }
 0x43a   : > { %v2612_v33 = vpop.permute.xlu1 %2611  ;;  %2998 = vst.msk [vmem:[#allocation4 + $0x68] sm:$0xff] %vm1653_vm0, %v2979_v32  ;;  %v3062_v11 = vld [vmem:[#allocation4 + $0x60] sm:$0xff] }
 0x43b   : > { %2630 = vst.msk [vmem:[#allocation4 + $0x78] sm:$0xff] %vm1571_vm15, %v2612_v33  ;;  %v2375_v33 = vld [vmem:[#allocation3 + $0x41] sm:$0xff] }
 0x43d   : > { %v2820_v56 = vpop.permute.xlu0 %2819 }
 0x43e   : > { %v2692_v12 = vpop.permute.xlu1 %2691  ;;  %2838 = vst.msk [vmem:[#allocation4 + $0x80] sm:$0xff] %vm1490_vm14, %v2820_v56 }
 0x43f   : > { %2710 = vst.msk [vmem:[#allocation4 + $0x78] sm:$0xff] %vm1653_vm0, %v2692_v12 }
 0x441   : > { %v2901_v21 = vpop.permute.xlu0 %2900  ;;  %v3063_v62 = vld [vmem:[#allocation4 + $0x68] sm:$0xff] }
 0x442   : > { %v2534_v50 = vpop.permute.xlu1 %2533  ;;  %2919 = vst.msk [vmem:[#allocation4 + $0x80] sm:$0xff] %vm1571_vm15, %v2901_v21  ;;  %3276 = vmatprep.mubr.bf16.mxu1 %v3063_v62 }
 0x443   : > { %2551 = vst.msk [vmem:[#allocation4 + $0x90] sm:$0xff] %vm1490_vm14, %v2534_v50  ;;  %3277 = vmatmul.mubr.bf16.gmra.mrb[32].mxu1 %v3062_v11 }
 0x445   : > { %v2981_v15 = vpop.permute.xlu0 %2980 }
 0x446   : > { %v2614_v2 = vpop.permute.xlu1 %2613  ;;  %2999 = vst.msk [vmem:[#allocation4 + $0x80] sm:$0xff] %vm1653_vm0, %v2981_v15  ;;  %v3065_v45 = vld [vmem:[#allocation4 + $0x78] sm:$0xff] }
 0x447   : > { %2631 = vst.msk [vmem:[#allocation4 + $0x90] sm:$0xff] %vm1571_vm15, %v2614_v2 }
 0x449   : > { %v2822_v39 = vpop.permute.xlu0 %2821 }
 0x44a   : > { %v2694_v41 = vpop.permute.xlu1 %2693  ;;  %2839 = vst.msk [vmem:[#allocation4 + $0x98] sm:$0xff] %vm1490_vm14, %v2822_v39 }
 0x44b   : > { %2711 = vst.msk [vmem:[#allocation4 + $0x90] sm:$0xff] %vm1653_vm0, %v2694_v41 }
 0x44d   : > { %v2903_v7 = vpop.permute.xlu0 %2902  ;;  %v3066_v48 = vld [vmem:[#allocation4 + $0x80] sm:$0xff] }
 0x44e   : > { %v2536_v40 = vpop.permute.xlu1 %2535  ;;  %2920 = vst.msk [vmem:[#allocation4 + $0x98] sm:$0xff] %vm1571_vm15, %v2903_v7  ;;  %3284 = vmatprep.mubr.bf16.mxu1 %v3066_v48  ;;  %v2376_v7 = vld [vmem:[#allocation3 + $0x51] sm:$0xff] }
 0x44f   : > { %2552 = vst.msk [vmem:[#allocation4 + $0xa8] sm:$0xff] %vm1490_vm14, %v2536_v40  ;;  %3285 = vmatmul.mubr.bf16.gmra.mrb[36].mxu1 %v3065_v45  ;;  %v2377_v45 = vld [vmem:[#allocation3 + $0x61] sm:$0xff] }
 0x451   : > { %v2983_v34 = vpop.permute.xlu0 %2982 }
 0x452   : > { %v2616_v42 = vpop.permute.xlu1 %2615  ;;  %3000 = vst.msk [vmem:[#allocation4 + $0x98] sm:$0xff] %vm1653_vm0, %v2983_v34  ;;  %v3068_v55 = vld [vmem:[#allocation4 + $0x90] sm:$0xff] }
 0x453   : > { %2632 = vst.msk [vmem:[#allocation4 + $0xa8] sm:$0xff] %vm1571_vm15, %v2616_v42 }
 0x455   : > { %v2824_v43 = vpop.permute.xlu0 %2823 }
 0x456   : > { %v2696_v63 = vpop.permute.xlu1 %2695  ;;  %2840 = vst.msk [vmem:[#allocation4 + $0xb0] sm:$0xff] %vm1490_vm14, %v2824_v43 }
 0x457   : > { %2712 = vst.msk [vmem:[#allocation4 + $0xa8] sm:$0xff] %vm1653_vm0, %v2696_v63 }
 0x459   : > { %v2905_v52 = vpop.permute.xlu0 %2904  ;;  %v3069_v8 = vld [vmem:[#allocation4 + $0x98] sm:$0xff] }
 0x45a   : > { %2921 = vst.msk [vmem:[#allocation4 + $0xb0] sm:$0xff] %vm1571_vm15, %v2905_v52  ;;  %3292 = vmatprep.mubr.bf16.mxu1 %v3069_v8 }
 0x45b   : > { %3293 = vmatmul.mubr.bf16.gmra.mrb[40].mxu1 %v3068_v55 }
 0x45d   : > { %v2985_v18 = vpop.permute.xlu0 %2984 }
 0x45e   : > { %3001 = vst.msk [vmem:[#allocation4 + $0xb0] sm:$0xff] %vm1653_vm0, %v2985_v18  ;;  %v3071_v1 = vld [vmem:[#allocation4 + $0xa8] sm:$0xff] }
 0x465   : > { %v3072_v20 = vld [vmem:[#allocation4 + $0xb0] sm:$0xff] }
 0x466   : > { %3300 = vmatprep.mubr.bf16.mxu1 %v3072_v20 }
 0x467   : > { %3301 = vmatmul.mubr.bf16.gmra.mrb[44].mxu1 %v3071_v1 }
 0x468   : > { %4993 = vmatprep.mubr.msk.bf16.mxu1 %vm1409_vm13, %v3070_v24  ;;  %v2378_v24 = vld [vmem:[#allocation3 + $0x71] sm:$0xff] }
 0x46f   : > { %4994 = vmatmul.mubr.msk.bf16.vlgmr.msra.gmra.mrb[48].mxu1 %vm1409_vm13, %v3073_v4 }
 0x478   : > { %v4983_v46 = vpop.f32.mrb[32].mxu0 }
 0x479   : > { %v3343_v29 = vpop.f32.mrb[33].mxu0 }
 0x47a   : > { %v4984_v61 = vpop.f32.mrb[34].mxu0 }
 0x47b   : > { %v3346_v14 = vpop.f32.mrb[35].mxu0 }
 0x486   : > { %v6467_v23 = vpop.f32.mrb[36].mxu0 }
 0x487   : > { %v3359_v47 = vpop.f32.mrb[37].mxu0 }
 0x488   : > { %v6469_v36 = vpop.f32.mrb[38].mxu0 }
 0x489   : > { %v3362_v38 = vpop.f32.mrb[39].mxu0 }
 0x4a8   : > { %v6471_v37 = vpop.f32.mrb[40].mxu0 }
 0x4a9   : > { %v6473_v28 = vpop.f32.mrb[41].mxu0 }
 0x4aa   : > { %v6475_v10 = vpop.f32.mrb[42].mxu0 }
 0x4ab   : > { %v6477_v31 = vpop.f32.mrb[43].mxu0 }
 0x4e5   : > { %v4799_v49 = vpop.f32.mrb[16].mxu1 }
 0x4e6   : > { %v4800_v57 = vpop.f32.mrb[17].mxu1 }
 0x4e7   : > { %v4801_v13 = vadd.f32 %v4800_v57, %v4799_v49  ;;  %v4802_v60 = vpop.f32.mrb[18].mxu1 }
 0x4e8   : > { %v4803_v59 = vpop.f32.mrb[19].mxu1 }
 0x4e9   : > { %v3247_v26 = vadd.f32 %v4801_v13, %v6484_v53  ;;  %v4804_v44 = vadd.f32 %v4803_v59, %v4802_v60 }
 0x4eb   : > { %v3344_v25 = vadd.f32 %v3343_v29, %v3247_v26  ;;  %v3250_v5 = vadd.f32 %v4804_v44, %v6484_v53  ;;  %v2379_v29 = vld [vmem:[#allocation3 + $0x81] sm:$0xff] }
 0x4ed   : > { %v3406_v16 = vadd.f32 %v3344_v25, %v2372_v3  ;;  %v3347_v19 = vadd.f32 %v3346_v14, %v3250_v5  ;;  %v2381_v25 = vld [vmem:[#allocation3 + $0xc1] sm:$0xff] }
 0x4ef   : > { %3422 = vst.msk [vmem:[#allocation3 + $0x11] sm:$0xff] %vm1409_vm13, %v3406_v16  ;;  %v3407_v27 = vadd.f32 %v3347_v19, %v2373_v0 }
 0x4f1   : > { %3423 = vst.msk [vmem:[#allocation3 + $0x21] sm:$0xff] %vm1409_vm13, %v3407_v27 }
 0x4f2   : > { %v4805_v30 = vpop.f32.mrb[20].mxu1 }
 0x4f3   : > { %v4806_v58 = vpop.f32.mrb[21].mxu1 }
 0x4f4   : > { %v4807_v17 = vadd.f32 %v4806_v58, %v4805_v30  ;;  %v4808_v9 = vpop.f32.mrb[22].mxu1 }
 0x4f5   : > { %v4809_v35 = vpop.f32.mrb[23].mxu1 }
 0x4f6   : > { %v3255_v51 = vadd.f32 %v4807_v17, %v6484_v53  ;;  %v4810_v54 = vadd.f32 %v4809_v35, %v4808_v9 }
 0x4f8   : > { %v3352_v22 = vadd.f32 %v4983_v46, %v3255_v51  ;;  %v3258_v32 = vadd.f32 %v4810_v54, %v6484_v53  ;;  %v2383_v54 = vld [vmem:[#allocation3 + $0xe1] sm:$0xff] }
 0x4fa   : > { %v3408_v56 = vadd.f32 %v3352_v22, %v2374_v6  ;;  %v3355_v12 = vadd.f32 %v4984_v61, %v3258_v32 }
 0x4fc   : > { %3424 = vst.msk [vmem:[#allocation3 + $0x31] sm:$0xff] %vm1409_vm13, %v3408_v56  ;;  %v3409_v21 = vadd.f32 %v3355_v12, %v2375_v33 }
 0x4fe   : > { %3425 = vst.msk [vmem:[#allocation3 + $0x41] sm:$0xff] %vm1409_vm13, %v3409_v21  ;;  %v4811_v50 = vpop.f32.mrb[24].mxu1 }
 0x4ff   : > { %v4812_v62 = vpop.f32.mrb[25].mxu1 }
 0x500   : > { %v4813_v11 = vadd.f32 %v4812_v62, %v4811_v50  ;;  %v4814_v15 = vpop.f32.mrb[26].mxu1 }
 0x501   : > { %v4815_v2 = vpop.f32.mrb[27].mxu1 }
 0x502   : > { %v3263_v39 = vadd.f32 %v4813_v11, %v6484_v53  ;;  %v4816_v41 = vadd.f32 %v4815_v2, %v4814_v15 }
 0x504   : > { %v3360_v40 = vadd.f32 %v3359_v47, %v3263_v39  ;;  %v3266_v48 = vadd.f32 %v4816_v41, %v6484_v53 }
 0x506   : > { %v3410_v34 = vadd.f32 %v3360_v40, %v2376_v7  ;;  %v3363_v42 = vadd.f32 %v3362_v38, %v3266_v48 }
 0x508   : > { %3426 = vst.msk [vmem:[#allocation3 + $0x51] sm:$0xff] %vm1409_vm13, %v3410_v34  ;;  %v3411_v43 = vadd.f32 %v3363_v42, %v2377_v45  ;;  %v2384_v45 = vld [vmem:[#allocation3 + $0xf1] sm:$0xff] }
 0x50a   : > { %3427 = vst.msk [vmem:[#allocation3 + $0x61] sm:$0xff] %vm1409_vm13, %v3411_v43  ;;  %v4817_v63 = vpop.f32.mrb[28].mxu1 }
 0x50b   : > { %v4818_v52 = vpop.f32.mrb[29].mxu1 }
 0x50c   : > { %v4819_v8 = vadd.f32 %v4818_v52, %v4817_v63  ;;  %v4820_v55 = vpop.f32.mrb[30].mxu1  ;;  %v2387_v63 = vld [vmem:[#allocation3 + $0x121] sm:$0xff] }
 0x50d   : > { %v4821_v18 = vpop.f32.mrb[31].mxu1 }
 0x50e   : > { %v3271_v20 = vadd.f32 %v4819_v8, %v6484_v53  ;;  %v4822_v1 = vadd.f32 %v4821_v18, %v4820_v55 }
 0x510   : > { %v3368_v4 = vadd.f32 %v6467_v23, %v3271_v20  ;;  %v3274_v46 = vadd.f32 %v4822_v1, %v6484_v53  ;;  %v2380_v23 = vld [vmem:[#allocation3 + $0xb1] sm:$0xff]  ;;  %v2385_v20 = vld [vmem:[#allocation3 + $0x101] sm:$0xff] }
 0x512   : > { %v3412_v61 = vadd.f32 %v3368_v4, %v2378_v24  ;;  %v3371_v14 = vadd.f32 %v6469_v36, %v3274_v46 }
 0x514   : > { %3428 = vst.msk [vmem:[#allocation3 + $0x71] sm:$0xff] %vm1409_vm13, %v3412_v61  ;;  %v3413_v47 = vadd.f32 %v3371_v14, %v2379_v29  ;;  %v6525_v61 = vld [vmem:[#allocation3 + $0x30] sm:$0xff] (!%p4660_p6) }
 0x515   : > { %v3735_v14 = vld [vmem:[#allocation3 + $0x12] sm:$0xff] (!%p4660_p6) }
 0x516   : > { %3429 = vst.msk [vmem:[#allocation3 + $0x81] sm:$0xff] %vm1409_vm13, %v3413_v47  ;;  %v4823_v38 = vpop.f32.mrb[32].mxu1 }
 0x517   : > { %v4824_v49 = vpop.f32.mrb[33].mxu1 }
 0x518   : > { %v4825_v57 = vadd.f32 %v4824_v49, %v4823_v38  ;;  %v4826_v13 = vpop.f32.mrb[34].mxu1  ;;  %v3736_v38 = vld [vmem:[#allocation3 + $0x22] sm:$0xff] (!%p4660_p6) }
 0x519   : > { %v4827_v60 = vpop.f32.mrb[35].mxu1  ;;  %v3575_v49 = vld [vmem:[#allocation3 + $0x2] sm:$0xff] (!%p4660_p6) }
 0x51a   : > { %v3279_v59 = vadd.f32 %v4825_v57, %v6484_v53  ;;  %v4828_v26 = vadd.f32 %v4827_v60, %v4826_v13  ;;  %v3511_v57 = vld [vmem:[#allocation3 + $0x1] sm:$0xff] (!%p4660_p6)  ;;  %v3751_v13 = vpack.c.bf16 (!%p4660_p6), %v3736_v38, %v3735_v14  ;;  %v3512_v60 = vld [vmem:[#allocation3 + $0x11] sm:$0xff] (!%p4660_p6) }
 0x51c   : > { %v3376_v44 = vadd.f32 %v6473_v28, %v3279_v59  ;;  %v3282_v3 = vadd.f32 %v4828_v26, %v6484_v53  ;;  %v2382_v28 = vld [vmem:[#allocation3 + $0xd1] sm:$0xff]  ;;  %v3863_v59 = vld [vmem:[#allocation3 + $0x21] sm:$0xff] (!%p4660_p6)  ;;  %v3591_v26 = vpack.c.bf16 (!%p4660_p6), %v3735_v14, %v3575_v49  ;;  %3767 = vrot.lane.b32.xlu0 (!%p4660_p6), %v3751_v13, %s5186_s13 }
 0x51d   : > { %v5134_v14 = vld [vmem:[%s7009_s7 + $0x8] sm:$0xff] (!%p4660_p6)   ;;  %v3866_v49 = vld [vmem:[#allocation3 + $0x51] sm:$0xff] (!%p4660_p6) }
 0x51e   : > { %v3414_v36 = vadd.f32 %v3376_v44, %v2380_v23  ;;  %v3379_v5 = vadd.f32 %v6477_v31, %v3282_v3  ;;  %v3719_v23 = vpack.c.bf16 (!%p4660_p6), %v3863_v59, %v3512_v60  ;;  %v3527_v44 = vpack.c.bf16 (!%p4660_p6), %v3512_v60, %v3511_v57  ;;  %v6531_v3 = vld [vmem:[#allocation3 + $0x10] sm:$0xff] (!%p4660_p6)  ;;  %v6678_v57 = vld [vmem:[#allocation3 + $0x61] sm:$0xff] (!%p4660_p6) }
 0x51f   : > { %v5136_v13 = vld [vmem:[%s7009_s7 + $0x10] sm:$0xff] (!%p4660_p6)   ;;  %v3721_v60 = vpack.c.bf16 (!%p4660_p6), %v6678_v57, %v3866_v49 }
 0x520   : > { %3430 = vst.msk [vmem:[#allocation3 + $0xb1] sm:$0xff] %vm1409_vm13, %v3414_v36  ;;  %v3415_v0 = vadd.f32 %v3379_v5, %v2381_v25  ;;  %v3864_v25 = vld [vmem:[#allocation3 + $0x31] sm:$0xff] (!%p4660_p6)  ;;  %3727 = vst.msk [vmem:[#allocation4 + $0x8] sm:$0xff] (!%p4660_p6), %vm1409_vm13, %v3719_v23  ;;  %3543 = vrot.lane.b32.xlu0 (!%p4660_p6), %v3527_v44, %s5186_s13  ;;  %v3479_v44 = vld [vmem:[#allocation3] sm:$0xff] (!%p4660_p6) }
 0x521   : > { %v3737_v36 = vld [vmem:[#allocation3 + $0x32] sm:$0xff] (!%p4660_p6)  ;;  %3729 = vst.msk [vmem:[#allocation4 + $0x38] sm:$0xff] (!%p4660_p6), %vm1409_vm13, %v3721_v60 }
 0x522   : > { %3431 = vst.msk [vmem:[#allocation3 + $0xc1] sm:$0xff] %vm1409_vm13, %v3415_v0  ;;  %v4829_v16 = vpop.f32.mrb[36].mxu1 }
 0x523   : > { %v4830_v19 = vpop.f32.mrb[37].mxu1 }
 0x524   : > { %v4831_v27 = vadd.f32 %v4830_v19, %v4829_v16  ;;  %v4832_v30 = vpop.f32.mrb[38].mxu1  ;;  %v6537_v19 = vpack.c.bf16 (!%p4660_p6), %v3737_v36, %v3736_v38 }
 0x525   : > { %v4833_v58 = vpop.f32.mrb[39].mxu1 }
 0x526   : > { %v3287_v17 = vadd.f32 %v4831_v27, %v6484_v53  ;;  %v4834_v9 = vadd.f32 %v4833_v58, %v4832_v30  ;;  %v6544_v30 = vld [vmem:[#allocation3 + $0x40] sm:$0xff] (!%p4660_p6)  ;;  %v6546_v58 = vld [vmem:[#allocation3 + $0x50] sm:$0xff] (!%p4660_p6)  ;;  %3951 = vst.msk [vmem:[#allocation4 + $0x10] sm:$0xff] (!%p4660_p6), %vm1409_vm13, %v6537_v19 }
 0x527   : > { %v3743_v60 = vld [vmem:[#allocation3 + $0xb2] sm:$0xff] (!%p4660_p6) }
 0x528   : > { %v3384_v35 = vadd.f32 %v6471_v37, %v3287_v17  ;;  %v3290_v51 = vadd.f32 %v4834_v9, %v6484_v53 }
 0x52a   : > { %v3416_v31 = vadd.f32 %v3384_v35, %v2382_v28  ;;  %v3387_v6 = vadd.f32 %v6475_v10, %v3290_v51  ;;  %v2386_v10 = vld [vmem:[#allocation3 + $0x111] sm:$0xff]  ;;  %v6554_v35 = vpack.c.bf16 (!%p4660_p6), %v6546_v58, %v6544_v30 }
 0x52c   : > { %3432 = vst.msk [vmem:[#allocation3 + $0xd1] sm:$0xff] %vm1409_vm13, %v3416_v31  ;;  %v3417_v22 = vadd.f32 %v3387_v6, %v2383_v54  ;;  %v6561_v31 = vld [vmem:[#allocation3 + $0x41] sm:$0xff] (!%p4660_p6)  ;;  %v3879_v6 = vpack.c.bf16 (!%p4660_p6), %v3864_v25, %v3863_v59  ;;  %3505 = vst.msk [vmem:[#allocation4 + $0x30] sm:$0xff] (!%p4660_p6), %vm1409_vm13, %v6554_v35 }
 0x52d   : > { %v3880_v23 = vpack.c.bf16 (!%p4660_p6), %v3866_v49, %v6561_v31  ;;  %v3870_v49 = vld [vmem:[#allocation3 + $0x91] sm:$0xff] (!%p4660_p6) }
 0x52e   : > { %3433 = vst.msk [vmem:[#allocation3 + $0xe1] sm:$0xff] %vm1409_vm13, %v3417_v22  ;;  %v4835_v32 = vpop.f32.mrb[40].mxu1  ;;  %3895 = vrot.lane.b32.xlu0 (!%p4660_p6), %v3879_v6, %s5187_s22 }
 0x52f   : > { %v4836_v33 = vpop.f32.mrb[41].mxu1 }
 0x530   : > { %v4837_v56 = vadd.f32 %v4836_v33, %v4835_v32  ;;  %v4838_v12 = vpop.f32.mrb[42].mxu1 }
 0x531   : > { %v4839_v21 = vpop.f32.mrb[43].mxu1 }
 0x532   : > { %v4840_v50 = vadd.f32 %v4839_v21, %v4838_v12  ;;  %v3295_v40 = vadd.f32 %v4837_v56, %v6484_v53  ;;  %v3720_v56 = vpack.c.bf16 (!%p4660_p6), %v6561_v31, %v3864_v25  ;;  %v3738_v12 = vld [vmem:[#allocation3 + $0x42] sm:$0xff] (!%p4660_p6)  ;;  %v6572_v21 = vld [vmem:[#allocation3 + $0x52] sm:$0xff] (!%p4660_p6)  ;;  %v3495_v25 = vpack.c.bf16 (!%p4660_p6), %v6531_v3, %v3479_v44 }
 0x533   : > { %v5144_v31 = vld [vmem:[%s7009_s7 + $0x30] sm:$0xff] (!%p4660_p6)  }
 0x534   : > { %v3298_v8 = vadd.f32 %v4840_v50, %v6484_v53  ;;  %3728 = vst.msk [vmem:[#allocation4 + $0x20] sm:$0xff] (!%p4660_p6), %vm1409_vm13, %v3720_v56  ;;  %3503 = vst.msk [vmem:[#allocation4] sm:$0xff] (!%p4660_p6), %vm1409_vm13, %v3495_v25  ;;  %v5146_v56 = vld [vmem:[%s7009_s7 + $0x38] sm:$0xff] (!%p4660_p6)   ;;  %v3583_v25 = vld [vmem:[#allocation3 + $0xa2] sm:$0xff] (!%p4660_p6) }
 0x535   : > { %v6548_v17 = vld [vmem:[#allocation3 + $0xe2] sm:$0xff] (!%p4660_p6) }
 0x53a   : > { %v4841_v62 = vpop.f32.mrb[44].mxu1 }
 0x53b   : > { %v4842_v11 = vpop.f32.mrb[45].mxu1 }
 0x53c   : > { %v4843_v37 = vadd.f32 %v4842_v11, %v4841_v62  ;;  %v4844_v15 = vpop.f32.mrb[46].mxu1  ;;  %v6581_v62 = vld [vmem:[#allocation3 + $0x60] sm:$0xff] (!%p4660_p6)  ;;  %v6584_v11 = vpack.c.bf16 (!%p4660_p6), %v6572_v21, %v3738_v12 }
 0x53d   : > { %v4845_v2 = vpop.f32.mrb[47].mxu1 }
 0x53e   : > { %v4846_v39 = vadd.f32 %v4845_v2, %v4844_v15  ;;  %v3303_v41 = vadd.f32 %v4843_v37, %v6484_v53  ;;  %v6589_v15 = vld [vmem:[#allocation3 + $0x70] sm:$0xff] (!%p4660_p6)  ;;  %v3752_v2 = vpack.c.bf16 (!%p4660_p6), %v3738_v12, %v3737_v36  ;;  %3952 = vst.msk [vmem:[#allocation4 + $0x28] sm:$0xff] (!%p4660_p6), %vm1409_vm13, %v6584_v11  ;;  %v5138_v36 = vld [vmem:[%s7009_s7 + $0x18] sm:$0xff] (!%p4660_p6)   ;;  %v6746_v12 = vld [vmem:[%s7009_s7 + $0x80] sm:$0xff] (!%p4660_p6)  }
 0x540   : > { %v3306_v42 = vadd.f32 %v4846_v39, %v6484_v53  ;;  %v3799_v53 = vld [vmem:[#allocation3 + $0x20] sm:$0xff] (!%p4660_p6)  ;;  %3769 = vrot.lane.b32.xlu0 (!%p4660_p6), %v3752_v2, %s5186_s13 }
 0x541   : > { %v3815_v47 = vpack.c.bf16 (!%p4660_p6), %v6525_v61, %v3799_v53  ;;  %v3655_v9 = vpack.c.bf16 (!%p4660_p6), %v3799_v53, %v6531_v3  ;;  %v6594_v39 = vld [vmem:[#allocation3 + $0xe1] sm:$0xff] (!%p4660_p6)  ;;  %v3656_v3 = vpack.c.bf16 (!%p4660_p6), %v6544_v30, %v6525_v61 }
 0x542   : > { %v4995_v7 = vpop.f32.mrb[48].mxu1  ;;  %v5133_v53 = vld [vmem:[%s7009_s7 + $0x48] sm:$0xff] (!%p4660_p6)  }
 0x543   : > { %v3400_v48 = vadd.f32 %v4995_v7, %v3303_v41  ;;  %v3391_v34 = vpop.f32.mrb[49].mxu1  ;;  %3831 = vrot.lane.b32.xlu1 (!%p4660_p6), %v3815_v47, %s5185_s17  ;;  %3504 = vst.msk [vmem:[#allocation4 + $0x18] sm:$0xff] (!%p4660_p6), %vm1409_vm13, %v3815_v47  ;;  %v6596_v41 = vld [vmem:[#allocation3 + $0x62] sm:$0xff] (!%p4660_p6)  ;;  %v6602_v7 = vld [vmem:[#allocation3 + $0x72] sm:$0xff] (!%p4660_p6) }
 0x544   : > { %v3392_v43 = vadd.f32 %v3391_v34, %v3295_v40  ;;  %v4996_v52 = vpop.f32.mrb[50].mxu1  ;;  %3441 = sbr.rel (%p4660_p6) target bundleno = 2009 (0x7d9), region = 64  ;;  %v6608_v40 = vpack.c.bf16 (!%p4660_p6), %v6602_v7, %v6596_v41  ;;  %v6621_v34 = vld [vmem:[#allocation3 + $0xd0] sm:$0xff] (!%p4660_p6)  ;;  %3545 = vrot.lane.b32.xlu0 (!%p4660_p6), %v3879_v6, %s5186_s13  ;;  %v3753_v61 = vpack.c.bf16 (!%p4660_p6), %v6596_v41, %v6572_v21  ;;  %v5142_v30 = vld [vmem:[%s7009_s7 + $0x28] sm:$0xff] (!%p4660_p6)  }
 0x545   : > { %v3420_v55 = vadd.f32 %v3400_v48, %v2386_v10  ;;  %v3403_v18 = vadd.f32 %v4996_v52, %v3306_v42  ;;  %v3394_v1 = vpop.f32.mrb[51].mxu1  ;;  %v6600_v10 = vpack.c.bf16 (!%p4660_p6), %v6589_v15, %v6581_v62  ;;  %v6631_v52 = vld [vmem:[#allocation3 + $0xd2] sm:$0xff] (!%p4660_p6) }
 0x546   : > { %v3418_v24 = vadd.f32 %v3392_v43, %v2384_v45  ;;  %v3395_v4 = vadd.f32 %v3394_v1, %v3298_v8  ;;  %3953 = vst.msk [vmem:[#allocation4 + $0x40] sm:$0xff] (!%p4660_p6), %vm1409_vm13, %v6608_v40  ;;  %v6619_v45 = vld [vmem:[#allocation3 + $0xc0] sm:$0xff] (!%p4660_p6)  ;;  %v5135_v47 = vld [vmem:[%s7009_s7 + $0x50] sm:$0xff] (!%p4660_p6)  }
 0x547   : > { %3436 = vst.msk [vmem:[#allocation3 + $0x111] sm:$0xff] %vm1409_vm13, %v3420_v55  ;;  %v3421_v46 = vadd.f32 %v3403_v18, %v2387_v63  ;;  %3607 = vrot.lane.b32.xlu1 (!%p4660_p6), %v3591_v26, %s5185_s17  ;;  %3506 = vst.msk [vmem:[#allocation4 + $0x48] sm:$0xff] (!%p4660_p6), %vm1409_vm13, %v6600_v10  ;;  %v6625_v43 = vld [vmem:[#allocation3 + $0xc2] sm:$0xff] (!%p4660_p6)  ;;  %v6629_v63 = vpack.c.bf16 (!%p4660_p6), %v6621_v34, %v6619_v45  ;;  %v3756_v55 = vpack.c.bf16 (!%p4660_p6), %v6548_v17, %v6631_v52  ;;  %v5137_v26 = vld [vmem:[%s7009_s7 + $0x58] sm:$0xff] (!%p4660_p6)  }
 0x548   : > { %3434 = vst.msk [vmem:[#allocation3 + $0xf1] sm:$0xff] %vm1409_vm13, %v3418_v24  ;;  %v3419_v29 = vadd.f32 %v3395_v4, %v2385_v20  ;;  %v6633_v8 = vld [vmem:[#allocation3 + $0xe0] sm:$0xff] (!%p4660_p6)  ;;  %v6645_v20 = vpack.c.bf16 (!%p4660_p6), %v6631_v52, %v6625_v43  ;;  %3833 = vrot.lane.b32.xlu0 (!%p4660_p6), %v6554_v35, %s5185_s17  ;;  %v5143_v35 = vld [vmem:[%s7009_s7 + $0x70] sm:$0xff] (!%p4660_p6)   ;;  %v3755_v44 = vpack.c.bf16 (!%p4660_p6), %v6625_v43, %v3743_v60 }
 0x549   : > { %3437 = vst.msk [vmem:[#allocation3 + $0x121] sm:$0xff] %vm1409_vm13, %v3421_v46  ;;  %v3660_v1 = vpack.c.bf16 (!%p4660_p6), %v6633_v8, %v6621_v34  ;;  %v5131_v24 = vld [vmem:[%s7009_s7 + $0x40] sm:$0xff] (!%p4660_p6)   ;;  %3508 = vst.msk [vmem:[#allocation4 + $0x78] sm:$0xff] (!%p4660_p6), %vm1409_vm13, %v6629_v63 }
 0x54a   : > { %3435 = vst.msk [vmem:[#allocation3 + $0x101] sm:$0xff] %vm1409_vm13, %v3419_v29  ;;  %v5132_v29 = vld [vmem:[%s7009_s7] sm:$0xff] (!%p4660_p6)   ;;  %4857 = vmatprep.subr.bf16.mxu0 (!%p4660_p6), %v5131_v24  ;;  %5031 = vmatprep.subr.bf16.mxu1 (!%p4660_p6), %v5131_v24  ;;  %3955 = vst.msk [vmem:[#allocation4 + $0x70] sm:$0xff] (!%p4660_p6), %vm1409_vm13, %v6645_v20 }
 0x54b   : > { %3671 = vrot.lane.b32.xlu1 %v3655_v9, %s5187_s22  ;;  %4858 = vmatpush3.bf16.msra.mxu0 %v5132_v29  ;;  %v5140_v9 = vld [vmem:[%s7009_s7 + $0x20] sm:$0xff]  }
 0x54c   : > { %5039 = vmatpush3.bf16.msra.mxu1 %v5132_v29  ;;  %4859 = vmatprep.subr.bf16.mxu0 %v5133_v53  ;;  %v3742_v24 = vld [vmem:[#allocation3 + $0x82] sm:$0xff]  ;;  %v3934_v29 = vld [vmem:[#allocation3 + $0x92] sm:$0xff] }
 0x54d   : > { %5032 = vmatprep.subr.bf16.mxu1 %v5133_v53  ;;  %3609 = vrot.lane.b32.xlu0 %v6537_v19, %s5185_s17  ;;  %v5139_v19 = vld [vmem:[%s7009_s7 + $0x60] sm:$0xff]  }
 0x54e   : > { %v6535_v16 = vld [vmem:[#allocation3 + $0x110] sm:$0xff]  ;;  %v3805_v53 = vld [vmem:[#allocation3 + $0x80] sm:$0xff] }
 0x54f   : > { %v3747_v5 = vld [vmem:[#allocation3 + $0xf2] sm:$0xff]  ;;  %4860 = vmatpush3.bf16.msra.mxu0 %v5134_v14 }
 0x550   : > { %v3524_v28 = vld [vmem:[#allocation3 + $0xf1] sm:$0xff]  ;;  %v6557_v51 = vpack.c.bf16 %v3747_v5, %v6548_v17  ;;  %v6655_v46 = vld [vmem:[#allocation3 + $0x121] sm:$0xff]  ;;  %5040 = vmatpush3.bf16.msra.mxu1 %v5134_v14  ;;  %4861 = vmatprep.subr.bf16.mxu0 %v5135_v47 }
 0x551   : > { %v6533_v0 = vld [vmem:[#allocation3 + $0x100] sm:$0xff]  ;;  %v6566_v32 = vld [vmem:[#allocation3 + $0x112] sm:$0xff]  ;;  %v6614_v48 = vpack.c.bf16 %v3524_v28, %v6594_v39  ;;  %5033 = vmatprep.subr.bf16.mxu1 %v5135_v47  ;;  %3897 = vrot.lane.b32.xlu0 %v3880_v23, %s5187_s22 }
 0x552   : > { %v6542_v27 = vpack.c.bf16 %v6535_v16, %v6533_v0  ;;  %v6559_v54 = vld [vmem:[#allocation3 + $0x101] sm:$0xff]  ;;  %3956 = vst.msk [vmem:[#allocation4 + $0x88] sm:$0xff] %vm1409_vm13, %v6557_v51  ;;  %v6623_v42 = vld [vmem:[#allocation3 + $0xf0] sm:$0xff] }
 0x553   : > { %v3748_v22 = vld [vmem:[#allocation3 + $0x102] sm:$0xff]  ;;  %v3725_v33 = vpack.c.bf16 %v6559_v54, %v3524_v28  ;;  %v6641_v18 = vpack.c.bf16 %v6623_v42, %v6633_v8  ;;  %v3876_v4 = vld [vmem:[#allocation3 + $0x111] sm:$0xff]  ;;  %4862 = vmatpush3.bf16.msra.mxu0 %v5136_v13 }
 0x554   : > { %3510 = vst.msk [vmem:[#allocation4 + $0xa8] sm:$0xff] %vm1409_vm13, %v6542_v27  ;;  %v6575_v50 = vpack.c.bf16 %v6566_v32, %v3748_v22  ;;  %v3757_v37 = vpack.c.bf16 %v3748_v22, %v3747_v5  ;;  %v3726_v38 = vpack.c.bf16 %v6655_v46, %v3876_v4  ;;  %v3885_v59 = vpack.c.bf16 %v3876_v4, %v6559_v54  ;;  %v3814_v54 = vld [vmem:[#allocation3 + $0x130] sm:$0xff]  ;;  %v5145_v22 = vld [vmem:[%s7009_s7 + $0x78] sm:$0xff]   ;;  %v3871_v4 = vld [vmem:[#allocation3 + $0xc1] sm:$0xff] }
 0x555   : > { %3733 = vst.msk [vmem:[#allocation4 + $0x98] sm:$0xff] %vm1409_vm13, %v3725_v33  ;;  %3509 = vst.msk [vmem:[#allocation4 + $0x90] sm:$0xff] %vm1409_vm13, %v6641_v18  ;;  %5041 = vmatpush3.bf16.msra.mxu1 %v5136_v13  ;;  %v3661_v5 = vpack.c.bf16 %v6533_v0, %v6623_v42  ;;  %4863 = vmatprep.subr.bf16.mxu0 %v5137_v26  ;;  %v5141_v0 = vld [vmem:[%s7009_s7 + $0x68] sm:$0xff]   ;;  %v3657_v42 = vpack.c.bf16 %v6581_v62, %v6546_v58  ;;  %v3806_v14 = vld [vmem:[#allocation3 + $0x90] sm:$0xff] }
 0x556   : > { %3957 = vst.msk [vmem:[#allocation4 + $0xa0] sm:$0xff] %vm1409_vm13, %v6575_v50  ;;  %3779 = vrot.lane.b32.xlu1 %v3757_v37, %s5186_s13  ;;  %3734 = vst.msk [vmem:[#allocation4 + $0xb0] sm:$0xff] %vm1409_vm13, %v3726_v38  ;;  %5034 = vmatprep.subr.bf16.mxu1 %v5137_v26  ;;  %v3869_v33 = vld [vmem:[#allocation3 + $0x81] sm:$0xff]  ;;  %v3878_v37 = vld [vmem:[#allocation3 + $0x131] sm:$0xff]  ;;  %v3818_v62 = vpack.c.bf16 %v3806_v14, %v3805_v53 }
 0x557   : > { %4864 = vmatpush3.bf16.msra.mxu0 %v5138_v36  ;;  %3673 = vrot.lane.b32.xlu0 %v3656_v3, %s5187_s22  ;;  %v3886_v2 = vpack.c.bf16 %v3878_v37, %v6655_v46  ;;  %v3647_v47 = vld [vmem:[#allocation3 + $0xb0] sm:$0xff]  ;;  %v3487_v58 = vld [vmem:[#allocation3 + $0xa0] sm:$0xff] }
 0x558   : > { %4865 = vmatprep.subr.bf16.mxu0 %v5139_v19  ;;  %v3499_v38 = vpack.c.bf16 %v3647_v47, %v3487_v58  ;;  %v3519_v13 = vld [vmem:[#allocation3 + $0xa1] sm:$0xff] }
 0x559   : > { %5042 = vmatpush3.bf16.msra.mxu1 %v5138_v36 }
 0x55a   : > { %3555 = vrot.lane.b32.xlu1 %v6614_v48, %s5186_s13  ;;  %5035 = vmatprep.subr.bf16.mxu1 %v5139_v19  ;;  %3507 = vst.msk [vmem:[#allocation4 + $0x60] sm:$0xff] %vm1409_vm13, %v3499_v38  ;;  %v3964_v38 = vld [vmem:[#allocation4 + $0x28] sm:$0xff] }
 0x55b   : > { %4866 = vmatpush3.bf16.msra.mxu0 %v5140_v9  ;;  %3771 = vrot.lane.b32.xlu0 %v3753_v61, %s5186_s13 }
 0x55c   : > { %4867 = vmatprep.subr.bf16.mxu0 %v5141_v0 }
 0x55d   : > { %5043 = vmatpush3.bf16.msra.mxu1 %v5140_v9 }
 0x55e   : > { %3843 = vrot.lane.b32.xlu1 %v6542_v27, %s5185_s17  ;;  %v6709_v27 = vld [vmem:[#allocation3 + $0x122] sm:$0xff]  ;;  %5036 = vmatprep.subr.bf16.mxu1 %v5141_v0 }
 0x55f   : > { %v3758_v28 = vpack.c.bf16 %v6709_v27, %v6566_v32  ;;  %4868 = vmatpush3.bf16.msra.mxu0 %v5142_v30  ;;  %3547 = vrot.lane.b32.xlu0 %v3880_v23, %s5186_s13  ;;  %v3868_v32 = vld [vmem:[#allocation3 + $0x71] sm:$0xff] }
 0x560   : > { %4869 = vmatprep.subr.bf16.mxu0 %v5143_v35  ;;  %v3722_v21 = vpack.c.bf16 %v3869_v33, %v3868_v32  ;;  %v3881_v41 = vpack.c.bf16 %v3868_v32, %v6678_v57  ;;  %v3882_v57 = vpack.c.bf16 %v3870_v49, %v3869_v33  ;;  %v3967_v49 = vld [vmem:[#allocation4 + $0x40] sm:$0xff] }
 0x561   : > { %5044 = vmatpush3.bf16.msra.mxu1 %v5142_v30 }
 0x562   : > { %3619 = vrot.lane.b32.xlu1 %v6557_v51, %s5185_s17  ;;  %v3813_v51 = vld [vmem:[#allocation3 + $0x120] sm:$0xff]  ;;  %5037 = vmatprep.subr.bf16.mxu1 %v5143_v35  ;;  %3730 = vst.msk [vmem:[#allocation4 + $0x50] sm:$0xff] %vm1409_vm13, %v3722_v21 }
 0x563   : > { %v3822_v6 = vpack.c.bf16 %v3814_v54, %v3813_v51  ;;  %4870 = vmatpush3.bf16.msra.mxu0 %v5144_v31  ;;  %3835 = vrot.lane.b32.xlu0 %v6600_v10, %s5185_s17  ;;  %v3662_v10 = vpack.c.bf16 %v3813_v51, %v6535_v16  ;;  %v3946_v16 = vpack.c.bf16 %v3934_v29, %v3742_v24  ;;  %v3961_v29 = vld [vmem:[#allocation4 + $0x10] sm:$0xff] }
 0x564   : > { %4871 = vmatprep.subr.bf16.mxu0 %v5145_v22 }
 0x565   : > { %5045 = vmatpush3.bf16.msra.mxu1 %v5144_v31  ;;  %3954 = vst.msk [vmem:[#allocation4 + $0x58] sm:$0xff] %vm1409_vm13, %v3946_v16 }
 0x566   : > { %3907 = vrot.lane.b32.xlu1 %v3885_v59, %s5187_s22  ;;  %5038 = vmatprep.subr.bf16.mxu1 %v5145_v22 }
 0x567   : > { %4872 = vmatpush3.bf16.msra.mxu0 %v5146_v56  ;;  %3611 = vrot.lane.b32.xlu0 %v6584_v11, %s5185_s17  ;;  %v3754_v11 = vpack.c.bf16 %v3742_v24, %v6602_v7  ;;  %v3658_v7 = vpack.c.bf16 %v3805_v53, %v6589_v15  ;;  %v3595_v15 = vpack.c.bf16 %v3743_v60, %v3583_v25 }
 0x569   : > { %5046 = vmatpush3.bf16.msra.mxu1 %v5146_v56 }
 0x56a   : > { %3683 = vrot.lane.b32.xlu1 %v3661_v5, %s5187_s22  ;;  %4997 = vmatprep.subr.bf16.mxu1 %v6746_v12  ;;  %v3659_v5 = vpack.c.bf16 %v6619_v45, %v3647_v47 }
 0x56b   : > { %3899 = vrot.lane.b32.xlu0 %v3881_v41, %s5187_s22 }
 0x56e   : > { %3781 = vrot.lane.b32.xlu1 %v3758_v28, %s5186_s13 }
 0x56f   : > { %3675 = vrot.lane.b32.xlu0 %v3657_v42, %s5187_s22 }
 0x572   : > { %3557 = vrot.lane.b32.xlu1 %v3885_v59, %s5186_s13  ;;  %v3872_v59 = vld [vmem:[#allocation3 + $0xd1] sm:$0xff] }
 0x573   : > { %3773 = vrot.lane.b32.xlu0 %v3754_v11, %s5186_s13  ;;  %v3724_v23 = vpack.c.bf16 %v6594_v39, %v3872_v59  ;;  %v3883_v39 = vpack.c.bf16 %v3872_v59, %v3871_v4 }
 0x575   : > { %3732 = vst.msk [vmem:[#allocation4 + $0x80] sm:$0xff] %vm1409_vm13, %v3724_v23  ;;  %v3970_v23 = vld [vmem:[#allocation4 + $0x58] sm:$0xff] }
 0x576   : > { %3845 = vrot.lane.b32.xlu1 %v3822_v6, %s5185_s17  ;;  %v5148_v6 = vld [vmem:[%s7009_s7 + $0x88] sm:$0xff]  }
 0x577   : > { %3837 = vrot.lane.b32.xlu0 %v3818_v62, %s5185_s17 }
 0x57a   : > { %3621 = vrot.lane.b32.xlu1 %v6575_v50, %s5185_s17  ;;  %v3520_v50 = vld [vmem:[#allocation3 + $0xb1] sm:$0xff] }
 0x57b   : > { %v3723_v46 = vpack.c.bf16 %v3871_v4, %v3520_v50  ;;  %v3531_v26 = vpack.c.bf16 %v3520_v50, %v3519_v13  ;;  %3901 = vrot.lane.b32.xlu0 %v3882_v57, %s5187_s22 }
 0x57d   : > { %3731 = vst.msk [vmem:[#allocation4 + $0x68] sm:$0xff] %vm1409_vm13, %v3723_v46 }
 0x57e   : > { %3909 = vrot.lane.b32.xlu1 %v3886_v2, %s5187_s22 }
 0x57f   : > { %3775 = vrot.lane.b32.xlu0 %v3755_v44, %s5186_s13  ;;  %v3973_v44 = vld [vmem:[#allocation4 + $0x70] sm:$0xff] }
 0x582   : > { %3685 = vrot.lane.b32.xlu1 %v3662_v10, %s5187_s22 }
 0x583   : > { %3839 = vrot.lane.b32.xlu0 %v6629_v63, %s5185_s17 }
 0x586   : > { %3549 = vrot.lane.b32.xlu1 %v3881_v41, %s5186_s13 }
 0x587   : > { %3903 = vrot.lane.b32.xlu0 %v3883_v39, %s5187_s22 }
 0x58a   : > { %3613 = vrot.lane.b32.xlu1 %v6608_v40, %s5185_s17  ;;  %v3942_v40 = vld [vmem:[#allocation3 + $0x132] sm:$0xff] }
 0x58b   : > { %v3950_v36 = vpack.c.bf16 %v3942_v40, %v6709_v27  ;;  %3777 = vrot.lane.b32.xlu0 %v3756_v55, %s5186_s13 }
 0x58d   : > { %3958 = vst.msk [vmem:[#allocation4 + $0xb8] sm:$0xff] %vm1409_vm13, %v3950_v36 }
 0x58e   : > { %3677 = vrot.lane.b32.xlu1 %v3658_v7, %s5187_s22  ;;  %v3768_v43 = vpop.permute.xlu0 %3767 }
 0x58f   : > { %3841 = vrot.lane.b32.xlu0 %v6641_v18, %s5185_s17  ;;  %3791 = vst.msk [vmem:[#allocation4 + $0x8] sm:$0xff] %vm1490_vm14, %v3768_v43 }
 0x592   : > { %3551 = vrot.lane.b32.xlu1 %v3531_v26, %s5186_s13  ;;  %v3544_v63 = vpop.permute.xlu0 %3543 }
 0x593   : > { %3905 = vrot.lane.b32.xlu0 %v6614_v48, %s5187_s22  ;;  %3567 = vst.msk [vmem:[#allocation4] sm:$0xff] %vm1490_vm14, %v3544_v63 }
 0x596   : > { %3615 = vrot.lane.b32.xlu1 %v3595_v15, %s5185_s17 }
 0x59a   : > { %3679 = vrot.lane.b32.xlu1 %v3659_v5, %s5187_s22  ;;  %v3976_v5 = vld [vmem:[#allocation4 + $0x88] sm:$0xff] }
 0x59e   : > { %3553 = vrot.lane.b32.xlu1 %v3883_v39, %s5186_s13  ;;  %v3979_v39 = vld [vmem:[#allocation4 + $0xa0] sm:$0xff] }
 0x5a0   : > { %v3896_v34 = vpop.permute.xlu0 %3895 }
 0x5a2   : > { %3617 = vrot.lane.b32.xlu1 %v6645_v20, %s5185_s17 }
 0x5a6   : > { %3681 = vrot.lane.b32.xlu1 %v3660_v1, %s5187_s22 }
 0x5b2   : > { %v3770_v48 = vpop.permute.xlu0 %3769 }
 0x5b3   : > { %3792 = vst.msk [vmem:[#allocation4 + $0x20] sm:$0xff] %vm1490_vm14, %v3770_v48 }
 0x5b5   : > { %v3832_v45 = vpop.permute.xlu1 %3831 }
 0x5b6   : > { %3855 = vst.msk [vmem:[#allocation4 + $0x8] sm:$0xff] %vm1571_vm15, %v3832_v45  ;;  %v3546_v20 = vpop.permute.xlu0 %3545 }
 0x5b7   : > { %3919 = vst.msk [vmem:[#allocation4 + $0x8] sm:$0xff] %vm1653_vm0, %v3896_v34 }
 0x5b8   : > { %3568 = vst.msk [vmem:[#allocation4 + $0x18] sm:$0xff] %vm1490_vm14, %v3546_v20 }
 0x5b9   : > { %v3608_v17 = vpop.permute.xlu1 %3607 }
 0x5ba   : > { %3631 = vst.msk [vmem:[#allocation4] sm:$0xff] %vm1571_vm15, %v3608_v17  ;;  %v3834_v3 = vpop.permute.xlu0 %3833 }
 0x5bb   : > { %3856 = vst.msk [vmem:[#allocation4 + $0x20] sm:$0xff] %vm1571_vm15, %v3834_v3 }
 0x5bd   : > { %v3672_v52 = vpop.permute.xlu1 %3671 }
 0x5be   : > { %3695 = vst.msk [vmem:[#allocation4] sm:$0xff] %vm1653_vm0, %v3672_v52  ;;  %v3960_v1 = vld [vmem:[#allocation4 + $0x8] sm:$0xff] }
 0x5bf   : > { %4153 = vmatprep.mubr.bf16.mxu0 %v3960_v1  ;;  %v3610_v9 = vpop.permute.xlu0 %3609 }
 0x5c0   : > { %3632 = vst.msk [vmem:[#allocation4 + $0x18] sm:$0xff] %vm1571_vm15, %v3610_v9 }
 0x5c3   : > { %v3898_v28 = vpop.permute.xlu0 %3897 }
 0x5c4   : > { %3920 = vst.msk [vmem:[#allocation4 + $0x20] sm:$0xff] %vm1653_vm0, %v3898_v28 }
 0x5c5   : > { %v3959_v18 = vld [vmem:[#allocation4] sm:$0xff] }
 0x5c6   : > { %4154 = vmatmul.mubr.bf16.vlgmr.msra.gmra.mrb[0].mxu0 %v3959_v18 }
 0x5c8   : > { %v3780_v8 = vpop.permute.xlu1 %3779 }
 0x5c9   : > { %3797 = vst.msk [vmem:[#allocation4 + $0x98] sm:$0xff] %vm1490_vm14, %v3780_v8  ;;  %v3674_v30 = vpop.permute.xlu0 %3673  ;;  %v3982_v8 = vld [vmem:[#allocation4 + $0xb8] sm:$0xff] }
 0x5ca   : > { %3696 = vst.msk [vmem:[#allocation4 + $0x18] sm:$0xff] %vm1653_vm0, %v3674_v30 }
 0x5cb   : > { %v3963_v31 = vld [vmem:[#allocation4 + $0x20] sm:$0xff] }
 0x5cc   : > { %v3556_v55 = vpop.permute.xlu1 %3555  ;;  %4161 = vmatprep.mubr.bf16.mxu0 %v3963_v31 }
 0x5cd   : > { %3573 = vst.msk [vmem:[#allocation4 + $0x90] sm:$0xff] %vm1490_vm14, %v3556_v55  ;;  %v3772_v54 = vpop.permute.xlu0 %3771 }
 0x5ce   : > { %3793 = vst.msk [vmem:[#allocation4 + $0x38] sm:$0xff] %vm1490_vm14, %v3772_v54 }
 0x5d0   : > { %v3844_v19 = vpop.permute.xlu1 %3843 }
 0x5d1   : > { %3861 = vst.msk [vmem:[#allocation4 + $0x98] sm:$0xff] %vm1571_vm15, %v3844_v19  ;;  %v3548_v33 = vpop.permute.xlu0 %3547  ;;  %v3962_v56 = vld [vmem:[#allocation4 + $0x18] sm:$0xff] }
 0x5d2   : > { %3569 = vst.msk [vmem:[#allocation4 + $0x30] sm:$0xff] %vm1490_vm14, %v3548_v33  ;;  %4162 = vmatmul.mubr.bf16.gmra.mrb[4].mxu0 %v3962_v56 }
 0x5d4   : > { %v3620_v27 = vpop.permute.xlu1 %3619 }
 0x5d5   : > { %3637 = vst.msk [vmem:[#allocation4 + $0x90] sm:$0xff] %vm1571_vm15, %v3620_v27  ;;  %v3836_v37 = vpop.permute.xlu0 %3835 }
 0x5d6   : > { %3857 = vst.msk [vmem:[#allocation4 + $0x38] sm:$0xff] %vm1571_vm15, %v3836_v37 }
 0x5d8   : > { %v3908_v0 = vpop.permute.xlu1 %3907 }
 0x5d9   : > { %3925 = vst.msk [vmem:[#allocation4 + $0x98] sm:$0xff] %vm1653_vm0, %v3908_v0  ;;  %v3612_v41 = vpop.permute.xlu0 %3611 }
 0x5da   : > { %3633 = vst.msk [vmem:[#allocation4 + $0x30] sm:$0xff] %vm1571_vm15, %v3612_v41 }
 0x5dc   : > { %v3684_v61 = vpop.permute.xlu1 %3683 }
 0x5dd   : > { %3701 = vst.msk [vmem:[#allocation4 + $0x90] sm:$0xff] %vm1653_vm0, %v3684_v61  ;;  %v3900_v42 = vpop.permute.xlu0 %3899 }
 0x5de   : > { %3921 = vst.msk [vmem:[#allocation4 + $0x38] sm:$0xff] %vm1653_vm0, %v3900_v42 }
 0x5e0   : > { %v3782_v35 = vpop.permute.xlu1 %3781  ;;  %v3978_v51 = vld [vmem:[#allocation4 + $0x98] sm:$0xff] }
 0x5e1   : > { %3798 = vst.msk [vmem:[#allocation4 + $0xb0] sm:$0xff] %vm1490_vm14, %v3782_v35  ;;  %4201 = vmatprep.mubr.bf16.mxu1 %v3978_v51  ;;  %v3676_v24 = vpop.permute.xlu0 %3675 }
 0x5e2   : > { %3697 = vst.msk [vmem:[#allocation4 + $0x30] sm:$0xff] %vm1653_vm0, %v3676_v24 }
 0x5e4   : > { %v3558_v22 = vpop.permute.xlu1 %3557  ;;  %v3977_v32 = vld [vmem:[#allocation4 + $0x90] sm:$0xff] }
 0x5e5   : > { %3574 = vst.msk [vmem:[#allocation4 + $0xa8] sm:$0xff] %vm1490_vm14, %v3558_v22  ;;  %4202 = vmatmul.mubr.bf16.vlgmr.msra.gmra.mrb[0].mxu1 %v3977_v32  ;;  %v3774_v46 = vpop.permute.xlu0 %3773  ;;  %v3966_v11 = vld [vmem:[#allocation4 + $0x38] sm:$0xff] }
 0x5e6   : > { %4998 = vmatpush3.bf16.msra.mxu1 %v6746_v12  ;;  %3794 = vst.msk [vmem:[#allocation4 + $0x50] sm:$0xff] %vm1490_vm14, %v3774_v46  ;;  %4169 = vmatprep.mubr.bf16.mxu0 %v3966_v11  ;;  %v6874_v46 = vld [vmem:[%s7010_s8] ss:$0 sm:$0xff] }
 0x5e7   : > { %4999 = vmatprep.subr.bf16.mxu1 %v5148_v6 }
 0x5e8   : > { %v3846_v21 = vpop.permute.xlu1 %3845 }
 0x5e9   : > { %3862 = vst.msk [vmem:[#allocation4 + $0xb0] sm:$0xff] %vm1571_vm15, %v3846_v21  ;;  %v3838_v16 = vpop.permute.xlu0 %3837  ;;  %v3965_v47 = vld [vmem:[#allocation4 + $0x30] sm:$0xff] }
 0x5ea   : > { %5000 = vmatpush3.bf16.msra.mxu1 %v5148_v6  ;;  %3858 = vst.msk [vmem:[#allocation4 + $0x50] sm:$0xff] %vm1571_vm15, %v3838_v16  ;;  %4170 = vmatmul.mubr.bf16.gmra.mrb[8].mxu0 %v3965_v47 }
 0x5ec   : > { %v3622_v2 = vpop.permute.xlu1 %3621 }
 0x5ed   : > { %3638 = vst.msk [vmem:[#allocation4 + $0xa8] sm:$0xff] %vm1571_vm15, %v3622_v2  ;;  %v3902_v62 = vpop.permute.xlu0 %3901 }
 0x5ee   : > { %3922 = vst.msk [vmem:[#allocation4 + $0x50] sm:$0xff] %vm1653_vm0, %v3902_v62 }
 0x5f0   : > { %v3910_v10 = vpop.permute.xlu1 %3909 }
 0x5f1   : > { %3926 = vst.msk [vmem:[#allocation4 + $0xb0] sm:$0xff] %vm1653_vm0, %v3910_v10  ;;  %v3776_v57 = vpop.permute.xlu0 %3775 }
 0x5f2   : > { %3795 = vst.msk [vmem:[#allocation4 + $0x68] sm:$0xff] %vm1490_vm14, %v3776_v57 }
 0x5f4   : > { %v3686_v12 = vpop.permute.xlu1 %3685 }
 0x5f5   : > { %3702 = vst.msk [vmem:[#allocation4 + $0xa8] sm:$0xff] %vm1653_vm0, %v3686_v12  ;;  %v3840_v59 = vpop.permute.xlu0 %3839  ;;  %v3969_v26 = vld [vmem:[#allocation4 + $0x50] sm:$0xff] }
 0x5f6   : > { %3859 = vst.msk [vmem:[#allocation4 + $0x68] sm:$0xff] %vm1571_vm15, %v3840_v59  ;;  %4177 = vmatprep.mubr.bf16.mxu0 %v3969_v26 }
 0x5f8   : > { %v3550_v50 = vpop.permute.xlu1 %3549  ;;  %v3981_v4 = vld [vmem:[#allocation4 + $0xb0] sm:$0xff] }
 0x5f9   : > { %3570 = vst.msk [vmem:[#allocation4 + $0x48] sm:$0xff] %vm1490_vm14, %v3550_v50  ;;  %4209 = vmatprep.mubr.bf16.mxu1 %v3981_v4  ;;  %v3904_v15 = vpop.permute.xlu0 %3903 }
 0x5fa   : > { %3923 = vst.msk [vmem:[#allocation4 + $0x68] sm:$0xff] %vm1653_vm0, %v3904_v15 }
 0x5fc   : > { %v3614_v53 = vpop.permute.xlu1 %3613  ;;  %v3980_v14 = vld [vmem:[#allocation4 + $0xa8] sm:$0xff] }
 0x5fd   : > { %3634 = vst.msk [vmem:[#allocation4 + $0x48] sm:$0xff] %vm1571_vm15, %v3614_v53  ;;  %4210 = vmatmul.mubr.bf16.gmra.mrb[4].mxu1 %v3980_v14  ;;  %v3778_v36 = vpop.permute.xlu0 %3777 }
 0x5fe   : > { %5001 = vmatprep.mubr.msk.bf16.mxu1 %vm1409_vm13, %v3961_v29  ;;  %3796 = vst.msk [vmem:[#allocation4 + $0x80] sm:$0xff] %vm1490_vm14, %v3778_v36 }
 0x600   : > { %v3678_v58 = vpop.permute.xlu1 %3677 }
 0x601   : > { %3698 = vst.msk [vmem:[#allocation4 + $0x48] sm:$0xff] %vm1653_vm0, %v3678_v58  ;;  %v3842_v17 = vpop.permute.xlu0 %3841  ;;  %v3972_v63 = vld [vmem:[#allocation4 + $0x68] sm:$0xff] }
 0x602   : > { %3860 = vst.msk [vmem:[#allocation4 + $0x80] sm:$0xff] %vm1571_vm15, %v3842_v17 }
 0x604   : > { %v3552_v7 = vpop.permute.xlu1 %3551 }
 0x605   : > { %3571 = vst.msk [vmem:[#allocation4 + $0x60] sm:$0xff] %vm1490_vm14, %v3552_v7  ;;  %5002 = vmatmul.mubr.msk.bf16.vlgmr.msra.gmra.mrb[8].mxu1 %vm1409_vm13, %v3964_v38  ;;  %v3906_v34 = vpop.permute.xlu0 %3905 }
 0x606   : > { %5005 = vmatprep.mubr.msk.bf16.mxu1 %vm1409_vm13, %v3967_v49  ;;  %3924 = vst.msk [vmem:[#allocation4 + $0x80] sm:$0xff] %vm1653_vm0, %v3906_v34 }
 0x608   : > { %v3616_v13 = vpop.permute.xlu1 %3615  ;;  %v3968_v60 = vld [vmem:[#allocation4 + $0x48] sm:$0xff] }
 0x609   : > { %3635 = vst.msk [vmem:[#allocation4 + $0x60] sm:$0xff] %vm1571_vm15, %v3616_v13  ;;  %4178 = vmatmul.mubr.bf16.gmra.mrb[12].mxu0 %v3968_v60 }
 0x60a   : > { %4185 = vmatprep.mubr.bf16.mxu0 %v3972_v63 }
 0x60c   : > { %v3680_v25 = vpop.permute.xlu1 %3679 }
 0x60d   : > { %3699 = vst.msk [vmem:[#allocation4 + $0x60] sm:$0xff] %vm1653_vm0, %v3680_v25  ;;  %5006 = vmatmul.mubr.msk.bf16.gmra.mrb[12].mxu1 %vm1409_vm13, %v3970_v23  ;;  %v3975_v55 = vld [vmem:[#allocation4 + $0x80] sm:$0xff] }
 0x60e   : > { %5009 = vmatprep.mubr.msk.bf16.mxu1 %vm1409_vm13, %v3973_v44 }
 0x610   : > { %v3554_v40 = vpop.permute.xlu1 %3553 }
 0x611   : > { %3572 = vst.msk [vmem:[#allocation4 + $0x78] sm:$0xff] %vm1490_vm14, %v3554_v40 }
 0x614   : > { %v3618_v45 = vpop.permute.xlu1 %3617  ;;  %v3971_v43 = vld [vmem:[#allocation4 + $0x60] sm:$0xff] }
 0x615   : > { %3636 = vst.msk [vmem:[#allocation4 + $0x78] sm:$0xff] %vm1571_vm15, %v3618_v45  ;;  %5010 = vmatmul.mubr.msk.bf16.gmra.mrb[16].mxu1 %vm1409_vm13, %v3976_v5  ;;  %4186 = vmatmul.mubr.bf16.gmra.mrb[16].mxu0 %v3971_v43 }
 0x616   : > { %5013 = vmatprep.mubr.msk.bf16.mxu1 %vm1409_vm13, %v3979_v39  ;;  %4193 = vmatprep.mubr.bf16.mxu0 %v3975_v55 }
 0x618   : > { %v3682_v52 = vpop.permute.xlu1 %3681 }
 0x619   : > { %3700 = vst.msk [vmem:[#allocation4 + $0x78] sm:$0xff] %vm1653_vm0, %v3682_v52 }
 0x61d   : > { %5014 = vmatmul.mubr.msk.bf16.gmra.mrb[20].mxu1 %vm1409_vm13, %v3982_v8 }
 0x620   : > { %v3974_v48 = vld [vmem:[#allocation4 + $0x78] sm:$0xff] }
 0x621   : > { %4194 = vmatmul.mubr.bf16.gmra.mrb[20].mxu0 %v3974_v48 }
 0x699   : > { %v4873_v18 = vpop.f32.mrb[0].mxu0 }
 0x69a   : > { %v4874_v20 = vpop.f32.mrb[1].mxu0 }
 0x69b   : > { %v4875_v1 = vadd.f32 %v4874_v20, %v4873_v18  ;;  %v4876_v19 = vpop.f32.mrb[2].mxu0 }
 0x69c   : > { %v4877_v3 = vpop.f32.mrb[3].mxu0 }
 0x69d   : > { %v4878_v27 = vadd.f32 %v4877_v3, %v4876_v19  ;;  %v4156_v53 = vadd.f32 %v4875_v1, %v6874_v46 }
 0x69f   : > { %v4159_v38 = vadd.f32 %v4878_v27, %v6874_v46 }
 0x6a5   : > { %v4879_v28 = vpop.f32.mrb[4].mxu0 }
 0x6a6   : > { %v4880_v35 = vpop.f32.mrb[5].mxu0 }
 0x6a7   : > { %v4881_v54 = vadd.f32 %v4880_v35, %v4879_v28  ;;  %v4882_v31 = vpop.f32.mrb[6].mxu0 }
 0x6a8   : > { %v4883_v22 = vpop.f32.mrb[7].mxu0 }
 0x6a9   : > { %v4884_v32 = vadd.f32 %v4883_v22, %v4882_v31  ;;  %v4164_v11 = vadd.f32 %v4881_v54, %v6874_v46 }
 0x6ab   : > { %v4167_v47 = vadd.f32 %v4884_v32, %v6874_v46 }
 0x6b8   : > { %v4909_v9 = vpop.f32.mrb[0].mxu1 }
 0x6b9   : > { %v4910_v0 = vpop.f32.mrb[1].mxu1 }
 0x6ba   : > { %v6865_v61 = vadd.f32 %v4910_v0, %v4909_v9  ;;  %v4912_v30 = vpop.f32.mrb[2].mxu1 }
 0x6bb   : > { %v4913_v51 = vpop.f32.mrb[3].mxu1 }
 0x6bc   : > { %v6867_v6 = vadd.f32 %v4913_v51, %v4912_v30  ;;  %v4204_v51 = vadd.f32 %v6865_v61, %v6874_v46 }
 0x6bd   : > { %v4885_v21 = vpop.f32.mrb[8].mxu0 }
 0x6be   : > { %v4886_v41 = vpop.f32.mrb[9].mxu0 }
 0x6bf   : > { %v4887_v42 = vadd.f32 %v4886_v41, %v4885_v21  ;;  %v4888_v12 = vpop.f32.mrb[10].mxu0  ;;  %v4207_v21 = vadd.f32 %v6867_v6, %v6874_v46 }
 0x6c0   : > { %v4889_v50 = vpop.f32.mrb[11].mxu0 }
 0x6c1   : > { %v4890_v4 = vadd.f32 %v4889_v50, %v4888_v12  ;;  %v4172_v26 = vadd.f32 %v4887_v42, %v6874_v46 }
 0x6c3   : > { %v4175_v39 = vadd.f32 %v4890_v4, %v6874_v46 }
 0x6d0   : > { %v4915_v33 = vpop.f32.mrb[4].mxu1 }
 0x6d1   : > { %v4916_v56 = vpop.f32.mrb[5].mxu1 }
 0x6d2   : > { %v4917_v37 = vadd.f32 %v4916_v56, %v4915_v33  ;;  %v4918_v2 = vpop.f32.mrb[6].mxu1 }
 0x6d3   : > { %v4919_v10 = vpop.f32.mrb[7].mxu1 }
 0x6d4   : > { %v6869_v24 = vadd.f32 %v4919_v10, %v4918_v2  ;;  %v4212_v28 = vadd.f32 %v4917_v37, %v6874_v46 }
 0x6d6   : > { %v4215_v32 = vadd.f32 %v6869_v24, %v6874_v46 }
 0x6d8   : > { %v5003_v29 = vpop.f32.mrb[8].mxu1 }
 0x6d9   : > { %v4261_v14 = vadd.f32 %v5003_v29, %v4164_v11  ;;  %v4252_v16 = vpop.f32.mrb[9].mxu1 }
 0x6da   : > { %v4253_v58 = vadd.f32 %v4252_v16, %v4156_v53  ;;  %v5004_v62 = vpop.f32.mrb[10].mxu1 }
 0x6db   : > { %v4264_v49 = vadd.f32 %v5004_v62, %v4167_v47  ;;  %v4255_v7 = vpop.f32.mrb[11].mxu1 }
 0x6dc   : > { %v4256_v57 = vadd.f32 %v4255_v7, %v4159_v38  ;;  %4377 = vrot.lane.b32.xlu1 %v4253_v58, %s5188_s19  ;;  %4315 = vxpose.xlu0.b32.start [1/16] (narrow) %v4253_v58, 16  ;;  %v4891_v13 = vpop.f32.mrb[12].mxu0 }
 0x6dd   : > { %v4892_v60 = vpop.f32.mrb[13].mxu0 }
 0x6de   : > { %v4893_v23 = vadd.f32 %v4892_v60, %v4891_v13  ;;  %v4894_v44 = vpop.f32.mrb[14].mxu0 }
 0x6df   : > { %v4895_v15 = vpop.f32.mrb[15].mxu0 }
 0x6e0   : > { %v5007_v59 = vpop.f32.mrb[12].mxu1  ;;  %4379 = vrot.lane.b32.xlu1 %v4256_v57, %s5188_s19  ;;  %4316 = vxpose.xlu0.b32.cont [2/16] (narrow) %v4256_v57, 16  ;;  %v4180_v36 = vadd.f32 %v4893_v23, %v6874_v46  ;;  %v4896_v45 = vadd.f32 %v4895_v15, %v4894_v44 }
 0x6e1   : > { %v4268_v25 = vpop.f32.mrb[13].mxu1 }
 0x6e2   : > { %v4269_v40 = vadd.f32 %v4268_v25, %v4172_v26  ;;  %v5008_v5 = vpop.f32.mrb[14].mxu1  ;;  %v4183_v63 = vadd.f32 %v4896_v45, %v6874_v46  ;;  %v4277_v52 = vadd.f32 %v5007_v59, %v4180_v36 }
 0x6e3   : > { %v4271_v43 = vpop.f32.mrb[15].mxu1 }
 0x6e4   : > { %v4272_v17 = vadd.f32 %v4271_v43, %v4175_v39  ;;  %4381 = vrot.lane.b32.xlu1 %v4261_v14, %s5188_s19  ;;  %4317 = vxpose.xlu0.b32.cont [3/16] (narrow) %v4261_v14, 16  ;;  %v4280_v34 = vadd.f32 %v5008_v5, %v4183_v63 }
 0x6e8   : > { %4383 = vrot.lane.b32.xlu1 %v4264_v49, %s5188_s19  ;;  %4318 = vxpose.xlu0.b32.cont [4/16] (narrow) %v4264_v49, 16  ;;  %v5011_v8 = vpop.f32.mrb[16].mxu1  ;;  %v4897_v55 = vpop.f32.mrb[16].mxu0 }
 0x6e9   : > { %v4284_v48 = vpop.f32.mrb[17].mxu1  ;;  %v4898_v20 = vpop.f32.mrb[17].mxu0 }
 0x6ea   : > { %v5012_v18 = vpop.f32.mrb[18].mxu1  ;;  %v4899_v19 = vadd.f32 %v4898_v20, %v4897_v55  ;;  %v4900_v3 = vpop.f32.mrb[18].mxu0 }
 0x6eb   : > { %v4287_v1 = vpop.f32.mrb[19].mxu1  ;;  %v4901_v27 = vpop.f32.mrb[19].mxu0 }
 0x6ec   : > { %4385 = vrot.lane.b32.xlu1 %v4269_v40, %s5188_s19  ;;  %4319 = vxpose.xlu0.b32.cont [5/16] (narrow) %v4269_v40, 16  ;;  %v4188_v9 = vadd.f32 %v4899_v19, %v6874_v46  ;;  %v4902_v0 = vadd.f32 %v4901_v27, %v4900_v3 }
 0x6ee   : > { %v4191_v30 = vadd.f32 %v4902_v0, %v6874_v46  ;;  %v4285_v54 = vadd.f32 %v4284_v48, %v4188_v9 }
 0x6f0   : > { %v5015_v35 = vpop.f32.mrb[20].mxu1  ;;  %4387 = vrot.lane.b32.xlu1 %v4272_v17, %s5188_s19  ;;  %4320 = vxpose.xlu0.b32.cont [6/16] (narrow) %v4272_v17, 16  ;;  %v4288_v37 = vadd.f32 %v4287_v1, %v4191_v30 }
 0x6f1   : > { %v4309_v31 = vadd.f32 %v5015_v35, %v4212_v28  ;;  %v4300_v22 = vpop.f32.mrb[21].mxu1 }
 0x6f2   : > { %v4301_v33 = vadd.f32 %v4300_v22, %v4204_v51  ;;  %v5016_v56 = vpop.f32.mrb[22].mxu1 }
 0x6f3   : > { %v4312_v2 = vadd.f32 %v5016_v56, %v4215_v32  ;;  %v4303_v41 = vpop.f32.mrb[23].mxu1 }
 0x6f4   : > { %v4304_v10 = vadd.f32 %v4303_v41, %v4207_v21  ;;  %4389 = vrot.lane.b32.xlu1 %v4277_v52, %s5188_s19  ;;  %4321 = vxpose.xlu0.b32.cont [7/16] (narrow) %v4277_v52, 16  ;;  %v4903_v42 = vpop.f32.mrb[20].mxu0 }
 0x6f5   : > { %v4904_v61 = vpop.f32.mrb[21].mxu0 }
 0x6f6   : > { %v4905_v12 = vadd.f32 %v4904_v61, %v4903_v42  ;;  %v4906_v50 = vpop.f32.mrb[22].mxu0 }
 0x6f7   : > { %v4907_v24 = vpop.f32.mrb[23].mxu0 }
 0x6f8   : > { %4391 = vrot.lane.b32.xlu1 %v4280_v34, %s5188_s19  ;;  %4322 = vxpose.xlu0.b32.cont [8/16] (narrow) %v4280_v34, 16  ;;  %v4196_v4 = vadd.f32 %v4905_v12, %v6874_v46  ;;  %v4908_v11 = vadd.f32 %v4907_v24, %v4906_v50 }
 0x6fa   : > { %v4199_v6 = vadd.f32 %v4908_v11, %v6874_v46  ;;  %v4293_v29 = vadd.f32 %v5011_v8, %v4196_v4 }
 0x6fc   : > { %4393 = vrot.lane.b32.xlu1 %v4285_v54, %s5188_s19  ;;  %4323 = vxpose.xlu0.b32.cont [9/16] (narrow) %v4285_v54, 16  ;;  %v4296_v53 = vadd.f32 %v5012_v18, %v4199_v6 }
 0x700   : > { %4395 = vrot.lane.b32.xlu1 %v4288_v37, %s5188_s19  ;;  %4324 = vxpose.xlu0.b32.cont [10/16] (narrow) %v4288_v37, 16 }
 0x704   : > { %4397 = vrot.lane.b32.xlu1 %v4293_v29, %s5188_s19  ;;  %4325 = vxpose.xlu0.b32.cont [11/16] (narrow) %v4293_v29, 16 }
 0x708   : > { %4399 = vrot.lane.b32.xlu1 %v4296_v53, %s5188_s19  ;;  %4326 = vxpose.xlu0.b32.cont [12/16] (narrow) %v4296_v53, 16 }
 0x70c   : > { %4401 = vrot.lane.b32.xlu1 %v4301_v33, %s5188_s19  ;;  %4327 = vxpose.xlu0.b32.cont [13/16] (narrow) %v4301_v33, 16 }
 0x710   : > { %4403 = vrot.lane.b32.xlu1 %v4304_v10, %s5188_s19  ;;  %4328 = vxpose.xlu0.b32.cont [14/16] (narrow) %v4304_v10, 16 }
 0x714   : > { %4405 = vrot.lane.b32.xlu1 %v4309_v31, %s5188_s19  ;;  %4329 = vxpose.xlu0.b32.cont [15/16] (narrow) %v4309_v31, 16 }
 0x718   : > { %4330 = vxpose.xlu0.b32.end [16/16] (narrow) %v4312_v2, 16 }
 0x74e   : > { %v4378_v46 = vpop.permute.xlu1 %4377 }
 0x74f   : > { %4426 = vst.msk [vmem:[%s7012_s10] sm:$0xff] %vm4425_vm1, %v4378_v46 }
 0x752   : > { %v4380_v14 = vpop.permute.xlu1 %4379 }
 0x753   : > { %4427 = vst.msk [vmem:[%s7012_s10 + $0x8] sm:$0xff] %vm4425_vm1, %v4380_v14 }
 0x756   : > { %v4382_v16 = vpop.permute.xlu1 %4381 }
 0x757   : > { %4428 = vst.msk [vmem:[%s7012_s10 + $0x10] sm:$0xff] %vm4425_vm1, %v4382_v16 }
 0x75a   : > { %v4384_v47 = vpop.permute.xlu1 %4383 }
 0x75b   : > { %4429 = vst.msk [vmem:[%s7012_s10 + $0x18] sm:$0xff] %vm4425_vm1, %v4384_v47 }
 0x75c   : > { %v4331_v58 = vpop.trf.xlu0 }
 0x75d   : > { %4348 = vst.msk [vmem:[%s7011_s9] sm:$0xff] %vm4347_vm2, %v4331_v58  ;;  %4352 = vrot.lane.b32.xlu1 %v4331_v58, %s5185_s17 }
 0x75e   : > { %v4386_v62 = vpop.permute.xlu1 %4385 }
 0x75f   : > { %4430 = vst.msk [vmem:[%s7012_s10 + $0x20] sm:$0xff] %vm4425_vm1, %v4386_v62 }
 0x760   : > { %v4332_v38 = vpop.trf.xlu0 }
 0x761   : > { %4349 = vst.msk [vmem:[%s7011_s9 + $0x8] sm:$0xff] %vm4347_vm2, %v4332_v38  ;;  %4354 = vrot.lane.b32.xlu1 %v4332_v38, %s5185_s17 }
 0x762   : > { %v4388_v49 = vpop.permute.xlu1 %4387 }
 0x763   : > { %4431 = vst.msk [vmem:[%s7012_s10 + $0x28] sm:$0xff] %vm4425_vm1, %v4388_v49 }
 0x765   : > { %4407 = vrot.lane.b32.xlu1 %v4312_v2, %s5188_s19 }
 0x766   : > { %v4390_v7 = vpop.permute.xlu1 %4389 }
 0x767   : > { %4432 = vst.msk [vmem:[%s7012_s10 + $0x30] sm:$0xff] %vm4425_vm1, %v4390_v7 }
 0x76a   : > { %v4392_v57 = vpop.permute.xlu1 %4391 }
 0x76b   : > { %4433 = vst.msk [vmem:[%s7012_s10 + $0x38] sm:$0xff] %vm4425_vm1, %v4392_v57 }
 0x76e   : > { %v4394_v13 = vpop.permute.xlu1 %4393 }
 0x76f   : > { %4434 = vst.msk [vmem:[%s7012_s10 + $0x40] sm:$0xff] %vm4425_vm1, %v4394_v13 }
 0x772   : > { %v4396_v60 = vpop.permute.xlu1 %4395 }
 0x773   : > { %4435 = vst.msk [vmem:[%s7012_s10 + $0x48] sm:$0xff] %vm4425_vm1, %v4396_v60 }
 0x776   : > { %v4398_v59 = vpop.permute.xlu1 %4397 }
 0x777   : > { %4436 = vst.msk [vmem:[%s7012_s10 + $0x50] sm:$0xff] %vm4425_vm1, %v4398_v59 }
 0x77a   : > { %v4400_v26 = vpop.permute.xlu1 %4399 }
 0x77b   : > { %4437 = vst.msk [vmem:[%s7012_s10 + $0x58] sm:$0xff] %vm4425_vm1, %v4400_v26 }
 0x77e   : > { %v4402_v23 = vpop.permute.xlu1 %4401 }
 0x77f   : > { %4438 = vst.msk [vmem:[%s7012_s10 + $0x60] sm:$0xff] %vm4425_vm1, %v4402_v23 }
 0x782   : > { %v4404_v44 = vpop.permute.xlu1 %4403 }
 0x783   : > { %4439 = vst.msk [vmem:[%s7012_s10 + $0x68] sm:$0xff] %vm4425_vm1, %v4404_v44 }
 0x786   : > { %v4406_v25 = vpop.permute.xlu1 %4405 }
 0x787   : > { %4440 = vst.msk [vmem:[%s7012_s10 + $0x70] sm:$0xff] %vm4425_vm1, %v4406_v25 }
 0x7cf   : > { %v4353_v15 = vpop.permute.xlu1 %4352 }
 0x7d0   : > { %4688 = vst.msk [vmem:[%s7011_s9 + $0x10] sm:$0xff] %vm4347_vm2, %v4353_v15 }
 0x7d3   : > { %v4355_v40 = vpop.permute.xlu1 %4354 }
 0x7d4   : > { %4689 = vst.msk [vmem:[%s7011_s9 + $0x18] sm:$0xff] %vm4347_vm2, %v4355_v40 }
 0x7d7   : > { %v4408_v36 = vpop.permute.xlu1 %4407 }
 0x7d8   : > { %4441 = vst.msk [vmem:[%s7012_s10 + $0x78] sm:$0xff] %vm4425_vm1, %v4408_v36 }
 0x7d9 PF: > { %s21_s15 = sadd.s32 1, %s5171_s15   ;;  %s7018_s13 = smov %s5167_s14 }
 0x7da   : > { %p18_p7 = scmp.ge.s32.totalorder %s21_s15, 4   ;;  %s7019_s14 = smov %s7021_s16 }
 0x7dc   :  { %20 = sbr.rel (!%p18_p7) target bundleno = 2 (0x2), region = 126 }

</bundles_post_ra>
